<compile_context>
chip_gen: v7x
topology: tpu7x:2x2x1
jax: 0.10.0
libtpu: 0.0.40
codegen_flags: <defaults>
</compile_context>

<pallas_src>
import functools
import math

import jax
import jax.numpy as jnp
from jax.experimental import pallas as pl
from jax.experimental.pallas import tpu as pltpu


# ------------------------------ tiling helpers ------------------------------ #

def _largest_tile(n, max_tile, multiple=8):
    """Largest divisor of n that is a multiple of `multiple` and <= max_tile.

    Falls back to n itself (a full-extent block is always legal) when no such
    divisor exists.  Avoids partial blocks entirely, so no masking / garbage-key
    issues in the softmax and no `M % tm` runtime assertion failures.
    """
    t = (max_tile // multiple) * multiple
    while t >= multiple:
        if n % t == 0:
            return t
        t -= multiple
    return n


# --------------------------- fused K|V projection --------------------------- #

def _linear_kernel(x_ref, w_ref, o_ref):
    # x: (TM, K), w: (K, Nout) -> o: (TM, Nout); f32 accumulation on the MXU.
    o_ref[...] = jnp.dot(x_ref[...], w_ref[...],
                         preferred_element_type=jnp.float32).astype(o_ref.dtype)


def linear_nobias(x, w, *, max_tile=1024):
    """(M, K) @ (K, Nout) with no bias (the 1x1-conv projections have qkv_bias=False)."""
    M, K = x.shape
    K2, Nout = w.shape
    assert K == K2
    tm = _largest_tile(M, max_tile)
    cost = pl.CostEstimate(
        flops=int(2 * M * K * Nout),
        transcendentals=0,
        bytes_accessed=int((M * K + K * Nout + M * Nout) * 4),
    )
    return pl.pallas_call(
        _linear_kernel,
        out_shape=jax.ShapeDtypeStruct((M, Nout), x.dtype),
        grid_spec=pltpu.PrefetchScalarGridSpec(
            num_scalar_prefetch=0,
            grid=(M // tm,),
            in_specs=[
                pl.BlockSpec((tm, K), lambda i: (i, 0)),
                pl.BlockSpec((K, Nout), lambda i: (0, 0)),
            ],
            out_specs=pl.BlockSpec((tm, Nout), lambda i: (i, 0)),
        ),
        compiler_params=pltpu.CompilerParams(
            dimension_semantics=("parallel",),
            vmem_limit_bytes=48 * 1024 * 1024,
        ),
        cost_estimate=cost,
    )(x, w)


# ----------------------- flash attention (fused kernel) ---------------------- #

def _flash_attn_kernel(x_ref, kv_ref, wq_ref, wp_ref, bp_ref, o_ref,
                       q_s, m_s, l_s, acc_s, *, num_heads, softmax_temp):
    ki = pl.program_id(2)
    C = q_s.shape[-1]
    D = C // num_heads

    @pl.when(ki == 0)
    def _():
        # q projection for this (batch, q-tile); fold the softmax temperature in
        # here (scales tq*C elements once instead of tq*tk per kv step).
        q_s[...] = jnp.dot(x_ref[...].astype(jnp.float32), wq_ref[...],
                           preferred_element_type=jnp.float32) * softmax_temp
        m_s[...] = jnp.full(m_s.shape, -jnp.inf, m_s.dtype)
        l_s[...] = jnp.zeros(l_s.shape, l_s.dtype)
        acc_s[...] = jnp.zeros(acc_s.shape, acc_s.dtype)

    q = q_s[...]                               # (tq, C) f32, temperature-scaled
    kv = kv_ref[...].astype(jnp.float32)       # (tk, 2C): [k | v]
    k = kv[:, :C]
    v = kv[:, C:]
    m_prev_all = m_s[...]                      # (tq, heads)
    l_prev_all = l_s[...]                      # (tq, heads)
    acc_prev = acc_s[...]                      # (tq, C)

    m_cols, l_cols, acc_cols = [], [], []
    for h in range(num_heads):                 # static unroll; small head count
        sl = slice(h * D, (h + 1) * D)
        # scores (tq, tk): contract head_dim on the MXU (no explicit transpose).
        s = jax.lax.dot_general(q[:, sl], k[:, sl], (((1,), (1,)), ((), ())),
                                preferred_element_type=jnp.float32)
        m_prev = m_prev_all[:, h:h + 1]
        m_new = jnp.maximum(m_prev, jnp.max(s, axis=-1, keepdims=True))
        alpha = jnp.exp(m_prev - m_new)
        p = jnp.exp(s - m_new)
        l_cols.append(alpha * l_prev_all[:, h:h + 1]
                      + jnp.sum(p, axis=-1, keepdims=True))
        acc_cols.append(alpha * acc_prev[:, sl]
                        + jnp.dot(p, v[:, sl], preferred_element_type=jnp.float32))
        m_cols.append(m_new)

    # Single full-width stores back to scratch (lane-dense for acc).
    m_s[...] = jnp.concatenate(m_cols, axis=-1)
    l_s[...] = jnp.concatenate(l_cols, axis=-1)
    acc_s[...] = jnp.concatenate(acc_cols, axis=-1)

    @pl.when(ki == pl.num_programs(2) - 1)
    def _():
        inv_l = pl.reciprocal(l_s[...], approx=True)        # EUP slot, ~free
        acc = acc_s[...]
        msg = jnp.concatenate(
            [acc[:, h * D:(h + 1) * D] * inv_l[:, h:h + 1]
             for h in range(num_heads)], axis=-1)           # (tq, C) head-major
        # Fused output Linear: msg @ wp + bp, stored lane-dense as (tq, C).
        out = jnp.dot(msg, wp_ref[...],
                      preferred_element_type=jnp.float32) + bp_ref[...]
        o_ref[...] = out.astype(o_ref.dtype)


def flash_attention(x, kv, wq, wp, bp, num_heads, *, max_q_tile=512, max_kv_tile=512):
    """x: (B, N, C) tokens; kv: (B, N, 2C) projected [k|v]; returns (B, N, C)."""
    B, N, C = x.shape
    assert kv.shape == (B, N, 2 * C)
    assert C % num_heads == 0
    D = C // num_heads
    softmax_temp = 1.0 / math.sqrt(D)

    # Tile sizes: divisors of N, multiples of 8, capped so q-tile + double-buffered
    # kv tiles + (tq, tk) score blocks stay well inside 64 MiB (v7x) VMEM.
    tq = _largest_tile(N, max_q_tile)
    tk = _largest_tile(N, max_kv_tile)
    nq = N // tq
    nk = N // tk

    wq32 = wq.astype(jnp.float32)
    wp32 = wp.astype(jnp.float32)
    bp2 = bp.reshape(1, C).astype(jnp.float32)

    kernel = functools.partial(_flash_attn_kernel,
                               num_heads=num_heads, softmax_temp=softmax_temp)

    cost = pl.CostEstimate(
        flops=int(4 * B * N * N * C + 4 * B * N * C * C),
        transcendentals=int(B * num_heads * N * N),
        bytes_accessed=int((x.size + kv.size + wq32.size + wp32.size + B * N * C) * 4),
    )

    return pl.pallas_call(
        kernel,
        out_shape=jax.ShapeDtypeStruct((B, N, C), x.dtype),
        grid_spec=pltpu.PrefetchScalarGridSpec(
            num_scalar_prefetch=0,
            grid=(B, nq, nk),
            in_specs=[
                pl.BlockSpec((None, tq, C), lambda b, qi, ki: (b, qi, 0)),       # x
                pl.BlockSpec((None, tk, 2 * C), lambda b, qi, ki: (b, ki, 0)),   # kv
                pl.BlockSpec((C, C), lambda b, qi, ki: (0, 0)),                  # wq
                pl.BlockSpec((C, C), lambda b, qi, ki: (0, 0)),                  # wp
                pl.BlockSpec((1, C), lambda b, qi, ki: (0, 0)),                  # bp
            ],
            out_specs=pl.BlockSpec((None, tq, C), lambda b, qi, ki: (b, qi, 0)),
            scratch_shapes=[
                pltpu.VMEM((tq, C), jnp.float32),          # q (projected, scaled)
                pltpu.VMEM((tq, num_heads), jnp.float32),  # running max m
                pltpu.VMEM((tq, num_heads), jnp.float32),  # running sum l
                pltpu.VMEM((tq, C), jnp.float32),          # output accumulator
            ],
        ),
        compiler_params=pltpu.CompilerParams(
            dimension_semantics=("parallel", "parallel", "arbitrary"),
            vmem_limit_bytes=48 * 1024 * 1024,
        ),
        cost_estimate=cost,
    )(x, kv, wq32, wp32, bp2)


# --------------------------- module forward (glue) -------------------------- #

def init_params(key, dim):
    """Deterministic synthetic init mirroring the module's __init__ shapes."""
    kq, kk, kv, kp = jax.random.split(key, 4)

    def tn(k, shape, std=0.02):  # trunc_normal_(std=0.02)-style init
        return std * jax.random.truncated_normal(k, -2.0, 2.0, shape, jnp.float32)

    return {
        # 1x1 conv weights (C_out, C_in, 1, 1) stored transposed as (C_in, C_out)
        "wq": tn(kq, (dim, dim)),
        "wk": tn(kk, (dim, dim)),
        "wv": tn(kv, (dim, dim)),
        # nn.Linear(dim, dim): weight (out, in) stored as (in, out), bias zeros
        "wp": tn(kp, (dim, dim)),
        "bp": jnp.zeros((dim,), jnp.float32),
    }


def quadtree_attention_forward(params, x, target, H, W, num_heads):
    """QuadtreeAttention.forward with scale=1, attn_type='B' (module defaults)."""
    B, N, C = x.shape
    assert N == H * W and C % num_heads == 0

    # Fused K|V projection: one read of `target`, one wide matmul -> (B, N, 2C).
    wkv = jnp.concatenate([params["wk"], params["wv"]], axis=1)   # (C, 2C)
    kv = linear_nobias(target.reshape(B * N, C), wkv).reshape(B, N, 2 * C)

    # q projection, multi-head softmax attention and the output Linear are all
    # fused inside the flash-attention kernel.  attn_drop / proj_drop (p=0.0)
    # are identities.
    return flash_attention(x, kv, params["wq"], params["wp"], params["bp"], num_heads)


# H, W, num_heads are static; jit fuses the wk|wv concat and removes per-call
# Python dispatch overhead around the two pallas_calls.
quadtree_attention_forward_jit = jax.jit(quadtree_attention_forward,
                                         static_argnums=(3, 4, 5))


def reference(params, x, target, num_heads):
    """Plain-JAX reference of the same forward (for a correctness check)."""
    B, N, C = x.shape
    D = C // num_heads
    q = (x @ params["wq"]).reshape(B, N, num_heads, D)
    k = (target @ params["wk"]).reshape(B, N, num_heads, D)
    v = (target @ params["wv"]).reshape(B, N, num_heads, D)
    s = jnp.einsum("nlhd,nshd->nlsh", q, k) * (1.0 / (D ** 0.5))
    a = jax.nn.softmax(s, axis=2)
    m = jnp.einsum("nlsh,nshd->nlhd", a, v).reshape(B, N, C)
    return m @ params["wp"] + params["bp"]


if __name__ == "__main__":
    key = jax.random.PRNGKey(0)
    B, Himg, Wimg = 2, 8, 8
    dim, num_heads = 32, 4
    N = Himg * Wimg

    kx, kt, kp = jax.random.split(key, 3)
    x = jax.random.normal(kx, (B, N, dim), jnp.float32)
    target = jax.random.normal(kt, (B, N, dim), jnp.float32)
    params = init_params(kp, dim)

    out = quadtree_attention_forward_jit(params, x, target, Himg, Wimg, num_heads)
    out = jax.block_until_ready(out)

    ref = reference(params, x, target, num_heads)
    assert out.shape == (B, N, dim)
    max_err = float(jnp.max(jnp.abs(out - ref)))
    assert jnp.allclose(out, ref, atol=1e-3, rtol=1e-3), f"mismatch vs reference: {max_err}"
    print("KERNEL_OK")
</pallas_src>

<mosaic_0001>
module attributes {stable_mosaic.version = 11 : i64} {
  func.func @_linear_kernel(%arg0: i32, %arg1: memref<128x32xf32, #tpu.memory_space<vmem>>, %arg2: memref<32x64xf32, #tpu.memory_space<vmem>>, %arg3: memref<128x64xf32, #tpu.memory_space<vmem>>) attributes {dimension_semantics = [#tpu.dimension_semantics<parallel>], iteration_bounds = array<i64: 1>, scalar_prefetch = 0 : i64, scratch_operands = 0 : i64, tpu.core_type = #tpu.core_type<tc>, window_params = [{transform_indices = @transform_0, window_bounds = array<i64: 128, 32>}, {pipeline_mode = #tpu.pipeline_mode<synchronous>, transform_indices = @transform_1, window_bounds = array<i64: 32, 64>}, {transform_indices = @transform_2, window_bounds = array<i64: 128, 64>}]} {
    %c0 = arith.constant 0 : index
    %c0_0 = arith.constant 0 : index
    %0 = vector.load %arg1[%c0, %c0_0] : memref<128x32xf32, #tpu.memory_space<vmem>>, vector<128x32xf32>
    %c0_1 = arith.constant 0 : index
    %c0_2 = arith.constant 0 : index
    %1 = vector.load %arg2[%c0_1, %c0_2] : memref<32x64xf32, #tpu.memory_space<vmem>>, vector<32x64xf32>
    %cst = arith.constant dense<0.000000e+00> : vector<128x64xf32>
    %2 = tpu.matmul %0, %1, %cst {dimension_numbers = #tpu.dot_dimension_numbers<[1], [0], [0], [1], [0, 0, 1, 1], [], []>} : vector<128x32xf32>, vector<32x64xf32>, vector<128x64xf32> -> vector<128x64xf32>
    %c0_3 = arith.constant 0 : index
    %c0_4 = arith.constant 0 : index
    %3 = vector.load %arg3[%c0_3, %c0_4] : memref<128x64xf32, #tpu.memory_space<vmem>>, vector<128x64xf32>
    tpu.vector_store %arg3[%c0_3, %c0_4], %2 {strides = array<i32>} : memref<128x64xf32, #tpu.memory_space<vmem>>, vector<128x64xf32>,
    return
  }
  func.func @transform_0(%arg0: i32) -> (i32, i32) {
    %c0_i32 = arith.constant 0 : i32
    %c0_i32_0 = arith.constant 0 : i32
    return %arg0, %c0_i32 : i32, i32
  }
  func.func @transform_1(%arg0: i32) -> (i32, i32) {
    %c0_i32 = arith.constant 0 : i32
    %c0_i32_0 = arith.constant 0 : i32
    %c0_i32_1 = arith.constant 0 : i32
    return %c0_i32, %c0_i32_0 : i32, i32
  }
  func.func @transform_2(%arg0: i32) -> (i32, i32) {
    %c0_i32 = arith.constant 0 : i32
    %c0_i32_0 = arith.constant 0 : i32
    return %arg0, %c0_i32 : i32, i32
  }
}

module attributes {stable_mosaic.version = 11 : i64} {
  func.func @_flash_attn_kernel(%arg0: i32, %arg1: i32, %arg2: i32, %arg3: memref<1x64x32xf32, #tpu.memory_space<vmem>>, %arg4: memref<1x64x64xf32, #tpu.memory_space<vmem>>, %arg5: memref<32x32xf32, #tpu.memory_space<vmem>>, %arg6: memref<32x32xf32, #tpu.memory_space<vmem>>, %arg7: memref<1x32xf32, #tpu.memory_space<vmem>>, %arg8: memref<1x64x32xf32, #tpu.memory_space<vmem>>, %arg9: memref<64x32xf32, #tpu.memory_space<vmem>>, %arg10: memref<64x4xf32, #tpu.memory_space<vmem>>, %arg11: memref<64x4xf32, #tpu.memory_space<vmem>>, %arg12: memref<64x32xf32, #tpu.memory_space<vmem>>) attributes {dimension_semantics = [#tpu.dimension_semantics<parallel>, #tpu.dimension_semantics<parallel>, #tpu.dimension_semantics<arbitrary>], iteration_bounds = array<i64: 2, 1, 1>, scalar_prefetch = 0 : i64, scratch_operands = 4 : i64, tpu.core_type = #tpu.core_type<tc>, window_params = [{transform_indices = @transform_0, window_bounds = array<i64: 1, 64, 32>}, {transform_indices = @transform_1, window_bounds = array<i64: 1, 64, 64>}, {pipeline_mode = #tpu.pipeline_mode<synchronous>, transform_indices = @transform_2, window_bounds = array<i64: 32, 32>}, {pipeline_mode = #tpu.pipeline_mode<synchronous>, transform_indices = @transform_3, window_bounds = array<i64: 32, 32>}, {pipeline_mode = #tpu.pipeline_mode<synchronous>, transform_indices = @transform_4, window_bounds = array<i64: 1, 32>}, {transform_indices = @transform_5, window_bounds = array<i64: 1, 64, 32>}]} {
    %c0_i32 = arith.constant 0 : i32
    %0 = arith.cmpi eq, %arg2, %c0_i32 : i32
    %1 = arith.extui %0 : i1 to i32
    %c0_i32_0 = arith.constant 0 : i32
    %2 = arith.cmpi ne, %1, %c0_i32_0 : i32
    scf.if %2 {
      %c0_34 = arith.constant 0 : index
      %c0_35 = arith.constant 0 : index
      %c0_36 = arith.constant 0 : index
      %112 = vector.load %arg3[%c0_34, %c0_35, %c0_36] : memref<1x64x32xf32, #tpu.memory_space<vmem>>, vector<1x64x32xf32>
      %113 = vector.shape_cast %112 : vector<1x64x32xf32> to vector<64x32xf32>
      %c0_37 = arith.constant 0 : index
      %c0_38 = arith.constant 0 : index
      %114 = vector.load %arg5[%c0_37, %c0_38] : memref<32x32xf32, #tpu.memory_space<vmem>>, vector<32x32xf32>
      %cst_39 = arith.constant dense<0.000000e+00> : vector<64x32xf32>
      %115 = tpu.matmul %113, %114, %cst_39 {dimension_numbers = #tpu.dot_dimension_numbers<[1], [0], [0], [1], [0, 0, 1, 1], [], []>} : vector<64x32xf32>, vector<32x32xf32>, vector<64x32xf32> -> vector<64x32xf32>
      %cst_40 = arith.constant 0.353553385 : f32
      %116 = vector.broadcast %cst_40 : f32 to vector<64x32xf32>
      %117 = arith.mulf %115, %116 : vector<64x32xf32>
      %c0_41 = arith.constant 0 : index
      %c0_42 = arith.constant 0 : index
      %118 = vector.load %arg9[%c0_41, %c0_42] : memref<64x32xf32, #tpu.memory_space<vmem>>, vector<64x32xf32>
      tpu.vector_store %arg9[%c0_41, %c0_42], %117 {strides = array<i32>} : memref<64x32xf32, #tpu.memory_space<vmem>>, vector<64x32xf32>,
      %cst_43 = arith.constant 0xFF800000 : f32
      %119 = vector.broadcast %cst_43 : f32 to vector<64x4xf32>
      %c0_44 = arith.constant 0 : index
      %c0_45 = arith.constant 0 : index
      %120 = vector.load %arg10[%c0_44, %c0_45] : memref<64x4xf32, #tpu.memory_space<vmem>>, vector<64x4xf32>
      tpu.vector_store %arg10[%c0_44, %c0_45], %119 {strides = array<i32>} : memref<64x4xf32, #tpu.memory_space<vmem>>, vector<64x4xf32>,
      %cst_46 = arith.constant 0.000000e+00 : f32
      %121 = vector.broadcast %cst_46 : f32 to vector<64x4xf32>
      %c0_47 = arith.constant 0 : index
      %c0_48 = arith.constant 0 : index
      %122 = vector.load %arg11[%c0_47, %c0_48] : memref<64x4xf32, #tpu.memory_space<vmem>>, vector<64x4xf32>
      tpu.vector_store %arg11[%c0_47, %c0_48], %121 {strides = array<i32>} : memref<64x4xf32, #tpu.memory_space<vmem>>, vector<64x4xf32>,
      %cst_49 = arith.constant 0.000000e+00 : f32
      %123 = vector.broadcast %cst_49 : f32 to vector<64x32xf32>
      %c0_50 = arith.constant 0 : index
      %c0_51 = arith.constant 0 : index
      %124 = vector.load %arg12[%c0_50, %c0_51] : memref<64x32xf32, #tpu.memory_space<vmem>>, vector<64x32xf32>
      tpu.vector_store %arg12[%c0_50, %c0_51], %123 {strides = array<i32>} : memref<64x32xf32, #tpu.memory_space<vmem>>, vector<64x32xf32>,
    } else {
    }
    %c0 = arith.constant 0 : index
    %c0_1 = arith.constant 0 : index
    %3 = vector.load %arg9[%c0, %c0_1] : memref<64x32xf32, #tpu.memory_space<vmem>>, vector<64x32xf32>
    %c0_2 = arith.constant 0 : index
    %c0_3 = arith.constant 0 : index
    %c0_4 = arith.constant 0 : index
    %4 = vector.load %arg4[%c0_2, %c0_3, %c0_4] : memref<1x64x64xf32, #tpu.memory_space<vmem>>, vector<1x64x64xf32>
    %5 = vector.shape_cast %4 : vector<1x64x64xf32> to vector<64x64xf32>
    %6 = vector.extract_strided_slice %5 {offsets = [0, 0], sizes = [64, 32], strides = [1, 1]} : vector<64x64xf32> to vector<64x32xf32>
    %7 = vector.extract_strided_slice %5 {offsets = [0, 32], sizes = [64, 32], strides = [1, 1]} : vector<64x64xf32> to vector<64x32xf32>
    %c0_5 = arith.constant 0 : index
    %c0_6 = arith.constant 0 : index
    %8 = vector.load %arg10[%c0_5, %c0_6] : memref<64x4xf32, #tpu.memory_space<vmem>>, vector<64x4xf32>
    %c0_7 = arith.constant 0 : index
    %c0_8 = arith.constant 0 : index
    %9 = vector.load %arg11[%c0_7, %c0_8] : memref<64x4xf32, #tpu.memory_space<vmem>>, vector<64x4xf32>
    %c0_9 = arith.constant 0 : index
    %c0_10 = arith.constant 0 : index
    %10 = vector.load %arg12[%c0_9, %c0_10] : memref<64x32xf32, #tpu.memory_space<vmem>>, vector<64x32xf32>
    %11 = vector.extract_strided_slice %3 {offsets = [0, 0], sizes = [64, 8], strides = [1, 1]} : vector<64x32xf32> to vector<64x8xf32>
    %12 = vector.extract_strided_slice %6 {offsets = [0, 0], sizes = [64, 8], strides = [1, 1]} : vector<64x32xf32> to vector<64x8xf32>
    %cst = arith.constant dense<0.000000e+00> : vector<64x64xf32>
    %13 = tpu.matmul %11, %12, %cst {dimension_numbers = #tpu.dot_dimension_numbers<[1], [1], [0], [0], [0, 0, 1, 0], [], []>} : vector<64x8xf32>, vector<64x8xf32>, vector<64x64xf32> -> vector<64x64xf32>
    %14 = vector.extract_strided_slice %8 {offsets = [0, 0], sizes = [64, 1], strides = [1, 1]} : vector<64x4xf32> to vector<64x1xf32>
    %cst_11 = arith.constant dense<0xFF800000> : vector<64xf32>
    %15 = vector.multi_reduction <maximumf>, %13, %cst_11 [1] : vector<64x64xf32> to vector<64xf32>
    %16 = vector.shape_cast %15 : vector<64xf32> to vector<64x1xf32>
    %17 = arith.maximumf %14, %16 : vector<64x1xf32>
    %18 = arith.subf %14, %17 : vector<64x1xf32>
    %19 = math.exp %18 : vector<64x1xf32>
    %20 = vector.broadcast %17 : vector<64x1xf32> to vector<64x64xf32>
    %21 = arith.subf %13, %20 : vector<64x64xf32>
    %22 = math.exp %21 : vector<64x64xf32>
    %23 = vector.extract_strided_slice %9 {offsets = [0, 0], sizes = [64, 1], strides = [1, 1]} : vector<64x4xf32> to vector<64x1xf32>
    %24 = arith.mulf %19, %23 : vector<64x1xf32>
    %cst_12 = arith.constant dense<0.000000e+00> : vector<64xf32>
    %25 = vector.multi_reduction <add>, %22, %cst_12 [1] : vector<64x64xf32> to vector<64xf32>
    %26 = vector.shape_cast %25 : vector<64xf32> to vector<64x1xf32>
    %27 = arith.addf %24, %26 : vector<64x1xf32>
    %28 = vector.extract_strided_slice %10 {offsets = [0, 0], sizes = [64, 8], strides = [1, 1]} : vector<64x32xf32> to vector<64x8xf32>
    %29 = vector.broadcast %19 : vector<64x1xf32> to vector<64x8xf32>
    %30 = arith.mulf %29, %28 : vector<64x8xf32>
    %31 = vector.extract_strided_slice %7 {offsets = [0, 0], sizes = [64, 8], strides = [1, 1]} : vector<64x32xf32> to vector<64x8xf32>
    %cst_13 = arith.constant dense<0.000000e+00> : vector<64x8xf32>
    %32 = tpu.matmul %22, %31, %cst_13 {dimension_numbers = #tpu.dot_dimension_numbers<[1], [0], [0], [1], [0, 0, 1, 1], [], []>} : vector<64x64xf32>, vector<64x8xf32>, vector<64x8xf32> -> vector<64x8xf32>
    %33 = arith.addf %30, %32 : vector<64x8xf32>
    %34 = vector.extract_strided_slice %3 {offsets = [0, 8], sizes = [64, 8], strides = [1, 1]} : vector<64x32xf32> to vector<64x8xf32>
    %35 = vector.extract_strided_slice %6 {offsets = [0, 8], sizes = [64, 8], strides = [1, 1]} : vector<64x32xf32> to vector<64x8xf32>
    %cst_14 = arith.constant dense<0.000000e+00> : vector<64x64xf32>
    %36 = tpu.matmul %34, %35, %cst_14 {dimension_numbers = #tpu.dot_dimension_numbers<[1], [1], [0], [0], [0, 0, 1, 0], [], []>} : vector<64x8xf32>, vector<64x8xf32>, vector<64x64xf32> -> vector<64x64xf32>
    %37 = vector.extract_strided_slice %8 {offsets = [0, 1], sizes = [64, 1], strides = [1, 1]} : vector<64x4xf32> to vector<64x1xf32>
    %cst_15 = arith.constant dense<0xFF800000> : vector<64xf32>
    %38 = vector.multi_reduction <maximumf>, %36, %cst_15 [1] : vector<64x64xf32> to vector<64xf32>
    %39 = vector.shape_cast %38 : vector<64xf32> to vector<64x1xf32>
    %40 = arith.maximumf %37, %39 : vector<64x1xf32>
    %41 = arith.subf %37, %40 : vector<64x1xf32>
    %42 = math.exp %41 : vector<64x1xf32>
    %43 = vector.broadcast %40 : vector<64x1xf32> to vector<64x64xf32>
    %44 = arith.subf %36, %43 : vector<64x64xf32>
    %45 = math.exp %44 : vector<64x64xf32>
    %46 = vector.extract_strided_slice %9 {offsets = [0, 1], sizes = [64, 1], strides = [1, 1]} : vector<64x4xf32> to vector<64x1xf32>
    %47 = arith.mulf %42, %46 : vector<64x1xf32>
    %cst_16 = arith.constant dense<0.000000e+00> : vector<64xf32>
    %48 = vector.multi_reduction <add>, %45, %cst_16 [1] : vector<64x64xf32> to vector<64xf32>
    %49 = vector.shape_cast %48 : vector<64xf32> to vector<64x1xf32>
    %50 = arith.addf %47, %49 : vector<64x1xf32>
    %51 = vector.extract_strided_slice %10 {offsets = [0, 8], sizes = [64, 8], strides = [1, 1]} : vector<64x32xf32> to vector<64x8xf32>
    %52 = vector.broadcast %42 : vector<64x1xf32> to vector<64x8xf32>
    %53 = arith.mulf %52, %51 : vector<64x8xf32>
    %54 = vector.extract_strided_slice %7 {offsets = [0, 8], sizes = [64, 8], strides = [1, 1]} : vector<64x32xf32> to vector<64x8xf32>
    %cst_17 = arith.constant dense<0.000000e+00> : vector<64x8xf32>
    %55 = tpu.matmul %45, %54, %cst_17 {dimension_numbers = #tpu.dot_dimension_numbers<[1], [0], [0], [1], [0, 0, 1, 1], [], []>} : vector<64x64xf32>, vector<64x8xf32>, vector<64x8xf32> -> vector<64x8xf32>
    %56 = arith.addf %53, %55 : vector<64x8xf32>
    %57 = vector.extract_strided_slice %3 {offsets = [0, 16], sizes = [64, 8], strides = [1, 1]} : vector<64x32xf32> to vector<64x8xf32>
    %58 = vector.extract_strided_slice %6 {offsets = [0, 16], sizes = [64, 8], strides = [1, 1]} : vector<64x32xf32> to vector<64x8xf32>
    %cst_18 = arith.constant dense<0.000000e+00> : vector<64x64xf32>
    %59 = tpu.matmul %57, %58, %cst_18 {dimension_numbers = #tpu.dot_dimension_numbers<[1], [1], [0], [0], [0, 0, 1, 0], [], []>} : vector<64x8xf32>, vector<64x8xf32>, vector<64x64xf32> -> vector<64x64xf32>
    %60 = vector.extract_strided_slice %8 {offsets = [0, 2], sizes = [64, 1], strides = [1, 1]} : vector<64x4xf32> to vector<64x1xf32>
    %cst_19 = arith.constant dense<0xFF800000> : vector<64xf32>
    %61 = vector.multi_reduction <maximumf>, %59, %cst_19 [1] : vector<64x64xf32> to vector<64xf32>
    %62 = vector.shape_cast %61 : vector<64xf32> to vector<64x1xf32>
    %63 = arith.maximumf %60, %62 : vector<64x1xf32>
    %64 = arith.subf %60, %63 : vector<64x1xf32>
    %65 = math.exp %64 : vector<64x1xf32>
    %66 = vector.broadcast %63 : vector<64x1xf32> to vector<64x64xf32>
    %67 = arith.subf %59, %66 : vector<64x64xf32>
    %68 = math.exp %67 : vector<64x64xf32>
    %69 = vector.extract_strided_slice %9 {offsets = [0, 2], sizes = [64, 1], strides = [1, 1]} : vector<64x4xf32> to vector<64x1xf32>
    %70 = arith.mulf %65, %69 : vector<64x1xf32>
    %cst_20 = arith.constant dense<0.000000e+00> : vector<64xf32>
    %71 = vector.multi_reduction <add>, %68, %cst_20 [1] : vector<64x64xf32> to vector<64xf32>
    %72 = vector.shape_cast %71 : vector<64xf32> to vector<64x1xf32>
    %73 = arith.addf %70, %72 : vector<64x1xf32>
    %74 = vector.extract_strided_slice %10 {offsets = [0, 16], sizes = [64, 8], strides = [1, 1]} : vector<64x32xf32> to vector<64x8xf32>
    %75 = vector.broadcast %65 : vector<64x1xf32> to vector<64x8xf32>
    %76 = arith.mulf %75, %74 : vector<64x8xf32>
    %77 = vector.extract_strided_slice %7 {offsets = [0, 16], sizes = [64, 8], strides = [1, 1]} : vector<64x32xf32> to vector<64x8xf32>
    %cst_21 = arith.constant dense<0.000000e+00> : vector<64x8xf32>
    %78 = tpu.matmul %68, %77, %cst_21 {dimension_numbers = #tpu.dot_dimension_numbers<[1], [0], [0], [1], [0, 0, 1, 1], [], []>} : vector<64x64xf32>, vector<64x8xf32>, vector<64x8xf32> -> vector<64x8xf32>
    %79 = arith.addf %76, %78 : vector<64x8xf32>
    %80 = vector.extract_strided_slice %3 {offsets = [0, 24], sizes = [64, 8], strides = [1, 1]} : vector<64x32xf32> to vector<64x8xf32>
    %81 = vector.extract_strided_slice %6 {offsets = [0, 24], sizes = [64, 8], strides = [1, 1]} : vector<64x32xf32> to vector<64x8xf32>
    %cst_22 = arith.constant dense<0.000000e+00> : vector<64x64xf32>
    %82 = tpu.matmul %80, %81, %cst_22 {dimension_numbers = #tpu.dot_dimension_numbers<[1], [1], [0], [0], [0, 0, 1, 0], [], []>} : vector<64x8xf32>, vector<64x8xf32>, vector<64x64xf32> -> vector<64x64xf32>
    %83 = vector.extract_strided_slice %8 {offsets = [0, 3], sizes = [64, 1], strides = [1, 1]} : vector<64x4xf32> to vector<64x1xf32>
    %cst_23 = arith.constant dense<0xFF800000> : vector<64xf32>
    %84 = vector.multi_reduction <maximumf>, %82, %cst_23 [1] : vector<64x64xf32> to vector<64xf32>
    %85 = vector.shape_cast %84 : vector<64xf32> to vector<64x1xf32>
    %86 = arith.maximumf %83, %85 : vector<64x1xf32>
    %87 = arith.subf %83, %86 : vector<64x1xf32>
    %88 = math.exp %87 : vector<64x1xf32>
    %89 = vector.broadcast %86 : vector<64x1xf32> to vector<64x64xf32>
    %90 = arith.subf %82, %89 : vector<64x64xf32>
    %91 = math.exp %90 : vector<64x64xf32>
    %92 = vector.extract_strided_slice %9 {offsets = [0, 3], sizes = [64, 1], strides = [1, 1]} : vector<64x4xf32> to vector<64x1xf32>
    %93 = arith.mulf %88, %92 : vector<64x1xf32>
    %cst_24 = arith.constant dense<0.000000e+00> : vector<64xf32>
    %94 = vector.multi_reduction <add>, %91, %cst_24 [1] : vector<64x64xf32> to vector<64xf32>
    %95 = vector.shape_cast %94 : vector<64xf32> to vector<64x1xf32>
    %96 = arith.addf %93, %95 : vector<64x1xf32>
    %97 = vector.extract_strided_slice %10 {offsets = [0, 24], sizes = [64, 8], strides = [1, 1]} : vector<64x32xf32> to vector<64x8xf32>
    %98 = vector.broadcast %88 : vector<64x1xf32> to vector<64x8xf32>
    %99 = arith.mulf %98, %97 : vector<64x8xf32>
    %100 = vector.extract_strided_slice %7 {offsets = [0, 24], sizes = [64, 8], strides = [1, 1]} : vector<64x32xf32> to vector<64x8xf32>
    %cst_25 = arith.constant dense<0.000000e+00> : vector<64x8xf32>
    %101 = tpu.matmul %91, %100, %cst_25 {dimension_numbers = #tpu.dot_dimension_numbers<[1], [0], [0], [1], [0, 0, 1, 1], [], []>} : vector<64x64xf32>, vector<64x8xf32>, vector<64x8xf32> -> vector<64x8xf32>
    %102 = arith.addf %99, %101 : vector<64x8xf32>
    %103 = tpu.concatenate %17, %40, %63, %86 in 1 : vector<64x1xf32>, vector<64x1xf32>, vector<64x1xf32>, vector<64x1xf32> -> vector<64x4xf32>
    %c0_26 = arith.constant 0 : index
    %c0_27 = arith.constant 0 : index
    %104 = vector.load %arg10[%c0_26, %c0_27] : memref<64x4xf32, #tpu.memory_space<vmem>>, vector<64x4xf32>
    tpu.vector_store %arg10[%c0_26, %c0_27], %103 {strides = array<i32>} : memref<64x4xf32, #tpu.memory_space<vmem>>, vector<64x4xf32>,
    %105 = tpu.concatenate %27, %50, %73, %96 in 1 : vector<64x1xf32>, vector<64x1xf32>, vector<64x1xf32>, vector<64x1xf32> -> vector<64x4xf32>
    %c0_28 = arith.constant 0 : index
    %c0_29 = arith.constant 0 : index
    %106 = vector.load %arg11[%c0_28, %c0_29] : memref<64x4xf32, #tpu.memory_space<vmem>>, vector<64x4xf32>
    tpu.vector_store %arg11[%c0_28, %c0_29], %105 {strides = array<i32>} : memref<64x4xf32, #tpu.memory_space<vmem>>, vector<64x4xf32>,
    %107 = tpu.concatenate %33, %56, %79, %102 in 1 : vector<64x8xf32>, vector<64x8xf32>, vector<64x8xf32>, vector<64x8xf32> -> vector<64x32xf32>
    %c0_30 = arith.constant 0 : index
    %c0_31 = arith.constant 0 : index
    %108 = vector.load %arg12[%c0_30, %c0_31] : memref<64x32xf32, #tpu.memory_space<vmem>>, vector<64x32xf32>
    tpu.vector_store %arg12[%c0_30, %c0_31], %107 {strides = array<i32>} : memref<64x32xf32, #tpu.memory_space<vmem>>, vector<64x32xf32>,
    %c0_i32_32 = arith.constant 0 : i32
    %109 = arith.cmpi eq, %arg2, %c0_i32_32 : i32
    %110 = arith.extui %109 : i1 to i32
    %c0_i32_33 = arith.constant 0 : i32
    %111 = arith.cmpi ne, %110, %c0_i32_33 : i32
    scf.if %111 {
      %c0_34 = arith.constant 0 : index
      %c0_35 = arith.constant 0 : index
      %112 = vector.load %arg11[%c0_34, %c0_35] : memref<64x4xf32, #tpu.memory_space<vmem>>, vector<64x4xf32>
      %113 = tpu.reciprocal %112 {approx = true} : vector<64x4xf32> -> vector<64x4xf32>
      %c0_36 = arith.constant 0 : index
      %c0_37 = arith.constant 0 : index
      %114 = vector.load %arg12[%c0_36, %c0_37] : memref<64x32xf32, #tpu.memory_space<vmem>>, vector<64x32xf32>
      %115 = vector.extract_strided_slice %114 {offsets = [0, 0], sizes = [64, 8], strides = [1, 1]} : vector<64x32xf32> to vector<64x8xf32>
      %116 = vector.extract_strided_slice %113 {offsets = [0, 0], sizes = [64, 1], strides = [1, 1]} : vector<64x4xf32> to vector<64x1xf32>
      %117 = vector.broadcast %116 : vector<64x1xf32> to vector<64x8xf32>
      %118 = arith.mulf %115, %117 : vector<64x8xf32>
      %119 = vector.extract_strided_slice %114 {offsets = [0, 8], sizes = [64, 8], strides = [1, 1]} : vector<64x32xf32> to vector<64x8xf32>
      %120 = vector.extract_strided_slice %113 {offsets = [0, 1], sizes = [64, 1], strides = [1, 1]} : vector<64x4xf32> to vector<64x1xf32>
      %121 = vector.broadcast %120 : vector<64x1xf32> to vector<64x8xf32>
      %122 = arith.mulf %119, %121 : vector<64x8xf32>
      %123 = vector.extract_strided_slice %114 {offsets = [0, 16], sizes = [64, 8], strides = [1, 1]} : vector<64x32xf32> to vector<64x8xf32>
      %124 = vector.extract_strided_slice %113 {offsets = [0, 2], sizes = [64, 1], strides = [1, 1]} : vector<64x4xf32> to vector<64x1xf32>
      %125 = vector.broadcast %124 : vector<64x1xf32> to vector<64x8xf32>
      %126 = arith.mulf %123, %125 : vector<64x8xf32>
      %127 = vector.extract_strided_slice %114 {offsets = [0, 24], sizes = [64, 8], strides = [1, 1]} : vector<64x32xf32> to vector<64x8xf32>
      %128 = vector.extract_strided_slice %113 {offsets = [0, 3], sizes = [64, 1], strides = [1, 1]} : vector<64x4xf32> to vector<64x1xf32>
      %129 = vector.broadcast %128 : vector<64x1xf32> to vector<64x8xf32>
      %130 = arith.mulf %127, %129 : vector<64x8xf32>
      %131 = tpu.concatenate %118, %122, %126, %130 in 1 : vector<64x8xf32>, vector<64x8xf32>, vector<64x8xf32>, vector<64x8xf32> -> vector<64x32xf32>
      %c0_38 = arith.constant 0 : index
      %c0_39 = arith.constant 0 : index
      %132 = vector.load %arg6[%c0_38, %c0_39] : memref<32x32xf32, #tpu.memory_space<vmem>>, vector<32x32xf32>
      %cst_40 = arith.constant dense<0.000000e+00> : vector<64x32xf32>
      %133 = tpu.matmul %131, %132, %cst_40 {dimension_numbers = #tpu.dot_dimension_numbers<[1], [0], [0], [1], [0, 0, 1, 1], [], []>} : vector<64x32xf32>, vector<32x32xf32>, vector<64x32xf32> -> vector<64x32xf32>
      %c0_41 = arith.constant 0 : index
      %c0_42 = arith.constant 0 : index
      %134 = vector.load %arg7[%c0_41, %c0_42] : memref<1x32xf32, #tpu.memory_space<vmem>>, vector<1x32xf32>
      %135 = vector.broadcast %134 : vector<1x32xf32> to vector<64x32xf32>
      %136 = arith.addf %133, %135 : vector<64x32xf32>
      %c0_43 = arith.constant 0 : index
      %c0_44 = arith.constant 0 : index
      %c0_45 = arith.constant 0 : index
      %137 = vector.load %arg8[%c0_43, %c0_44, %c0_45] : memref<1x64x32xf32, #tpu.memory_space<vmem>>, vector<1x64x32xf32>
      %138 = vector.shape_cast %137 : vector<1x64x32xf32> to vector<64x32xf32>
      %139 = vector.shape_cast %136 : vector<64x32xf32> to vector<1x64x32xf32>
      tpu.vector_store %arg8[%c0_43, %c0_44, %c0_45], %139 {strides = array<i32>} : memref<1x64x32xf32, #tpu.memory_space<vmem>>, vector<1x64x32xf32>,
    } else {
    }
    return
  }
  func.func @transform_0(%arg0: i32, %arg1: i32, %arg2: i32) -> (i32, i32, i32) {
    %c0_i32 = arith.constant 0 : i32
    %c0_i32_0 = arith.constant 0 : i32
    return %arg0, %arg1, %c0_i32 : i32, i32, i32
  }
  func.func @transform_1(%arg0: i32, %arg1: i32, %arg2: i32) -> (i32, i32, i32) {
    %c0_i32 = arith.constant 0 : i32
    %c0_i32_0 = arith.constant 0 : i32
    return %arg0, %arg2, %c0_i32 : i32, i32, i32
  }
  func.func @transform_2(%arg0: i32, %arg1: i32, %arg2: i32) -> (i32, i32) {
    %c0_i32 = arith.constant 0 : i32
    %c0_i32_0 = arith.constant 0 : i32
    %c0_i32_1 = arith.constant 0 : i32
    return %c0_i32, %c0_i32_0 : i32, i32
  }
  func.func @transform_3(%arg0: i32, %arg1: i32, %arg2: i32) -> (i32, i32) {
    %c0_i32 = arith.constant 0 : i32
    %c0_i32_0 = arith.constant 0 : i32
    %c0_i32_1 = arith.constant 0 : i32
    return %c0_i32, %c0_i32_0 : i32, i32
  }
  func.func @transform_4(%arg0: i32, %arg1: i32, %arg2: i32) -> (i32, i32) {
    %c0_i32 = arith.constant 0 : i32
    %c0_i32_0 = arith.constant 0 : i32
    %c0_i32_1 = arith.constant 0 : i32
    return %c0_i32, %c0_i32_0 : i32, i32
  }
  func.func @transform_5(%arg0: i32, %arg1: i32, %arg2: i32) -> (i32, i32, i32) {
    %c0_i32 = arith.constant 0 : i32
    %c0_i32_0 = arith.constant 0 : i32
    return %arg0, %arg1, %c0_i32 : i32, i32, i32
  }
}

</mosaic_0001>

<bundles_post_ra>
// kernel: quadtree_attention_forward.2
= control target key start
LH: loop header
LB: loop body
LE: loop exit
PB: predicated region body
PF: predicated region fallthrough
CT: control target
= control target key end

     0   :  { %vm31_vm0 = vcmask 261120   ;;  %vm225_vm1 = vcmask 523264   ;;  %s481_s1 = inlined_call_operand.vmem [shape: f32[32,64], index: 1, kind: input, shape index: {}]   ;;  %s482_s0 = inlined_call_operand.vmem [shape: f32[128,32], index: 0, kind: input, shape index: {}]   ;;  %s483_s2 = inlined_call_operand.vmem [shape: f32[128,64], index: 2, kind: output, shape index: {}]  }
   0x1   :  { %v27_v0 = vld [vmem:[%s481_s1] sm:$0xff]  ;;  %v28_v1 = vld [vmem:[%s481_s1 + $0x8] sm:$0xff]  ;;  %v29_v2 = vld [vmem:[%s481_s1 + $0x10] sm:$0xff] }
   0x2   :  { %v314_v3 = vpack.c.bf16 %v28_v1, %v27_v0  ;;  %v30_v4 = vld [vmem:[%s481_s1 + $0x18] sm:$0xff]  ;;  %v11_v5 = vld [vmem:[%s482_s0] sm:$0xff]  ;;  %v12_v8 = vld [vmem:[%s482_s0 + $0x8] sm:$0xff] }
   0x3   :  { %v19_v6 = vld [vmem:[%s482_s0 + $0x40] sm:$0xff]  ;;  %v318_v7 = vpack.c.bf16 %v30_v4, %v29_v2  ;;  %290 = vmatprep.mubr.msk.f32.mxu0 %vm31_vm0, %v11_v5  ;;  %v20_v9 = vld [vmem:[%s482_s0 + $0x48] sm:$0xff]  ;;  %v13_v10 = vld [vmem:[%s482_s0 + $0x10] sm:$0xff] }
   0x4   :  { %302 = vmatprep.mubr.msk.f32.mxu1 %vm31_vm0, %v19_v6  ;;  %315 = vmatprep.subr.bf16.mxu0 %v314_v3  ;;  %v21_v11 = vld [vmem:[%s482_s0 + $0x50] sm:$0xff]  ;;  %v14_v12 = vld [vmem:[%s482_s0 + $0x18] sm:$0xff]  ;;  %v15_v14 = vld [vmem:[%s482_s0 + $0x20] sm:$0xff] }
   0x5   :  { %322 = vmatprep.subr.bf16.mxu1 %v314_v3  ;;  %317 = vmatpush3.bf16.msra.mxu0 %v314_v3  ;;  %v22_v13 = vld [vmem:[%s482_s0 + $0x58] sm:$0xff]  ;;  %v23_v15 = vld [vmem:[%s482_s0 + $0x60] sm:$0xff]  ;;  %v16_v16 = vld [vmem:[%s482_s0 + $0x28] sm:$0xff] }
   0x6   :  { %324 = vmatpush3.bf16.msra.mxu1 %v314_v3  ;;  %319 = vmatprep.subr.bf16.mxu0 %v318_v7  ;;  %v24_v17 = vld [vmem:[%s482_s0 + $0x68] sm:$0xff]  ;;  %v17_v18 = vld [vmem:[%s482_s0 + $0x30] sm:$0xff]  ;;  %v18_v20 = vld [vmem:[%s482_s0 + $0x38] sm:$0xff] }
   0x7   :  { %323 = vmatprep.subr.bf16.mxu1 %v318_v7  ;;  %v25_v19 = vld [vmem:[%s482_s0 + $0x70] sm:$0xff]  ;;  %v26_v21 = vld [vmem:[%s482_s0 + $0x78] sm:$0xff] }
   0x9   :  { %321 = vmatpush3.bf16.msra.mxu0 %v318_v7 }
   0xa   :  { %325 = vmatpush3.bf16.msra.mxu1 %v318_v7 }
   0xc   :  { %291 = vmatmul.mubr.msk.f32.vlgmr.msra.gmra.mrb[0].mxu0 %vm31_vm0, %v12_v8 }
   0xd   :  { %303 = vmatmul.mubr.msk.f32.vlgmr.msra.gmra.mrb[0].mxu1 %vm31_vm0, %v20_v9  ;;  %293 = vmatprep.mubr.msk.f32.mxu0 %vm31_vm0, %v13_v10 }
   0xe   :  { %305 = vmatprep.mubr.msk.f32.mxu1 %vm31_vm0, %v21_v11 }
  0x10   :  { %294 = vmatmul.mubr.msk.f32.gmra.mrb[2].mxu0 %vm31_vm0, %v14_v12 }
  0x11   :  { %306 = vmatmul.mubr.msk.f32.gmra.mrb[2].mxu1 %vm31_vm0, %v22_v13  ;;  %296 = vmatprep.mubr.msk.f32.mxu0 %vm31_vm0, %v15_v14 }
  0x12   :  { %308 = vmatprep.mubr.msk.f32.mxu1 %vm31_vm0, %v23_v15 }
  0x14   :  { %297 = vmatmul.mubr.msk.f32.gmra.mrb[4].mxu0 %vm31_vm0, %v16_v16 }
  0x15   :  { %309 = vmatmul.mubr.msk.f32.gmra.mrb[4].mxu1 %vm31_vm0, %v24_v17  ;;  %299 = vmatprep.mubr.msk.f32.mxu0 %vm31_vm0, %v17_v18 }
  0x16   :  { %311 = vmatprep.mubr.msk.f32.mxu1 %vm31_vm0, %v25_v19 }
  0x18   :  { %300 = vmatmul.mubr.msk.f32.gmra.mrb[6].mxu0 %vm31_vm0, %v18_v20 }
  0x19   :  { %312 = vmatmul.mubr.msk.f32.gmra.mrb[6].mxu1 %vm31_vm0, %v26_v21 }
  0xdf   :  { %v292_v22 = vpop.f32.mrb[0].mxu0 }
  0xe0   :  { %v304_v23 = vpop.f32.mrb[0].mxu1  ;;  %227 = vst.msk [vmem:[%s483_s2 + $0x8] sm:$0xff] %vm225_vm1, %v292_v22  ;;  %v146_v24 = vpop.f32.mrb[1].mxu0 }
  0xe1   :  { %235 = vst.msk [vmem:[%s483_s2 + $0x48] sm:$0xff] %vm225_vm1, %v304_v23  ;;  %v186_v25 = vpop.f32.mrb[1].mxu1  ;;  %226 = vst.msk [vmem:[%s483_s2] sm:$0xff] %vm225_vm1, %v146_v24 }
  0xe2   :  { %234 = vst.msk [vmem:[%s483_s2 + $0x40] sm:$0xff] %vm225_vm1, %v186_v25 }
  0xe3   :  { %v295_v26 = vpop.f32.mrb[2].mxu0 }
  0xe4   :  { %v307_v27 = vpop.f32.mrb[2].mxu1  ;;  %229 = vst.msk [vmem:[%s483_s2 + $0x18] sm:$0xff] %vm225_vm1, %v295_v26  ;;  %v156_v28 = vpop.f32.mrb[3].mxu0 }
  0xe5   :  { %237 = vst.msk [vmem:[%s483_s2 + $0x58] sm:$0xff] %vm225_vm1, %v307_v27  ;;  %v196_v29 = vpop.f32.mrb[3].mxu1  ;;  %228 = vst.msk [vmem:[%s483_s2 + $0x10] sm:$0xff] %vm225_vm1, %v156_v28 }
  0xe6   :  { %236 = vst.msk [vmem:[%s483_s2 + $0x50] sm:$0xff] %vm225_vm1, %v196_v29 }
  0xe7   :  { %v298_v30 = vpop.f32.mrb[4].mxu0 }
  0xe8   :  { %v310_v31 = vpop.f32.mrb[4].mxu1  ;;  %231 = vst.msk [vmem:[%s483_s2 + $0x28] sm:$0xff] %vm225_vm1, %v298_v30  ;;  %v166_v32 = vpop.f32.mrb[5].mxu0 }
  0xe9   :  { %239 = vst.msk [vmem:[%s483_s2 + $0x68] sm:$0xff] %vm225_vm1, %v310_v31  ;;  %v206_v33 = vpop.f32.mrb[5].mxu1  ;;  %230 = vst.msk [vmem:[%s483_s2 + $0x20] sm:$0xff] %vm225_vm1, %v166_v32 }
  0xea   :  { %238 = vst.msk [vmem:[%s483_s2 + $0x60] sm:$0xff] %vm225_vm1, %v206_v33 }
  0xeb   :  { %v301_v34 = vpop.f32.mrb[6].mxu0 }
  0xec   :  { %v313_v35 = vpop.f32.mrb[6].mxu1  ;;  %233 = vst.msk [vmem:[%s483_s2 + $0x38] sm:$0xff] %vm225_vm1, %v301_v34  ;;  %v176_v36 = vpop.f32.mrb[7].mxu0 }
  0xed   :  { %241 = vst.msk [vmem:[%s483_s2 + $0x78] sm:$0xff] %vm225_vm1, %v313_v35  ;;  %v216_v37 = vpop.f32.mrb[7].mxu1  ;;  %232 = vst.msk [vmem:[%s483_s2 + $0x30] sm:$0xff] %vm225_vm1, %v176_v36 }
  0xee   :  { %240 = vst.msk [vmem:[%s483_s2 + $0x70] sm:$0xff] %vm225_vm1, %v216_v37 }

// kernel: quadtree_attention_forward.3
= control target key start
LH: loop header
LB: loop body
LE: loop exit
PB: predicated region body
PF: predicated region fallthrough
CT: control target
= control target key end

     0   :  { %s4543_s18 = smov 0   ;;  %s4545_s19 = smov 0   ;;  %s6190_s0 = inlined_call_operand.vmem [shape: f32[2,64,32], index: 0, kind: input, shape index: {}]   ;;  %s6191_s1 = inlined_call_operand.vmem [shape: f32[2,64,64], index: 1, kind: input, shape index: {}]   ;;  %s6192_s2 = inlined_call_operand.vmem [shape: f32[32,32], index: 2, kind: input, shape index: {}]   ;;  %s6193_s3 = inlined_call_operand.vmem [shape: f32[32,32], index: 3, kind: input, shape index: {}]   ;;  %s6194_s4 = inlined_call_operand.vmem [shape: f32[1,32], index: 4, kind: input, shape index: {}]   ;;  %s6195_s5 = inlined_call_operand.vmem [shape: f32[2,64,32], index: 5, kind: output, shape index: {}]  }
   0x1   :  { %s4547_s20 = smov 0  }
   0x2 LB: > { %s34_s21 = sadd.s32 1, %s4491_s19  ;;  %p3350_p0 = scmp.ge.s32.totalorder %s4495_s20, 1  ;;  %s4495_s20 = sphi %s4547_s20, %s15_s20   ;;  %s4491_s19 = sphi %s4545_s19, %s6342_s19   ;;  %s4487_s18 = sphi %s4543_s18, %s6341_s18  }
   0x3   : > { %p36_p1 = scmp.ge.s32.totalorder %s34_s21, 2  ;;  %p232_p2 = scmp.lt.s32.totalorder %s4495_s20, 3 }
   0x5   : > { %s6344_s21 = smov (%p36_p1, %s34_s21), 0  ;;  %p233_p3 = pnand %p3350_p0, %p232_p2 }
   0x7   : > { %236 = sbr.rel (%p233_p3) target bundleno = 3039 (0xbdf), region = 40 }
   0xe   : > { %v319_v0 = vld [vmem:[%s6192_s2] sm:$0xff]  ;;  %v320_v1 = vld [vmem:[%s6192_s2 + $0x8] sm:$0xff]  ;;  %v321_v2 = vld [vmem:[%s6192_s2 + $0x10] sm:$0xff]  ;;  %p278_p4 = scmp.lt.s32.totalorder %s4487_s18, 1  ;;  %vm323_vm0 = vcmask 261120   ;;  %vm534_vm1 = vcmask 64512  }
   0xf   : > { %v3891_v3 = vpack.c.bf16 %v320_v1, %v319_v0  ;;  %v322_v4 = vld [vmem:[%s6192_s2 + $0x18] sm:$0xff]  ;;  %vm4588_vm2 = vmpackc.low %vm534_vm1, %vm534_vm1  ;;  %vm469_vm3 = vcmask 31744   ;;  %v4497_v51 = vmov -inf   ;;  %vm688_vm4 = vcmask 523264   ;;  %s4500_s12 = smov 96   ;;  %s4501_s13 = smov 120  }
  0x10   : > { %v3895_v5 = vpack.c.bf16 %v322_v4, %v321_v2  ;;  %s6346_s18 = smov (!%p278_p4, %s4487_s18), 1  ;;  %470 = vst.msk [vmem:[#allocation3] sm:$0xff] %vm469_vm3, %v4497_v51  ;;  %471 = vst.msk [vmem:[#allocation3 + $0x8] sm:$0xff] %vm469_vm3, %v4497_v51  ;;  %v6198_v4 = vmov 0   ;;  %s4503_s14 = smov 88   ;;  %vm2768_vm5 = vcmask 7168  }
  0x11   : > { %3892 = vmatprep.subr.bf16.mxu0 %v3891_v3  ;;  %s4573_s30 = sshll.u32 %s6346_s18, 6  ;;  %472 = vst.msk [vmem:[#allocation3 + $0x10] sm:$0xff] %vm469_vm3, %v4497_v51  ;;  %473 = vst.msk [vmem:[#allocation3 + $0x18] sm:$0xff] %vm469_vm3, %v4497_v51  ;;  %4141 = vset.pattern.permute.xlu0 %v6198_v4  ;;  %s4504_s15 = smov 112   ;;  %vm2777_vm6 = vcmask 15360   ;;  %vm2786_vm7 = vcmask 23552  }
  0x12   : > { %3894 = vmatpush3.bf16.msra.mxu0 %v3891_v3  ;;  %s285_s8 = scalar_lea.vmem %s6190_s0, %s4573_s30  ;;  %s4583_s11 = scalar_lea.vmem %s6191_s1, %s4573_s30  ;;  %474 = vst.msk [vmem:[#allocation3 + $0x20] sm:$0xff] %vm469_vm3, %v4497_v51  ;;  %475 = vst.msk [vmem:[#allocation3 + $0x28] sm:$0xff] %vm469_vm3, %v4497_v51  ;;  %4120 = vset.pattern.permute.xlu1 %v6198_v4  ;;  %vm2844_vm8 = vcmask 130048   ;;  %vm2853_vm9 = vcmask 195584  }
  0x13   : > { %3896 = vmatprep.subr.bf16.mxu0 %v3895_v5  ;;  %v311_v6 = vld [vmem:[%s285_s8] sm:$0xff]  ;;  %v312_v8 = vld [vmem:[%s285_s8 + $0x8] sm:$0xff]  ;;  %v313_v9 = vld [vmem:[%s285_s8 + $0x10] sm:$0xff]  ;;  %476 = vst.msk [vmem:[#allocation3 + $0x30] sm:$0xff] %vm469_vm3, %v4497_v51  ;;  %s4506_s16 = smov 80   ;;  %s4507_s17 = smov 104  }
  0x14   : > { %3635 = vmatprep.mubr.msk.f32.mxu0 %vm323_vm0, %v311_v6  ;;  %v4593_v10 = vld [vmem:[%s4583_s11] sm:$0xff]  ;;  %v4596_v11 = vld [vmem:[%s4583_s11 + $0x8] sm:$0xff]  ;;  %v4599_v12 = vld [vmem:[%s4583_s11 + $0x10] sm:$0xff]  ;;  %477 = vst.msk [vmem:[#allocation3 + $0x38] sm:$0xff] %vm469_vm3, %v4497_v51  ;;  %s4508_s18 = smov 72   ;;  %s4510_s22 = smov 8  }
  0x15   : > { %v4602_v13 = vld [vmem:[%s4583_s11 + $0x18] sm:$0xff]  ;;  %v3899_v14 = vpack.c.bf16 %v4596_v11, %v4593_v10  ;;  %v315_v17 = vld [vmem:[%s285_s8 + $0x20] sm:$0xff]  ;;  %v4621_v19 = vld [vmem:[%s4583_s11 + $0x28] sm:$0xff]  ;;  %v4747_v6 = vpack.i.bf16 %v4596_v11, %v4593_v10  ;;  %s4511_s23 = smov 16   ;;  %s4512_s24 = smov 24  }
  0x16   : > { %3898 = vmatpush3.bf16.msra.mxu0 %v3895_v5  ;;  %v3905_v15 = vpack.c.bf16 %v4602_v13, %v4599_v12  ;;  %v314_v16 = vld [vmem:[%s285_s8 + $0x18] sm:$0xff]  ;;  %v4618_v18 = vld [vmem:[%s4583_s11 + $0x20] sm:$0xff]  ;;  %v316_v20 = vld [vmem:[%s285_s8 + $0x28] sm:$0xff]  ;;  %v4499_v5 = vmov 0.0  }
  0x17   : > { %3901 = vmatprep.subr.msk.bf16.mxu1 %vm4588_vm2, %v3899_v14  ;;  %v317_v21 = vld [vmem:[%s285_s8 + $0x30] sm:$0xff]  ;;  %v3911_v22 = vpack.c.bf16 %v4621_v19, %v4618_v18  ;;  %v318_v23 = vld [vmem:[%s285_s8 + $0x38] sm:$0xff]  ;;  %479 = vst.msk [vmem:[#allocation4 + $0x8] sm:$0xff] %vm469_vm3, %v4499_v5  ;;  %478 = vst.msk [vmem:[#allocation4] sm:$0xff] %vm469_vm3, %v4499_v5 }
  0x18   : > { %3904 = vmatpush3.bf16.xpose.msk.msra.mxu1 %vm4588_vm2, %v3899_v14  ;;  %v4636_v24 = vld [vmem:[%s4583_s11 + $0x30] sm:$0xff]  ;;  %v4639_v25 = vld [vmem:[%s4583_s11 + $0x38] sm:$0xff]  ;;  %480 = vst.msk [vmem:[#allocation4 + $0x10] sm:$0xff] %vm469_vm3, %v4499_v5  ;;  %481 = vst.msk [vmem:[#allocation4 + $0x18] sm:$0xff] %vm469_vm3, %v4499_v5 }
  0x19   : > { %3636 = vmatmul.mubr.msk.f32.vlgmr.msra.gmra.mrb[0].mxu0 %vm323_vm0, %v312_v8  ;;  %3907 = vmatprep.subr.msk.bf16.mxu1 %vm4588_vm2, %v3905_v15  ;;  %v3917_v26 = vpack.c.bf16 %v4639_v25, %v4636_v24  ;;  %482 = vst.msk [vmem:[#allocation4 + $0x20] sm:$0xff] %vm469_vm3, %v4499_v5  ;;  %483 = vst.msk [vmem:[#allocation4 + $0x28] sm:$0xff] %vm469_vm3, %v4499_v5  ;;  %v4753_v8 = vpack.i.bf16 %v4621_v19, %v4618_v18  ;;  %v4757_v14 = vld [vmem:[#allocation3 + $0x8] sm:$0xff]  ;;  %v4769_v18 = vld [vmem:[#allocation3 + $0x20] sm:$0xff] }
  0x1a   : > { %3638 = vmatprep.mubr.msk.f32.mxu0 %vm323_vm0, %v313_v9  ;;  %484 = vst.msk [vmem:[#allocation4 + $0x30] sm:$0xff] %vm469_vm3, %v4499_v5  ;;  %485 = vst.msk [vmem:[#allocation4 + $0x38] sm:$0xff] %vm469_vm3, %v4499_v5 }
  0x1b   : > { %486 = vst.msk [vmem:[#allocation5] sm:$0xff] %vm323_vm0, %v4499_v5  ;;  %487 = vst.msk [vmem:[#allocation5 + $0x8] sm:$0xff] %vm323_vm0, %v4499_v5 }
  0x1c   : > { %488 = vst.msk [vmem:[#allocation5 + $0x10] sm:$0xff] %vm323_vm0, %v4499_v5  ;;  %489 = vst.msk [vmem:[#allocation5 + $0x18] sm:$0xff] %vm323_vm0, %v4499_v5 }
  0x1d   : > { %3639 = vmatmul.mubr.msk.f32.gmra.mrb[2].mxu0 %vm323_vm0, %v314_v16  ;;  %490 = vst.msk [vmem:[#allocation5 + $0x20] sm:$0xff] %vm323_vm0, %v4499_v5  ;;  %491 = vst.msk [vmem:[#allocation5 + $0x28] sm:$0xff] %vm323_vm0, %v4499_v5 }
  0x1e   : > { %3641 = vmatprep.mubr.msk.f32.mxu0 %vm323_vm0, %v315_v17  ;;  %492 = vst.msk [vmem:[#allocation5 + $0x30] sm:$0xff] %vm323_vm0, %v4499_v5  ;;  %493 = vst.msk [vmem:[#allocation5 + $0x38] sm:$0xff] %vm323_vm0, %v4499_v5 }
  0x20   : > { %3910 = vmatpush3.bf16.xpose.msk.msra.mxu1 %vm4588_vm2, %v3905_v15  ;;  %v4759_v15 = vld [vmem:[#allocation3 + $0x10] sm:$0xff] }
  0x21   : > { %3642 = vmatmul.mubr.msk.f32.gmra.mrb[4].mxu0 %vm323_vm0, %v316_v20  ;;  %3913 = vmatprep.subr.msk.bf16.mxu1 %vm4588_vm2, %v3911_v22  ;;  %v4767_v20 = vld [vmem:[#allocation3] sm:$0xff] }
  0x22   : > { %3644 = vmatprep.mubr.msk.f32.mxu0 %vm323_vm0, %v317_v21 }
  0x25   : > { %3645 = vmatmul.mubr.msk.f32.gmra.mrb[6].mxu0 %vm323_vm0, %v318_v23  ;;  %v4779_v23 = vld [vmem:[#allocation3 + $0x30] sm:$0xff] }
  0x28   : > { %3916 = vmatpush3.bf16.xpose.msk.msra.mxu1 %vm4588_vm2, %v3911_v22 }
  0x29   : > { %3919 = vmatprep.subr.msk.bf16.mxu1 %vm4588_vm2, %v3917_v26 }
  0x30   : > { %3922 = vmatpush3.bf16.xpose.msk.msra.mxu1 %vm4588_vm2, %v3917_v26  ;;  %v4785_v26 = vpack.i.bf16 %v4602_v13, %v4599_v12  ;;  %v4800_v13 = vld [vmem:[#allocation3 + $0x18] sm:$0xff] }
  0xec   : > { %v3637_v27 = vpop.f32.mrb[0].mxu0 }
  0xed   : > { %v454_v28 = vmul.f32 0.35355338, %v3637_v27  ;;  %v414_v29 = vpop.f32.mrb[1].mxu0 }
  0xee   : > { %v453_v30 = vmul.f32 0.35355338, %v414_v29  ;;  %v4795_v29 = vpack.i.bf16 %v4639_v25, %v4636_v24 }
  0xef   : > { %462 = vst.msk [vmem:[#allocation2 + $0x8] sm:$0xff] %vm323_vm0, %v454_v28 }
  0xf0   : > { %461 = vst.msk [vmem:[#allocation2] sm:$0xff] %vm323_vm0, %v453_v30  ;;  %v3640_v31 = vpop.f32.mrb[2].mxu0 }
  0xf1   : > { %v456_v32 = vmul.f32 0.35355338, %v3640_v31  ;;  %v424_v33 = vpop.f32.mrb[3].mxu0 }
  0xf2   : > { %v455_v34 = vmul.f32 0.35355338, %v424_v33 }
  0xf3   : > { %464 = vst.msk [vmem:[#allocation2 + $0x18] sm:$0xff] %vm323_vm0, %v456_v32 }
  0xf4   : > { %463 = vst.msk [vmem:[#allocation2 + $0x10] sm:$0xff] %vm323_vm0, %v455_v34  ;;  %v3643_v35 = vpop.f32.mrb[4].mxu0  ;;  %v4807_v34 = vld [vmem:[#allocation3 + $0x28] sm:$0xff] }
  0xf5   : > { %v458_v36 = vmul.f32 0.35355338, %v3643_v35  ;;  %v434_v37 = vpop.f32.mrb[5].mxu0 }
  0xf6   : > { %v457_v38 = vmul.f32 0.35355338, %v434_v37  ;;  %v4657_v41 = vld [vmem:[#allocation2 + $0x8] sm:$0xff] }
  0xf7   : > { %466 = vst.msk [vmem:[#allocation2 + $0x28] sm:$0xff] %vm323_vm0, %v458_v36  ;;  %v4652_v39 = vld [vmem:[#allocation2] sm:$0xff]  ;;  %v4814_v36 = vld [vmem:[#allocation3 + $0x38] sm:$0xff] }
  0xf8   : > { %465 = vst.msk [vmem:[#allocation2 + $0x20] sm:$0xff] %vm323_vm0, %v457_v38  ;;  %v3646_v40 = vpop.f32.mrb[6].mxu0  ;;  %3663 = vmatprep.mubr.msk.f32.mxu1 %vm534_vm1, %v4652_v39 }
  0xf9   : > { %v460_v42 = vmul.f32 0.35355338, %v3646_v40  ;;  %v444_v43 = vpop.f32.mrb[7].mxu0  ;;  %3664 = vmatmul.mubr.msk.f32.vlgmr.msra.gmra.mrb[0].mxu1 %vm534_vm1, %v4657_v41 }
  0xfa   : > { %v459_v44 = vmul.f32 0.35355338, %v444_v43  ;;  %v4661_v45 = vld [vmem:[#allocation2 + $0x18] sm:$0xff] }
  0xfb   : > { %468 = vst.msk [vmem:[#allocation2 + $0x38] sm:$0xff] %vm323_vm0, %v460_v42  ;;  %v4664_v46 = vld [vmem:[#allocation2 + $0x10] sm:$0xff] }
  0xfc   : > { %467 = vst.msk [vmem:[#allocation2 + $0x30] sm:$0xff] %vm323_vm0, %v459_v44  ;;  %3666 = vmatprep.mubr.msk.f32.mxu1 %vm534_vm1, %v4664_v46 }
  0xfd   : > { %3667 = vmatmul.mubr.msk.f32.gmra.mrb[2].mxu1 %vm534_vm1, %v4661_v45 }
  0xfe   : > { %v4671_v47 = vld [vmem:[#allocation2 + $0x28] sm:$0xff] }
  0xff   : > { %v4673_v48 = vld [vmem:[#allocation2 + $0x20] sm:$0xff] }
 0x100   : > { %3669 = vmatprep.mubr.msk.f32.mxu1 %vm534_vm1, %v4673_v48 }
 0x101   : > { %3670 = vmatmul.mubr.msk.f32.gmra.mrb[4].mxu1 %vm534_vm1, %v4671_v47 }
 0x102   : > { %v4679_v49 = vld [vmem:[#allocation2 + $0x38] sm:$0xff] }
 0x103   : > { %v4681_v50 = vld [vmem:[#allocation2 + $0x30] sm:$0xff] }
 0x104   : > { %3672 = vmatprep.mubr.msk.f32.mxu1 %vm534_vm1, %v4681_v50 }
 0x105   : > { %3673 = vmatmul.mubr.msk.f32.gmra.mrb[6].mxu1 %vm534_vm1, %v4679_v49 }
 0x1cc   : > { %v4695_v52 = vpop.f32.mrb[0].mxu1 }
 0x1cd   : > { %v4697_v53 = vpop.f32.mrb[1].mxu1  ;;  %v692_v57 = vsel %vm688_vm4, %v4695_v52, -inf }
 0x1ce   : > { %v689_v54 = vsel %vm688_vm4, %v4697_v53, -inf }
 0x1cf   : > { %690 = vmax.xlane.f32.xlu0 %v689_v54 }
 0x1d0   : > { %v4701_v55 = vpop.f32.mrb[2].mxu1 }
 0x1d1   : > { %v4703_v56 = vpop.f32.mrb[3].mxu1  ;;  %v698_v60 = vsel %vm688_vm4, %v4701_v55, -inf }
 0x1d2   : > { %v695_v58 = vsel %vm688_vm4, %v4703_v56, -inf }
 0x1d3   : > { %693 = vmax.xlane.f32.xlu0 %v692_v57  ;;  %696 = vmax.xlane.f32.xlu1 %v695_v58 }
 0x1d4   : > { %v4709_v59 = vpop.f32.mrb[4].mxu1 }
 0x1d5   : > { %v4713_v61 = vpop.f32.mrb[5].mxu1  ;;  %v704_v0 = vsel %vm688_vm4, %v4709_v59, -inf }
 0x1d6   : > { %v701_v62 = vsel %vm688_vm4, %v4713_v61, -inf }
 0x1d7   : > { %702 = vmax.xlane.f32.xlu0 %v701_v62  ;;  %699 = vmax.xlane.f32.xlu1 %v698_v60 }
 0x1d8   : > { %v4717_v63 = vpop.f32.mrb[6].mxu1 }
 0x1d9   : > { %v4721_v1 = vpop.f32.mrb[7].mxu1  ;;  %v710_v3 = vsel %vm688_vm4, %v4717_v63, -inf }
 0x1da   : > { %v707_v2 = vsel %vm688_vm4, %v4721_v1, -inf }
 0x1db   : > { %708 = vmax.xlane.f32.xlu0 %v707_v2  ;;  %705 = vmax.xlane.f32.xlu1 %v704_v0 }
 0x1df   : > { %711 = vmax.xlane.f32.xlu1 %v710_v3 }
 0x1f1   : > { %4116 = vrot.lane.b32.xlu0 %v4747_v6, %s4500_s12 }
 0x1f5   : > { %4127 = vrot.lane.b32.xlu0 %v4753_v8, %s4500_s12 }
 0x25c   : > { %v691_v9 = vpop.xlane.xlu0 %690 }
 0x25d   : > { %v4774_v21 = vmax.f32 %v4767_v20, %v691_v9 }
 0x260   : > { %v694_v16 = vpop.xlane.xlu0 %693  ;;  %v697_v17 = vpop.xlane.xlu1 %696 }
 0x261   : > { %v4762_v10 = vmax.f32 %v4757_v14, %v694_v16  ;;  %v4765_v11 = vmax.f32 %v4759_v15, %v697_v17 }
 0x263   : > { %752 = vperm.xlu1 %4120, %v4762_v10   ;;  %757 = vperm.xlu0 %4141, %v4765_v11  }
 0x264   : > { %v703_v19 = vpop.xlane.xlu0 %702  ;;  %v700_v32 = vpop.xlane.xlu1 %699 }
 0x265   : > { %v4777_v22 = vmax.f32 %v4769_v18, %v703_v19  ;;  %v4805_v25 = vmax.f32 %v4800_v13, %v700_v32 }
 0x267   : > { %747 = vperm.xlu1 %4120, %v4774_v21   ;;  %767 = vperm.xlu0 %4141, %v4777_v22  }
 0x268   : > { %v709_v27 = vpop.xlane.xlu0 %708  ;;  %v706_v24 = vpop.xlane.xlu1 %705 }
 0x269   : > { %v4788_v28 = vmax.f32 %v4779_v23, %v709_v27  ;;  %v4812_v35 = vmax.f32 %v4807_v34, %v706_v24 }
 0x26b   : > { %4122 = vrot.lane.b32.xlu1 %v4785_v26, %s4500_s12  ;;  %777 = vperm.xlu0 %4141, %v4788_v28  }
 0x26c   : > { %v4117_v30 = vpop.permute.xlu0 %4116  ;;  %v712_v37 = vpop.xlane.xlu1 %711 }
 0x26d   : > { %v4119_v31 = vunpack.i.h.bf16 %v4117_v30  ;;  %v4118_v33 = vunpack.i.l.bf16 %v4117_v30  ;;  %v4819_v38 = vmax.f32 %v4814_v36, %v712_v37 }
 0x26f   : > { %4132 = vrot.lane.b32.xlu1 %v4795_v29, %s4500_s12  ;;  %4143 = vrot.lane.b32.xlu0 %v4785_v26, %s4501_s13  ;;  %v3923_v12 = vpack.c.bf16 %v4119_v31, %v4118_v33 }
 0x270   : > { %v4128_v40 = vpop.permute.xlu0 %4127 }
 0x271   : > { %3924 = vmatprep.subr.bf16.mxu0 %v3923_v12  ;;  %v4130_v60 = vunpack.i.h.bf16 %v4128_v40  ;;  %v4129_v0 = vunpack.i.l.bf16 %v4128_v40 }
 0x272   : > { %3926 = vmatpush3.bf16.msra.mxu0 %v3923_v12 }
 0x273   : > { %4137 = vrot.lane.b32.xlu1 %v4747_v6, %s4501_s13  ;;  %4153 = vrot.lane.b32.xlu0 %v4795_v29, %s4501_s13 }
 0x277   : > { %762 = vperm.xlu1 %4120, %v4805_v25   ;;  %1060 = vrot.lane.b32.xlu0 %v4657_v41, %s4501_s13 }
 0x27b   : > { %772 = vperm.xlu1 %4120, %v4812_v35   ;;  %1064 = vrot.lane.b32.xlu0 %v4661_v45, %s4501_s13 }
 0x27f   : > { %782 = vperm.xlu1 %4120, %v4819_v38   ;;  %1068 = vrot.lane.b32.xlu0 %v4671_v47, %s4501_s13 }
 0x283   : > { %4148 = vrot.lane.b32.xlu1 %v4753_v8, %s4501_s13  ;;  %1072 = vrot.lane.b32.xlu0 %v4679_v49, %s4501_s13 }
 0x287   : > { %1058 = vrot.lane.b32.xlu1 %v4652_v39, %s4501_s13 }
 0x28b   : > { %1062 = vrot.lane.b32.xlu1 %v4664_v46, %s4501_s13 }
 0x28f   : > { %1066 = vrot.lane.b32.xlu1 %v4673_v48, %s4501_s13 }
 0x293   : > { %1070 = vrot.lane.b32.xlu1 %v4681_v50, %s4501_s13  ;;  %s305_s13 = scalar_lea.vmem %s6195_s5, %s4573_s30 }
 0x2e2   : > { %v753_v42 = vpop.permute.xlu1 %752  ;;  %v758_v43 = vpop.permute.xlu0 %757 }
 0x2e3   : > { %v786_v54 = vsub.f32 %v4695_v52, %v753_v42  ;;  %v787_v57 = vsub.f32 %v4703_v56, %v758_v43 }
 0x2e5   : > { %v795_v5 = vmul.f32 1.442695, %v786_v54  ;;  %v797_v9 = vmul.f32 1.442695, %v787_v57 }
 0x2e6   : > { %v748_v44 = vpop.permute.xlu1 %747  ;;  %v768_v16 = vpop.permute.xlu0 %767 }
 0x2e7   : > { %v785_v51 = vsub.f32 %v4697_v53, %v748_v44  ;;  %v3931_v53 = vpack.c.bf16 %v4130_v60, %v4129_v0  ;;  %v789_v12 = vsub.f32 %v4713_v61, %v768_v16 }
 0x2e9   : > { %v793_v58 = vmul.f32 1.442695, %v785_v51  ;;  %v801_v43 = vmul.f32 1.442695, %v789_v12 }
 0x2ea   : > { %v4123_v62 = vpop.permute.xlu1 %4122  ;;  %v778_v56 = vpop.permute.xlu0 %777 }
 0x2eb   : > { %4305 = vpow2.f32 %v793_v58  ;;  %v4125_v2 = vunpack.i.h.bf16 %v4123_v62  ;;  %v4124_v3 = vunpack.i.l.bf16 %v4123_v62  ;;  %v791_v44 = vsub.f32 %v4721_v1, %v778_v56 }
 0x2ec   : > { %4307 = vpow2.f32 %v795_v5 }
 0x2ed   : > { %v3927_v17 = vpack.c.bf16 %v4125_v2, %v4124_v3  ;;  %4309 = vpow2.f32 %v797_v9 }
 0x2ee   : > { %v4133_v19 = vpop.permute.xlu1 %4132  ;;  %v4144_v51 = vpop.permute.xlu0 %4143 }
 0x2ef   : > { %v4135_v27 = vunpack.i.h.bf16 %v4133_v19  ;;  %v4134_v30 = vunpack.i.l.bf16 %v4133_v19  ;;  %3928 = vmatprep.subr.bf16.mxu0 %v3927_v17  ;;  %v4146_v57 = vunpack.i.h.bf16 %v4144_v51  ;;  %v4145_v58 = vunpack.i.l.bf16 %v4144_v51 }
 0x2f0   : > { %3930 = vmatpush3.bf16.msra.mxu0 %v3927_v17 }
 0x2f1   : > { %3932 = vmatprep.subr.bf16.mxu0 %v3931_v53  ;;  %v3935_v33 = vpack.c.bf16 %v4135_v27, %v4134_v30  ;;  %v3945_v2 = vpack.c.bf16 %v4146_v57, %v4145_v58 }
 0x2f2   : > { %v4138_v52 = vpop.permute.xlu1 %4137 }
 0x2f3   : > { %v4140_v31 = vunpack.i.h.bf16 %v4138_v52  ;;  %v4139_v32 = vunpack.i.l.bf16 %v4138_v52 }
 0x2f4   : > { %3934 = vmatpush3.bf16.msra.mxu0 %v3931_v53  ;;  %v4154_v53 = vpop.permute.xlu0 %4153 }
 0x2f5   : > { %v4833_v24 = vpop.eup %4305  ;;  %3936 = vmatprep.subr.bf16.mxu0 %v3935_v33  ;;  %v3939_v40 = vpack.c.bf16 %v4140_v31, %v4139_v32  ;;  %v4156_v56 = vunpack.i.h.bf16 %v4154_v53  ;;  %v4155_v31 = vunpack.i.l.bf16 %v4154_v53 }
 0x2f6   : > { %3691 = vmatprep.mubr.msk.f32.mxu0 %vm688_vm4, %v4833_v24  ;;  %v763_v37 = vpop.permute.xlu1 %762  ;;  %v4841_v61 = vpop.eup %4307 }
 0x2f7   : > { %v788_v42 = vsub.f32 %v4701_v55, %v763_v37  ;;  %v4843_v62 = vpop.eup %4309  ;;  %v805_v55 = vmul.f32 1.442695, %v791_v44 }
 0x2f8   : > { %3938 = vmatpush3.bf16.msra.mxu0 %v3935_v33  ;;  %v3957_v33 = vpack.c.bf16 %v4156_v56, %v4155_v31  ;;  %v1061_v37 = vpop.permute.xlu0 %1060 }
 0x2f9   : > { %v799_v54 = vmul.f32 1.442695, %v788_v42  ;;  %3941 = vmatprep.subr.msk.bf16.mxu0 %vm4588_vm2, %v3939_v40 }
 0x2fa   : > { %v773_v60 = vpop.permute.xlu1 %772 }
 0x2fb   : > { %4311 = vpow2.f32 %v799_v54  ;;  %v790_v0 = vsub.f32 %v4709_v59, %v773_v60  ;;  %3692 = vmatmul.mubr.msk.f32.vlgmr.msra.gmra.mrb[8].mxu0 %vm688_vm4, %v4841_v61 }
 0x2fc   : > { %4313 = vpow2.f32 %v801_v43  ;;  %3694 = vmatprep.mubr.msk.f32.mxu0 %vm688_vm4, %v4843_v62  ;;  %v1065_v42 = vpop.permute.xlu0 %1064 }
 0x2fd   : > { %v803_v1 = vmul.f32 1.442695, %v790_v0 }
 0x2fe   : > { %v783_v3 = vpop.permute.xlu1 %782 }
 0x2ff   : > { %4315 = vpow2.f32 %v803_v1  ;;  %v792_v5 = vsub.f32 %v4717_v63, %v783_v3 }
 0x300   : > { %4317 = vpow2.f32 %v805_v55  ;;  %v1069_v44 = vpop.permute.xlu0 %1068 }
 0x301   : > { %v807_v9 = vmul.f32 1.442695, %v792_v5  ;;  %3944 = vmatpush3.bf16.xpose.msk.msra.mxu0 %vm4588_vm2, %v3939_v40 }
 0x302   : > { %v4149_v59 = vpop.permute.xlu1 %4148  ;;  %3947 = vmatprep.subr.msk.bf16.mxu0 %vm4588_vm2, %v3945_v2 }
 0x303   : > { %4319 = vpow2.f32 %v807_v9  ;;  %v4151_v16 = vunpack.i.h.bf16 %v4149_v59  ;;  %v4150_v17 = vunpack.i.l.bf16 %v4149_v59 }
 0x304   : > { %v1073_v54 = vpop.permute.xlu0 %1072 }
 0x305   : > { %v4855_v19 = vpop.eup %4311  ;;  %v3951_v30 = vpack.c.bf16 %v4151_v16, %v4150_v17 }
 0x306   : > { %v4857_v27 = vpop.eup %4313  ;;  %3695 = vmatmul.mubr.msk.f32.gmra.mrb[10].mxu0 %vm688_vm4, %v4855_v19  ;;  %v1059_v12 = vpop.permute.xlu1 %1058 }
 0x307   : > { %3697 = vmatprep.mubr.msk.f32.mxu0 %vm688_vm4, %v4857_v27 }
 0x309   : > { %v4863_v63 = vpop.eup %4315  ;;  %3950 = vmatpush3.bf16.xpose.msk.msra.mxu0 %vm4588_vm2, %v3945_v2 }
 0x30a   : > { %v4867_v52 = vpop.eup %4317  ;;  %3698 = vmatmul.mubr.msk.f32.gmra.mrb[12].mxu0 %vm688_vm4, %v4863_v63  ;;  %3953 = vmatprep.subr.msk.bf16.mxu0 %vm4588_vm2, %v3951_v30  ;;  %v1063_v40 = vpop.permute.xlu1 %1062 }
 0x30b   : > { %3700 = vmatprep.mubr.msk.f32.mxu0 %vm688_vm4, %v4867_v52 }
 0x30d   : > { %v4875_v32 = vpop.eup %4319 }
 0x30e   : > { %3701 = vmatmul.mubr.msk.f32.gmra.mrb[14].mxu0 %vm688_vm4, %v4875_v32  ;;  %v1067_v43 = vpop.permute.xlu1 %1066 }
 0x30f   : > { %3719 = vmatprep.mubr.msk.f32.mxu0 %vm534_vm1, %v1059_v12 }
 0x311   : > { %3956 = vmatpush3.bf16.xpose.msk.msra.mxu0 %vm4588_vm2, %v3951_v30 }
 0x312   : > { %3959 = vmatprep.subr.msk.bf16.mxu0 %vm4588_vm2, %v3957_v33  ;;  %v1071_v51 = vpop.permute.xlu1 %1070 }
 0x319   : > { %3962 = vmatpush3.bf16.xpose.msk.msra.mxu0 %vm4588_vm2, %v3957_v33 }
 0x320   : > { %3720 = vmatmul.mubr.msk.f32.vlgmr.msra.gmra.mrb[16].mxu0 %vm534_vm1, %v1061_v37 }
 0x321   : > { %3722 = vmatprep.mubr.msk.f32.mxu0 %vm534_vm1, %v1063_v40 }
 0x324   : > { %3723 = vmatmul.mubr.msk.f32.gmra.mrb[18].mxu0 %vm534_vm1, %v1065_v42 }
 0x325   : > { %3725 = vmatprep.mubr.msk.f32.mxu0 %vm534_vm1, %v1067_v43 }
 0x328   : > { %3726 = vmatmul.mubr.msk.f32.gmra.mrb[20].mxu0 %vm534_vm1, %v1069_v44 }
 0x329   : > { %3728 = vmatprep.mubr.msk.f32.mxu0 %vm534_vm1, %v1071_v51  ;;  %v6196_v51 = vmov 1  }
 0x32a   : > { %4163 = vset.pattern.permute.xlu1 %v6196_v51  ;;  %4162 = vset.pattern.permute.xlu0 %v6196_v51 }
 0x32c   : > { %3729 = vmatmul.mubr.msk.f32.gmra.mrb[22].mxu0 %vm534_vm1, %v1073_v54 }
 0x3ce   : > { %v4893_v57 = vpop.f32.mrb[8].mxu0 }
 0x3cf   : > { %6227 = vst [vmem:[#allocation6_spill] sm:$0xff] %v4893_v57  ;;  %v4895_v58 = vpop.f32.mrb[9].mxu0  ;;  %v6200_v57 = vmov 2  }
 0x3d0   : > { %6228 = vst [vmem:[#allocation7_spill] sm:$0xff] %v4895_v58 }
 0x3d9   : > { %v4897_v60 = vpop.f32.mrb[10].mxu0 }
 0x3da   : > { %6229 = vst [vmem:[#allocation8_spill] sm:$0xff] %v4897_v60  ;;  %v4899_v0 = vpop.f32.mrb[11].mxu0 }
 0x3db   : > { %6230 = vst [vmem:[#allocation9_spill] sm:$0xff] %v4899_v0 }
 0x3dd   : > { %v4901_v55 = vpop.f32.mrb[12].mxu0 }
 0x3de   : > { %6231 = vst [vmem:[#allocation10_spill] sm:$0xff] %v4901_v55  ;;  %v4903_v1 = vpop.f32.mrb[13].mxu0 }
 0x3df   : > { %6232 = vst [vmem:[#allocation11_spill] sm:$0xff] %v4903_v1 }
 0x3e1   : > { %v4905_v2 = vpop.f32.mrb[14].mxu0 }
 0x3e2   : > { %6233 = vst [vmem:[#allocation12_spill] sm:$0xff] %v4905_v2  ;;  %v4907_v3 = vpop.f32.mrb[15].mxu0 }
 0x3e3   : > { %6234 = vst [vmem:[#allocation13_spill] sm:$0xff] %v4907_v3 }
 0x3f3   : > { %v4909_v5 = vpop.f32.mrb[16].mxu0 }
 0x3f4   : > { %v4911_v9 = vpop.f32.mrb[17].mxu0  ;;  %v1230_v59 = vsel %vm688_vm4, %v4909_v5, -inf }
 0x3f5   : > { %1231 = vmax.xlane.f32.xlu0 %v1230_v59  ;;  %v1227_v16 = vsel %vm688_vm4, %v4911_v9, -inf }
 0x3f6   : > { %1228 = vmax.xlane.f32.xlu1 %v1227_v16 }
 0x3f7   : > { %v4917_v17 = vpop.f32.mrb[18].mxu0 }
 0x3f8   : > { %v4919_v30 = vpop.f32.mrb[19].mxu0  ;;  %v1236_v33 = vsel %vm688_vm4, %v4917_v17, -inf }
 0x3f9   : > { %v1233_v53 = vsel %vm688_vm4, %v4919_v30, -inf }
 0x3fa   : > { %1234 = vmax.xlane.f32.xlu0 %v1233_v53 }
 0x3fb   : > { %v4923_v56 = vpop.f32.mrb[20].mxu0 }
 0x3fc   : > { %v4925_v31 = vpop.f32.mrb[21].mxu0  ;;  %v1242_v42 = vsel %vm688_vm4, %v4923_v56, -inf }
 0x3fd   : > { %v1239_v12 = vsel %vm688_vm4, %v4925_v31, -inf }
 0x3fe   : > { %1237 = vmax.xlane.f32.xlu0 %v1236_v33  ;;  %1240 = vmax.xlane.f32.xlu1 %v1239_v12 }
 0x3ff   : > { %v4931_v37 = vpop.f32.mrb[22].mxu0 }
 0x400   : > { %v4933_v40 = vpop.f32.mrb[23].mxu0  ;;  %v1248_v44 = vsel %vm688_vm4, %v4931_v37, -inf }
 0x401   : > { %v1245_v43 = vsel %vm688_vm4, %v4933_v40, -inf }
 0x402   : > { %1243 = vmax.xlane.f32.xlu0 %v1242_v42  ;;  %1246 = vmax.xlane.f32.xlu1 %v1245_v43 }
 0x406   : > { %1249 = vmax.xlane.f32.xlu0 %v1248_v44 }
 0x413   : > { %4158 = vrot.lane.b32.xlu1 %v4747_v6, %s4503_s14 }
 0x482   : > { %v1232_v54 = vpop.xlane.xlu0 %1231 }
 0x483   : > { %v4945_v59 = vmax.f32 %v4757_v14, %v1232_v54  ;;  %v1229_v16 = vpop.xlane.xlu1 %1228 }
 0x484   : > { %v4948_v53 = vmax.f32 %v4767_v20, %v1229_v16 }
 0x485   : > { %6235 = vst [vmem:[#allocation14_spill] sm:$0xff] %v4945_v59  ;;  %1290 = vperm.xlu1 %4163, %v4945_v59  }
 0x486   : > { %6236 = vst [vmem:[#allocation15_spill] sm:$0xff] %v4948_v53  ;;  %1285 = vperm.xlu0 %4162, %v4948_v53  }
 0x487   : > { %v1235_v33 = vpop.xlane.xlu0 %1234 }
 0x489   : > { %4165 = vrot.lane.b32.xlu1 %v4785_v26, %s4503_s14 }
 0x48b   : > { %v1238_v12 = vpop.xlane.xlu0 %1237  ;;  %v1241_v42 = vpop.xlane.xlu1 %1240 }
 0x48c   : > { %v4965_v3 = vmax.f32 %v4800_v13, %v1238_v12 }
 0x48d   : > { %4170 = vrot.lane.b32.xlu1 %v4753_v8, %s4503_s14 }
 0x48e   : > { %6238 = vst [vmem:[#allocation17_spill] sm:$0xff] %v4965_v3 }
 0x48f   : > { %v1244_v43 = vpop.xlane.xlu0 %1243  ;;  %v1247_v44 = vpop.xlane.xlu1 %1246 }
 0x490   : > { %v4955_v54 = vmax.f32 %v4807_v34, %v1244_v43 }
 0x491   : > { %4175 = vrot.lane.b32.xlu1 %v4795_v29, %s4503_s14 }
 0x492   : > { %6237 = vst [vmem:[#allocation16_spill] sm:$0xff] %v4955_v54  ;;  %1310 = vperm.xlu0 %4162, %v4955_v54  }
 0x493   : > { %v1250_v16 = vpop.xlane.xlu0 %1249  ;;  %v4159_v51 = vpop.permute.xlu1 %4158 }
 0x494   : > { %v4960_v4 = vmax.f32 %v4814_v36, %v1250_v16  ;;  %v4161_v2 = vunpack.i.h.bf16 %v4159_v51  ;;  %v4160_v55 = vunpack.i.l.bf16 %v4159_v51  ;;  %v4970_v16 = vmax.f32 %v4759_v15, %v1235_v33 }
 0x495   : > { %4180 = vrot.lane.b32.xlu1 %v4747_v6, %s4504_s15  ;;  %v4975_v6 = vmax.f32 %v4769_v18, %v1241_v42 }
 0x496   : > { %1320 = vperm.xlu0 %4162, %v4960_v4   ;;  %v3963_v43 = vpack.c.bf16 %v4161_v2, %v4160_v55  ;;  %6239 = vst [vmem:[#allocation18_spill] sm:$0xff] %v4970_v16  ;;  %v4980_v55 = vmax.f32 %v4779_v23, %v1247_v44 }
 0x498   : > { %3964 = vmatprep.subr.bf16.mxu1 %v3963_v43  ;;  %6240 = vst [vmem:[#allocation19_spill] sm:$0xff] %v4980_v55 }
 0x499   : > { %1300 = vperm.xlu1 %4163, %v4965_v3   ;;  %3966 = vmatpush3.bf16.msra.mxu1 %v3963_v43 }
 0x49a   : > { %4190 = vrot.lane.b32.xlu0 %v4753_v8, %s4504_s15 }
 0x49b   : > { %4204 = vset.pattern.permute.xlu0 %v6200_v57 }
 0x49d   : > { %1295 = vperm.xlu1 %4163, %v4970_v16  }
 0x49e   : > { %1628 = vrot.lane.b32.xlu0 %v4652_v39, %s4504_s15 }
 0x4a1   : > { %1305 = vperm.xlu1 %4163, %v4975_v6  }
 0x4a2   : > { %1632 = vrot.lane.b32.xlu0 %v4664_v46, %s4504_s15 }
 0x4a5   : > { %1315 = vperm.xlu1 %4163, %v4980_v55  }
 0x4a6   : > { %1636 = vrot.lane.b32.xlu0 %v4673_v48, %s4504_s15 }
 0x4a9   : > { %4185 = vrot.lane.b32.xlu1 %v4785_v26, %s4504_s15 }
 0x4aa   : > { %1640 = vrot.lane.b32.xlu0 %v4681_v50, %s4504_s15  ;;  %4205 = vset.pattern.permute.xlu1 %v6200_v57 }
 0x4ad   : > { %4195 = vrot.lane.b32.xlu1 %v4795_v29, %s4504_s15 }
 0x4b1   : > { %1630 = vrot.lane.b32.xlu1 %v4657_v41, %s4504_s15 }
 0x4b5   : > { %1634 = vrot.lane.b32.xlu1 %v4661_v45, %s4504_s15 }
 0x4b9   : > { %1638 = vrot.lane.b32.xlu1 %v4671_v47, %s4504_s15 }
 0x4bd   : > { %1642 = vrot.lane.b32.xlu1 %v4679_v49, %s4504_s15 }
 0x504   : > { %v1291_v39 = vpop.permute.xlu1 %1290 }
 0x505   : > { %v1286_v46 = vpop.permute.xlu0 %1285  ;;  %v1324_v8 = vsub.f32 %v4909_v5, %v1291_v39 }
 0x506   : > { %v1323_v48 = vsub.f32 %v4911_v9, %v1286_v46 }
 0x507   : > { %v1333_v33 = vmul.f32 1.442695, %v1324_v8 }
 0x508   : > { %v1331_v2 = vmul.f32 1.442695, %v1323_v48  ;;  %v4166_v26 = vpop.permute.xlu1 %4165 }
 0x509   : > { %v4168_v51 = vunpack.i.h.bf16 %v4166_v26  ;;  %v4167_v50 = vunpack.i.l.bf16 %v4166_v26 }
 0x50a   : > { %4321 = vpow2.f32 %v1331_v2 }
 0x50b   : > { %v3967_v29 = vpack.c.bf16 %v4168_v51, %v4167_v50  ;;  %4323 = vpow2.f32 %v1333_v33 }
 0x50c   : > { %v4171_v41 = vpop.permute.xlu1 %4170 }
 0x50d   : > { %v4173_v12 = vunpack.i.h.bf16 %v4171_v41  ;;  %v4172_v45 = vunpack.i.l.bf16 %v4171_v41  ;;  %3968 = vmatprep.subr.bf16.mxu1 %v3967_v29 }
 0x50e   : > { %3970 = vmatpush3.bf16.msra.mxu1 %v3967_v29 }
 0x50f   : > { %v3971_v47 = vpack.c.bf16 %v4173_v12, %v4172_v45 }
 0x510   : > { %v4176_v49 = vpop.permute.xlu1 %4175 }
 0x511   : > { %v4178_v42 = vunpack.i.h.bf16 %v4176_v49  ;;  %v4177_v44 = vunpack.i.l.bf16 %v4176_v49  ;;  %3972 = vmatprep.subr.bf16.mxu1 %v3971_v47  ;;  %v1311_v26 = vpop.permute.xlu0 %1310 }
 0x512   : > { %3974 = vmatpush3.bf16.msra.mxu1 %v3971_v47  ;;  %v1328_v29 = vsub.f32 %v4923_v56, %v1311_v26 }
 0x513   : > { %v3975_v5 = vpack.c.bf16 %v4178_v42, %v4177_v44 }
 0x514   : > { %v4993_v9 = vpop.eup %4321  ;;  %v4181_v43 = vpop.permute.xlu1 %4180  ;;  %v1341_v42 = vmul.f32 1.442695, %v1328_v29 }
 0x515   : > { %v4183_v39 = vunpack.i.h.bf16 %v4181_v43  ;;  %v4182_v46 = vunpack.i.l.bf16 %v4181_v43  ;;  %3747 = vmatprep.mubr.msk.f32.mxu1 %vm688_vm4, %v4993_v9  ;;  %3976 = vmatprep.subr.bf16.mxu1 %v3975_v5  ;;  %v4997_v48 = vpop.eup %4323  ;;  %v1321_v12 = vpop.permute.xlu0 %1320 }
 0x516   : > { %3978 = vmatpush3.bf16.msra.mxu1 %v3975_v5  ;;  %v1330_v44 = vsub.f32 %v4931_v37, %v1321_v12 }
 0x517   : > { %v3979_v8 = vpack.c.bf16 %v4183_v39, %v4182_v46 }
 0x518   : > { %v1301_v2 = vpop.permute.xlu1 %1300  ;;  %v1345_v56 = vmul.f32 1.442695, %v1330_v44 }
 0x519   : > { %3748 = vmatmul.mubr.msk.f32.vlgmr.msra.gmra.mrb[8].mxu1 %vm688_vm4, %v4997_v48  ;;  %3981 = vmatprep.subr.msk.bf16.mxu1 %vm4588_vm2, %v3979_v8  ;;  %v1326_v51 = vsub.f32 %v4917_v17, %v1301_v2  ;;  %v4191_v43 = vpop.permute.xlu0 %4190 }
 0x51a   : > { %v4193_v39 = vunpack.i.h.bf16 %v4191_v43  ;;  %v4192_v46 = vunpack.i.l.bf16 %v4191_v43 }
 0x51b   : > { %v1337_v41 = vmul.f32 1.442695, %v1326_v51 }
 0x51c   : > { %v1296_v50 = vpop.permute.xlu1 %1295  ;;  %v3991_v37 = vpack.c.bf16 %v4193_v39, %v4192_v46 }
 0x51d   : > { %v1325_v33 = vsub.f32 %v4919_v30, %v1296_v50  ;;  %v1629_v44 = vpop.permute.xlu0 %1628 }
 0x51f   : > { %v1335_v45 = vmul.f32 1.442695, %v1325_v33  ;;  %3984 = vmatpush3.bf16.xpose.msk.msra.mxu1 %vm4588_vm2, %v3979_v8 }
 0x520   : > { %v1306_v47 = vpop.permute.xlu1 %1305 }
 0x521   : > { %4325 = vpow2.f32 %v1335_v45  ;;  %v1327_v49 = vsub.f32 %v4925_v31, %v1306_v47 }
 0x522   : > { %4327 = vpow2.f32 %v1337_v41 }
 0x523   : > { %v1339_v17 = vmul.f32 1.442695, %v1327_v49 }
 0x524   : > { %v1316_v5 = vpop.permute.xlu1 %1315 }
 0x525   : > { %4329 = vpow2.f32 %v1339_v17  ;;  %v1329_v30 = vsub.f32 %v4933_v40, %v1316_v5  ;;  %v1633_v5 = vpop.permute.xlu0 %1632 }
 0x526   : > { %4331 = vpow2.f32 %v1341_v42 }
 0x527   : > { %v1343_v2 = vmul.f32 1.442695, %v1329_v30 }
 0x528   : > { %v4186_v8 = vpop.permute.xlu1 %4185 }
 0x529   : > { %4333 = vpow2.f32 %v1343_v2  ;;  %v4188_v26 = vunpack.i.h.bf16 %v4186_v8  ;;  %v4187_v51 = vunpack.i.l.bf16 %v4186_v8 }
 0x52a   : > { %4335 = vpow2.f32 %v1345_v56  ;;  %v1637_v56 = vpop.permute.xlu0 %1636 }
 0x52b   : > { %v5011_v31 = vpop.eup %4325  ;;  %v3985_v50 = vpack.c.bf16 %v4188_v26, %v4187_v51 }
 0x52c   : > { %v5013_v33 = vpop.eup %4327  ;;  %3750 = vmatprep.mubr.msk.f32.mxu1 %vm688_vm4, %v5011_v31  ;;  %v4196_v40 = vpop.permute.xlu1 %4195 }
 0x52d   : > { %3751 = vmatmul.mubr.msk.f32.gmra.mrb[10].mxu1 %vm688_vm4, %v5013_v33  ;;  %3987 = vmatprep.subr.msk.bf16.mxu1 %vm4588_vm2, %v3985_v50  ;;  %v4198_v41 = vunpack.i.h.bf16 %v4196_v40  ;;  %v4197_v12 = vunpack.i.l.bf16 %v4196_v40 }
 0x52e   : > { %3990 = vmatpush3.bf16.xpose.msk.msra.mxu1 %vm4588_vm2, %v3985_v50  ;;  %v1641_v39 = vpop.permute.xlu0 %1640 }
 0x52f   : > { %v5023_v29 = vpop.eup %4329  ;;  %3993 = vmatprep.subr.msk.bf16.mxu1 %vm4588_vm2, %v3991_v37  ;;  %v3997_v49 = vpack.c.bf16 %v4198_v41, %v4197_v12 }
 0x530   : > { %v5027_v45 = vpop.eup %4331  ;;  %3753 = vmatprep.mubr.msk.f32.mxu1 %vm688_vm4, %v5023_v29  ;;  %v1631_v17 = vpop.permute.xlu1 %1630 }
 0x531   : > { %3754 = vmatmul.mubr.msk.f32.gmra.mrb[12].mxu1 %vm688_vm4, %v5027_v45 }
 0x533   : > { %v5033_v47 = vpop.eup %4333 }
 0x534   : > { %6241 = vst [vmem:[#allocation20_spill] sm:$0xff] %v5033_v47  ;;  %v5035_v42 = vpop.eup %4335  ;;  %3756 = vmatprep.mubr.msk.f32.mxu1 %vm688_vm4, %v5033_v47  ;;  %v1635_v30 = vpop.permute.xlu1 %1634 }
 0x535   : > { %3757 = vmatmul.mubr.msk.f32.gmra.mrb[14].mxu1 %vm688_vm4, %v5035_v42 }
 0x536   : > { %3996 = vmatpush3.bf16.xpose.msk.msra.mxu1 %vm4588_vm2, %v3991_v37  ;;  %3775 = vmatprep.mubr.msk.f32.mxu1 %vm534_vm1, %v1629_v44 }
 0x537   : > { %3999 = vmatprep.subr.msk.bf16.mxu1 %vm4588_vm2, %v3997_v49 }
 0x538   : > { %v1639_v43 = vpop.permute.xlu1 %1638 }
 0x53c   : > { %v1643_v46 = vpop.permute.xlu1 %1642 }
 0x53e   : > { %4002 = vmatpush3.bf16.xpose.msk.msra.mxu1 %vm4588_vm2, %v3997_v49 }
 0x545   : > { %3776 = vmatmul.mubr.msk.f32.vlgmr.msra.gmra.mrb[16].mxu1 %vm534_vm1, %v1631_v17 }
 0x546   : > { %3778 = vmatprep.mubr.msk.f32.mxu1 %vm534_vm1, %v1633_v5 }
 0x549   : > { %3779 = vmatmul.mubr.msk.f32.gmra.mrb[18].mxu1 %vm534_vm1, %v1635_v30 }
 0x54a   : > { %3781 = vmatprep.mubr.msk.f32.mxu1 %vm534_vm1, %v1637_v56 }
 0x54d   : > { %3782 = vmatmul.mubr.msk.f32.gmra.mrb[20].mxu1 %vm534_vm1, %v1639_v43 }
 0x54e   : > { %3784 = vmatprep.mubr.msk.f32.mxu1 %vm534_vm1, %v1641_v39 }
 0x551   : > { %3785 = vmatmul.mubr.msk.f32.gmra.mrb[22].mxu1 %vm534_vm1, %v1643_v46 }
 0x5ec   : > { %v5055_v2 = vpop.f32.mrb[8].mxu1 }
 0x5ed   : > { %6242 = vst [vmem:[#allocation21_spill] sm:$0xff] %v5055_v2  ;;  %v5057_v8 = vpop.f32.mrb[9].mxu1 }
 0x5ee   : > { %6243 = vst [vmem:[#allocation22_spill] sm:$0xff] %v5057_v8 }
 0x600   : > { %v5059_v26 = vpop.f32.mrb[10].mxu1 }
 0x601   : > { %6244 = vst [vmem:[#allocation23_spill] sm:$0xff] %v5059_v26  ;;  %v5061_v51 = vpop.f32.mrb[11].mxu1 }
 0x602   : > { %6245 = vst [vmem:[#allocation24_spill] sm:$0xff] %v5061_v51 }
 0x604   : > { %v5063_v37 = vpop.f32.mrb[12].mxu1 }
 0x605   : > { %6246 = vst [vmem:[#allocation25_spill] sm:$0xff] %v5063_v37  ;;  %v5065_v50 = vpop.f32.mrb[13].mxu1  ;;  %v4452_v37 = vld [vmem:[%s4583_s11 + $0x18] sm:$0xff] }
 0x606   : > { %6247 = vst [vmem:[#allocation26_spill] sm:$0xff] %v5065_v50 }
 0x608   : > { %v5067_v40 = vpop.f32.mrb[14].mxu1 }
 0x609   : > { %6248 = vst [vmem:[#allocation27_spill] sm:$0xff] %v5067_v40  ;;  %v5069_v41 = vpop.f32.mrb[15].mxu1 }
 0x60a   : > { %6249 = vst [vmem:[#allocation28_spill] sm:$0xff] %v5069_v41 }
 0x618   : > { %v5071_v12 = vpop.f32.mrb[16].mxu1 }
 0x619   : > { %v5073_v49 = vpop.f32.mrb[17].mxu1  ;;  %v1800_v44 = vsel %vm688_vm4, %v5071_v12, -inf }
 0x61a   : > { %1801 = vmax.xlane.f32.xlu1 %v1800_v44  ;;  %v1797_v17 = vsel %vm688_vm4, %v5073_v49, -inf }
 0x61b   : > { %1798 = vmax.xlane.f32.xlu0 %v1797_v17 }
 0x61c   : > { %v5079_v5 = vpop.f32.mrb[18].mxu1 }
 0x61d   : > { %v5081_v30 = vpop.f32.mrb[19].mxu1  ;;  %v1806_v46 = vsel %vm688_vm4, %v5079_v5, -inf }
 0x61e   : > { %v1803_v56 = vsel %vm688_vm4, %v5081_v30, -inf }
 0x61f   : > { %1804 = vmax.xlane.f32.xlu0 %v1803_v56 }
 0x620   : > { %v5085_v43 = vpop.f32.mrb[20].mxu1 }
 0x621   : > { %v5087_v39 = vpop.f32.mrb[21].mxu1  ;;  %v1812_v56 = vsel %vm688_vm4, %v5085_v43, -inf }
 0x622   : > { %v1809_v44 = vsel %vm688_vm4, %v5087_v39, -inf }
 0x623   : > { %1807 = vmax.xlane.f32.xlu0 %v1806_v46  ;;  %1810 = vmax.xlane.f32.xlu1 %v1809_v44  ;;  %v4449_v46 = vld [vmem:[%s4583_s11] sm:$0xff]  ;;  %v4450_v44 = vld [vmem:[%s4583_s11 + $0x8] sm:$0xff] }
 0x624   : > { %v5093_v17 = vpop.f32.mrb[22].mxu1  ;;  %v5107_v58 = vpack.i.bf16 %v4450_v44, %v4449_v46  ;;  %v2769_v44 = vsel %vm2768_vm5, %v4774_v21, %v4948_v53 }
 0x625   : > { %v5095_v1 = vpop.f32.mrb[23].mxu1  ;;  %v1818_v0 = vsel %vm688_vm4, %v5093_v17, -inf }
 0x626   : > { %v1815_v60 = vsel %vm688_vm4, %v5095_v1, -inf }
 0x627   : > { %1813 = vmax.xlane.f32.xlu0 %v1812_v56  ;;  %1816 = vmax.xlane.f32.xlu1 %v1815_v60 }
 0x62b   : > { %1819 = vmax.xlane.f32.xlu0 %v1818_v0  ;;  %v2770_v0 = vsel %vm2768_vm5, %v4762_v10, %v4945_v59 }
 0x638   : > { %4200 = vrot.lane.b32.xlu1 %v5107_v58, %s4506_s16 }
 0x6a7   : > { %v1802_v60 = vpop.xlane.xlu1 %1801 }
 0x6a8   : > { %v5112_v56 = vmax.f32 %v4757_v14, %v1802_v60  ;;  %v1799_v40 = vpop.xlane.xlu0 %1798  ;;  %v4451_v60 = vld [vmem:[%s4583_s11 + $0x10] sm:$0xff] }
 0x6a9   : > { %v5118_v46 = vmax.f32 %v4767_v20, %v1799_v40  ;;  %v5130_v41 = vpack.i.bf16 %v4452_v37, %v4451_v60  ;;  %v4453_v37 = vld [vmem:[%s4583_s11 + $0x20] sm:$0xff]  ;;  %v4454_v60 = vld [vmem:[%s4583_s11 + $0x28] sm:$0xff] }
 0x6aa   : > { %6250 = vst [vmem:[#allocation29_spill] sm:$0xff] %v5112_v56  ;;  %v5125_v57 = vsel %vm2777_vm6, %v2770_v0, %v5112_v56  ;;  %1860 = vperm.xlu1 %4205, %v5112_v56   ;;  %v2771_v0 = vsel %vm2768_vm5, %v4765_v11, %v4970_v16  ;;  %v5147_v51 = vpack.i.bf16 %v4454_v60, %v4453_v37  ;;  %v4455_v37 = vld [vmem:[%s4583_s11 + $0x30] sm:$0xff]  ;;  %v4456_v60 = vld [vmem:[%s4583_s11 + $0x38] sm:$0xff] }
 0x6ab   : > { %6251 = vst [vmem:[#allocation30_spill] sm:$0xff] %v5118_v46  ;;  %v5134_v50 = vsel %vm2777_vm6, %v2769_v44, %v5118_v46  ;;  %1855 = vperm.xlu0 %4204, %v5118_v46   ;;  %v2772_v46 = vsel %vm2768_vm5, %v4805_v25, %v4965_v3  ;;  %v4216_v16 = vpack.i.bf16 %v4456_v60, %v4455_v37 }
 0x6ac   : > { %v1805_v40 = vpop.xlane.xlu0 %1804  ;;  %v2774_v37 = vsel %vm2768_vm5, %v4812_v35, %v4955_v54 }
 0x6ad   : > { %v5138_v26 = vmax.f32 %v4759_v15, %v1805_v40 }
 0x6ae   : > { %4207 = vrot.lane.b32.xlu1 %v5130_v41, %s4506_s16 }
 0x6af   : > { %v5151_v44 = vsel %vm2777_vm6, %v2771_v0, %v5138_v26  ;;  %v2773_v0 = vsel %vm2768_vm5, %v4777_v22, %v4975_v6 }
 0x6b0   : > { %v1808_v2 = vpop.xlane.xlu0 %1807  ;;  %v1811_v8 = vpop.xlane.xlu1 %1810 }
 0x6b1   : > { %v5154_v40 = vmax.f32 %v4800_v13, %v1808_v2  ;;  %v5157_v56 = vmax.f32 %v4769_v18, %v1811_v8 }
 0x6b2   : > { %4212 = vrot.lane.b32.xlu1 %v5147_v51, %s4506_s16 }
 0x6b3   : > { %v5171_v2 = vsel %vm2777_vm6, %v2772_v46, %v5154_v40  ;;  %v5175_v8 = vsel %vm2777_vm6, %v2773_v0, %v5157_v56  ;;  %v2775_v46 = vsel %vm2768_vm5, %v4788_v28, %v4980_v55  ;;  %v2776_v55 = vsel %vm2768_vm5, %v4819_v38, %v4960_v4 }
 0x6b4   : > { %v1814_v59 = vpop.xlane.xlu0 %1813  ;;  %v1817_v3 = vpop.xlane.xlu1 %1816 }
 0x6b5   : > { %v5178_v53 = vmax.f32 %v4807_v34, %v1814_v59  ;;  %v5181_v47 = vmax.f32 %v4779_v23, %v1817_v3 }
 0x6b6   : > { %4217 = vrot.lane.b32.xlu1 %v4216_v16, %s4506_s16 }
 0x6b7   : > { %6252 = vst [vmem:[#allocation31_spill] sm:$0xff] %v5178_v53  ;;  %v5192_v60 = vsel %vm2777_vm6, %v2774_v37, %v5178_v53  ;;  %1880 = vperm.xlu0 %4204, %v5178_v53   ;;  %v5197_v23 = vsel %vm2777_vm6, %v2775_v46, %v5181_v47 }
 0x6b8   : > { %v1820_v3 = vpop.xlane.xlu0 %1819  ;;  %v4201_v59 = vpop.permute.xlu1 %4200 }
 0x6b9   : > { %v5200_v0 = vmax.f32 %v4814_v36, %v1820_v3  ;;  %v4203_v54 = vunpack.i.h.bf16 %v4201_v59  ;;  %v4202_v37 = vunpack.i.l.bf16 %v4201_v59  ;;  %v6253_v36 = vmov 0   ;;  %v4457_v3 = vld [vmem:[#allocation2] sm:$0xff]  ;;  %v4460_v59 = vld [vmem:[#allocation2 + $0x30] sm:$0xff] }
 0x6ba   : > { %4222 = vrot.lane.b32.xlu1 %v5107_v58, %s4507_s17 }
 0x6bb   : > { %v5209_v53 = vsel %vm2777_vm6, %v2776_v55, %v5200_v0  ;;  %1890 = vperm.xlu0 %4204, %v5200_v0   ;;  %v4003_v46 = vpack.c.bf16 %v4203_v54, %v4202_v37  ;;  %v4458_v55 = vld [vmem:[#allocation2 + $0x10] sm:$0xff]  ;;  %v4459_v54 = vld [vmem:[#allocation2 + $0x20] sm:$0xff]  ;;  %v4461_v37 = vld [vmem:[#allocation2 + $0x8] sm:$0xff] }
 0x6bd   : > { %4004 = vmatprep.subr.bf16.mxu0 %v4003_v46 }
 0x6be   : > { %1870 = vperm.xlu1 %4205, %v5154_v40   ;;  %4006 = vmatpush3.bf16.msra.mxu0 %v4003_v46  ;;  %v4462_v46 = vld [vmem:[#allocation2 + $0x18] sm:$0xff] }
 0x6bf   : > { %4232 = vrot.lane.b32.xlu0 %v5147_v51, %s4507_s17 }
 0x6c0   : > { %4261 = vset.pattern.permute.xlu0 %v6253_v36 }
 0x6c2   : > { %1865 = vperm.xlu1 %4205, %v5138_v26  }
 0x6c3   : > { %2198 = vrot.lane.b32.xlu0 %v4457_v3, %s4507_s17  ;;  %v4463_v3 = vld [vmem:[#allocation2 + $0x28] sm:$0xff] }
 0x6c6   : > { %1875 = vperm.xlu1 %4205, %v5157_v56  }
 0x6c7   : > { %2202 = vrot.lane.b32.xlu0 %v4458_v55, %s4507_s17  ;;  %v4464_v55 = vld [vmem:[#allocation2 + $0x38] sm:$0xff] }
 0x6ca   : > { %1885 = vperm.xlu1 %4205, %v5181_v47  }
 0x6cb   : > { %2206 = vrot.lane.b32.xlu0 %v4459_v54, %s4507_s17  ;;  %v823_v54 = vsel %vm688_vm4, %v4843_v62, 0.0  ;;  %v826_v62 = vsel %vm688_vm4, %v4855_v19, 0.0  ;;  %v724_v19 = vsub.f32 %v4800_v13, %v4805_v25 }
 0x6ce   : > { %4227 = vrot.lane.b32.xlu1 %v5130_v41, %s4507_s17 }
 0x6cf   : > { %2210 = vrot.lane.b32.xlu0 %v4460_v59, %s4507_s17  ;;  %4262 = vset.pattern.permute.xlu1 %v6253_v36  ;;  %v829_v59 = vsel %vm688_vm4, %v4857_v27, 0.0  ;;  %v832_v27 = vsel %vm688_vm4, %v4863_v63, 0.0  ;;  %v725_v63 = vsub.f32 %v4769_v18, %v4777_v22  ;;  %v5270_v18 = vld [vmem:[#allocation3 + $0x30] sm:$0xff] }
 0x6d0   : > { %v727_v22 = vsub.f32 %v5270_v18, %v4788_v28 }
 0x6d2   : > { %4237 = vrot.lane.b32.xlu1 %v4216_v16, %s4507_s17 }
 0x6d3   : > { %4257 = vrot.lane.b32.xlu0 %v4216_v16, %s4508_s18  ;;  %v820_v16 = vsel %vm688_vm4, %v4841_v61, 0.0  ;;  %v817_v61 = vsel %vm688_vm4, %v4833_v24, 0.0 }
 0x6d6   : > { %2200 = vrot.lane.b32.xlu1 %v4461_v37, %s4507_s17  ;;  %v835_v37 = vsel %vm688_vm4, %v4867_v52, 0.0  ;;  %v723_v52 = vsub.f32 %v4759_v15, %v4765_v11  ;;  %v726_v15 = vsub.f32 %v4807_v34, %v4812_v35 }
 0x6da   : > { %2204 = vrot.lane.b32.xlu1 %v4462_v46, %s4507_s17  ;;  %v733_v46 = vmul.f32 1.442695, %v723_v52 }
 0x6de   : > { %2208 = vrot.lane.b32.xlu1 %v4463_v3, %s4507_s17  ;;  %v735_v3 = vmul.f32 1.442695, %v724_v19 }
 0x6e2   : > { %2212 = vrot.lane.b32.xlu1 %v4464_v55, %s4507_s17 }
 0x6e6   : > { %4242 = vrot.lane.b32.xlu1 %v5107_v58, %s4508_s18  ;;  %v721_v58 = vsub.f32 %v4767_v20, %v4774_v21  ;;  %v722_v20 = vsub.f32 %v4757_v14, %v4762_v10  ;;  %v838_v21 = vsel %vm688_vm4, %v4875_v32, 0.0 }
 0x6e8   : > { %v731_v24 = vmul.f32 1.442695, %v722_v20 }
 0x6ea   : > { %4247 = vrot.lane.b32.xlu1 %v5130_v41, %s4508_s18 }
 0x6ee   : > { %4252 = vrot.lane.b32.xlu1 %v5147_v51, %s4508_s18  ;;  %v729_v51 = vmul.f32 1.442695, %v721_v58 }
 0x6f0   : > { %4337 = vpow2.f32 %v729_v51 }
 0x6f1   : > { %4339 = vpow2.f32 %v731_v24 }
 0x6f2   : > { %821 = vadd.xlane.f32.xlu0 %v820_v16  ;;  %4341 = vpow2.f32 %v733_v46  ;;  %v737_v16 = vmul.f32 1.442695, %v725_v63 }
 0x6f3   : > { %4343 = vpow2.f32 %v735_v3 }
 0x6f6   : > { %824 = vadd.xlane.f32.xlu0 %v823_v54 }
 0x6fa   : > { %830 = vadd.xlane.f32.xlu0 %v829_v59  ;;  %v5246_v41 = vpop.eup %4337 }
 0x6fb   : > { %6254 = vst [vmem:[#allocation32_spill] sm:$0xff] %v5246_v41  ;;  %v5267_v59 = vpop.eup %4339 }
 0x6fc   : > { %6255 = vst [vmem:[#allocation33_spill] sm:$0xff] %v5267_v59  ;;  %v5274_v34 = vpop.eup %4341 }
 0x6fd   : > { %6256 = vst [vmem:[#allocation34_spill] sm:$0xff] %v5274_v34  ;;  %v5277_v20 = vpop.eup %4343 }
 0x6fe   : > { %836 = vadd.xlane.f32.xlu0 %v835_v37  ;;  %6257 = vst [vmem:[#allocation35_spill] sm:$0xff] %v5277_v20 }
 0x712   : > { %818 = vadd.xlane.f32.xlu1 %v817_v61  ;;  %v741_v61 = vmul.f32 1.442695, %v727_v22 }
 0x714   : > { %851 = vperm.xlu0 %4261, %v5246_v41  }
 0x716   : > { %827 = vadd.xlane.f32.xlu1 %v826_v62 }
 0x71a   : > { %833 = vadd.xlane.f32.xlu1 %v832_v27 }
 0x71e   : > { %839 = vadd.xlane.f32.xlu1 %v838_v21 }
 0x729   : > { %v1861_v55 = vpop.permute.xlu1 %1860 }
 0x72a   : > { %v1856_v14 = vpop.permute.xlu0 %1855  ;;  %v1894_v10 = vsub.f32 %v5071_v12, %v1861_v55  ;;  %v739_v12 = vmul.f32 1.442695, %v726_v15 }
 0x72b   : > { %v1893_v32 = vsub.f32 %v5073_v49, %v1856_v14 }
 0x72c   : > { %v1903_v37 = vmul.f32 1.442695, %v1894_v10 }
 0x72d   : > { %v1901_v11 = vmul.f32 1.442695, %v1893_v32  ;;  %v4208_v54 = vpop.permute.xlu1 %4207 }
 0x72e   : > { %v4210_v13 = vunpack.i.h.bf16 %v4208_v54  ;;  %v4209_v25 = vunpack.i.l.bf16 %v4208_v54 }
 0x72f   : > { %4345 = vpow2.f32 %v1901_v11  ;;  %856 = vperm.xlu1 %4262, %v5267_v59  }
 0x730   : > { %4347 = vpow2.f32 %v737_v16  ;;  %v4007_v49 = vpack.c.bf16 %v4210_v13, %v4209_v25 }
 0x731   : > { %v4213_v58 = vpop.permute.xlu1 %4212  ;;  %4349 = vpow2.f32 %v1903_v37 }
 0x732   : > { %v4215_v35 = vunpack.i.h.bf16 %v4213_v58  ;;  %v4214_v51 = vunpack.i.l.bf16 %v4213_v58  ;;  %4008 = vmatprep.subr.bf16.mxu0 %v4007_v49  ;;  %4351 = vpow2.f32 %v739_v12 }
 0x733   : > { %861 = vperm.xlu1 %4262, %v5274_v34   ;;  %4010 = vmatpush3.bf16.msra.mxu0 %v4007_v49  ;;  %4353 = vpow2.f32 %v741_v61 }
 0x734   : > { %v4011_v62 = vpack.c.bf16 %v4215_v35, %v4214_v51 }
 0x735   : > { %v4218_v27 = vpop.permute.xlu1 %4217 }
 0x736   : > { %v4220_v21 = vunpack.i.h.bf16 %v4218_v27  ;;  %v4219_v28 = vunpack.i.l.bf16 %v4218_v27  ;;  %4012 = vmatprep.subr.bf16.mxu0 %v4011_v62  ;;  %v1881_v16 = vpop.permute.xlu0 %1880 }
 0x737   : > { %866 = vperm.xlu1 %4262, %v5277_v20   ;;  %4014 = vmatpush3.bf16.msra.mxu0 %v4011_v62  ;;  %v1898_v25 = vsub.f32 %v5085_v43, %v1881_v16 }
 0x738   : > { %v4015_v24 = vpack.c.bf16 %v4220_v21, %v4219_v28 }
 0x739   : > { %v5280_v52 = vpop.eup %4345  ;;  %v4223_v46 = vpop.permute.xlu1 %4222  ;;  %v1911_v58 = vmul.f32 1.442695, %v1898_v25 }
 0x73a   : > { %v5282_v19 = vpop.eup %4347  ;;  %v4225_v63 = vunpack.i.h.bf16 %v4223_v46  ;;  %v4224_v3 = vunpack.i.l.bf16 %v4223_v46  ;;  %3803 = vmatprep.mubr.msk.f32.mxu0 %vm688_vm4, %v5280_v52  ;;  %4016 = vmatprep.subr.bf16.mxu0 %v4015_v24  ;;  %v1891_v22 = vpop.permute.xlu0 %1890 }
 0x73b   : > { %6258 = vst [vmem:[#allocation36_spill] sm:$0xff] %v5282_v19  ;;  %871 = vperm.xlu1 %4262, %v5282_v19   ;;  %4018 = vmatpush3.bf16.msra.mxu0 %v4015_v24  ;;  %v5287_v14 = vpop.eup %4349  ;;  %v1900_v35 = vsub.f32 %v5093_v17, %v1891_v22 }
 0x73c   : > { %v4019_v55 = vpack.c.bf16 %v4225_v63, %v4224_v3  ;;  %v5289_v32 = vpop.eup %4351 }
 0x73d   : > { %v1871_v10 = vpop.permute.xlu1 %1870  ;;  %v5297_v54 = vpop.eup %4353  ;;  %v1915_v61 = vmul.f32 1.442695, %v1900_v35 }
 0x73e   : > { %3804 = vmatmul.mubr.msk.f32.vlgmr.msra.gmra.mrb[24].mxu0 %vm688_vm4, %v5287_v14  ;;  %4021 = vmatprep.subr.msk.bf16.mxu0 %vm4588_vm2, %v4019_v55  ;;  %v1896_v15 = vsub.f32 %v5079_v5, %v1871_v10  ;;  %6259 = vst [vmem:[#allocation37_spill] sm:$0xff] %v5297_v54  ;;  %v4233_v62 = vpop.permute.xlu0 %4232 }
 0x73f   : > { %876 = vperm.xlu1 %4262, %v5289_v32   ;;  %v4235_v27 = vunpack.i.h.bf16 %v4233_v62  ;;  %v4234_v21 = vunpack.i.l.bf16 %v4233_v62 }
 0x740   : > { %v1907_v37 = vmul.f32 1.442695, %v1896_v15 }
 0x741   : > { %v1866_v11 = vpop.permute.xlu1 %1865  ;;  %v4031_v17 = vpack.c.bf16 %v4235_v27, %v4234_v21 }
 0x742   : > { %v1895_v13 = vsub.f32 %v5081_v30, %v1866_v11  ;;  %v2199_v25 = vpop.permute.xlu0 %2198 }
 0x743   : > { %881 = vperm.xlu1 %4262, %v5297_v54  }
 0x744   : > { %v1905_v12 = vmul.f32 1.442695, %v1895_v13  ;;  %4024 = vmatpush3.bf16.xpose.msk.msra.mxu0 %vm4588_vm2, %v4019_v55 }
 0x745   : > { %v1876_v49 = vpop.permute.xlu1 %1875 }
 0x746   : > { %4355 = vpow2.f32 %v1905_v12  ;;  %v1897_v5 = vsub.f32 %v5087_v39, %v1876_v49 }
 0x747   : > { %4357 = vpow2.f32 %v1907_v37 }
 0x748   : > { %v1909_v51 = vmul.f32 1.442695, %v1897_v5  ;;  %v2203_v5 = vpop.permute.xlu0 %2202 }
 0x749   : > { %v1886_v30 = vpop.permute.xlu1 %1885 }
 0x74a   : > { %4359 = vpow2.f32 %v1909_v51  ;;  %v1899_v43 = vsub.f32 %v5095_v1, %v1886_v30 }
 0x74b   : > { %4361 = vpow2.f32 %v1911_v58 }
 0x74c   : > { %v1913_v28 = vmul.f32 1.442695, %v1899_v43  ;;  %v2207_v51 = vpop.permute.xlu0 %2206 }
 0x74d   : > { %v4228_v24 = vpop.permute.xlu1 %4227 }
 0x74e   : > { %4363 = vpow2.f32 %v1913_v28  ;;  %v4230_v46 = vunpack.i.h.bf16 %v4228_v24  ;;  %v4229_v63 = vunpack.i.l.bf16 %v4228_v24 }
 0x74f   : > { %4365 = vpow2.f32 %v1915_v61 }
 0x750   : > { %v5307_v39 = vpop.eup %4355  ;;  %v4025_v3 = vpack.c.bf16 %v4230_v46, %v4229_v63  ;;  %v2211_v62 = vpop.permute.xlu0 %2210 }
 0x751   : > { %v5309_v55 = vpop.eup %4357  ;;  %v4238_v10 = vpop.permute.xlu1 %4237  ;;  %3806 = vmatprep.mubr.msk.f32.mxu0 %vm688_vm4, %v5307_v39 }
 0x752   : > { %3807 = vmatmul.mubr.msk.f32.gmra.mrb[26].mxu0 %vm688_vm4, %v5309_v55  ;;  %4027 = vmatprep.subr.msk.bf16.mxu0 %vm4588_vm2, %v4025_v3  ;;  %v4240_v16 = vunpack.i.h.bf16 %v4238_v10  ;;  %v4239_v15 = vunpack.i.l.bf16 %v4238_v10 }
 0x753   : > { %4030 = vmatpush3.bf16.xpose.msk.msra.mxu0 %vm4588_vm2, %v4025_v3 }
 0x754   : > { %v5319_v1 = vpop.eup %4359  ;;  %4033 = vmatprep.subr.msk.bf16.mxu0 %vm4588_vm2, %v4031_v17  ;;  %v4037_v22 = vpack.c.bf16 %v4240_v16, %v4239_v15  ;;  %v4258_v46 = vpop.permute.xlu0 %4257 }
 0x755   : > { %v5323_v11 = vpop.eup %4361  ;;  %v2201_v13 = vpop.permute.xlu1 %2200  ;;  %3809 = vmatprep.mubr.msk.f32.mxu0 %vm688_vm4, %v5319_v1  ;;  %v4260_v7 = vunpack.i.h.bf16 %v4258_v46 }
 0x756   : > { %3810 = vmatmul.mubr.msk.f32.gmra.mrb[28].mxu0 %vm688_vm4, %v5323_v11 }
 0x758   : > { %v5329_v37 = vpop.eup %4363 }
 0x759   : > { %v5331_v12 = vpop.eup %4365  ;;  %v2205_v49 = vpop.permute.xlu1 %2204  ;;  %3812 = vmatprep.mubr.msk.f32.mxu0 %vm688_vm4, %v5329_v37 }
 0x75a   : > { %3813 = vmatmul.mubr.msk.f32.gmra.mrb[30].mxu0 %vm688_vm4, %v5331_v12 }
 0x75b   : > { %4036 = vmatpush3.bf16.xpose.msk.msra.mxu0 %vm4588_vm2, %v4031_v17  ;;  %3831 = vmatprep.mubr.msk.f32.mxu0 %vm534_vm1, %v2199_v25  ;;  %v4259_v17 = vunpack.i.l.bf16 %v4258_v46 }
 0x75c   : > { %4039 = vmatprep.subr.msk.bf16.mxu0 %vm4588_vm2, %v4037_v22 }
 0x75d   : > { %v2209_v58 = vpop.permute.xlu1 %2208 }
 0x761   : > { %v2213_v35 = vpop.permute.xlu1 %2212 }
 0x763   : > { %4042 = vmatpush3.bf16.xpose.msk.msra.mxu0 %vm4588_vm2, %v4037_v22 }
 0x765   : > { %v4243_v30 = vpop.permute.xlu1 %4242 }
 0x766   : > { %v4245_v43 = vunpack.i.h.bf16 %v4243_v30  ;;  %v4244_v61 = vunpack.i.l.bf16 %v4243_v30 }
 0x768   : > { %v4043_v27 = vpack.c.bf16 %v4245_v43, %v4244_v61 }
 0x769   : > { %v4248_v21 = vpop.permute.xlu1 %4247 }
 0x76a   : > { %3832 = vmatmul.mubr.msk.f32.vlgmr.msra.gmra.mrb[32].mxu0 %vm534_vm1, %v2201_v13  ;;  %v4250_v28 = vunpack.i.h.bf16 %v4248_v21  ;;  %v4249_v24 = vunpack.i.l.bf16 %v4248_v21  ;;  %4044 = vmatprep.subr.bf16.mxu0 %v4043_v27  ;;  %v4055_v13 = vpack.c.bf16 %v4260_v7, %v4259_v17 }
 0x76b   : > { %3834 = vmatprep.mubr.msk.f32.mxu0 %vm534_vm1, %v2203_v5  ;;  %4067 = vmatprep.subr.bf16.mxu1 %v4043_v27 }
 0x76c   : > { %v4047_v63 = vpack.c.bf16 %v4250_v28, %v4249_v24  ;;  %4046 = vmatpush3.bf16.msra.mxu0 %v4043_v27  ;;  %4071 = vmatpush3.bf16.msra.mxu1 %v4043_v27 }
 0x76d   : > { %v4253_v3 = vpop.permute.xlu1 %4252 }
 0x76e   : > { %3835 = vmatmul.mubr.msk.f32.gmra.mrb[34].mxu0 %vm534_vm1, %v2205_v49  ;;  %v4255_v10 = vunpack.i.h.bf16 %v4253_v3  ;;  %v4254_v16 = vunpack.i.l.bf16 %v4253_v3  ;;  %4048 = vmatprep.subr.bf16.mxu0 %v4047_v63  ;;  %v5389_v3 = vld [vmem:[#allocation3 + $0x38] sm:$0xff] }
 0x76f   : > { %3837 = vmatprep.mubr.msk.f32.mxu0 %vm534_vm1, %v2207_v51  ;;  %4068 = vmatprep.subr.bf16.mxu1 %v4047_v63 }
 0x770   : > { %v4051_v15 = vpack.c.bf16 %v4255_v10, %v4254_v16  ;;  %4050 = vmatpush3.bf16.msra.mxu0 %v4047_v63  ;;  %4072 = vmatpush3.bf16.msra.mxu1 %v4047_v63  ;;  %v728_v10 = vsub.f32 %v5389_v3, %v4819_v38  ;;  %v1361_v38 = vsel %vm688_vm4, %v5011_v31, 0.0 }
 0x772   : > { %3838 = vmatmul.mubr.msk.f32.gmra.mrb[36].mxu0 %vm534_vm1, %v2209_v58  ;;  %4052 = vmatprep.subr.bf16.mxu0 %v4051_v15 }
 0x773   : > { %3840 = vmatprep.mubr.msk.f32.mxu0 %vm534_vm1, %v2211_v62  ;;  %4069 = vmatprep.subr.bf16.mxu1 %v4051_v15 }
 0x774   : > { %4054 = vmatpush3.bf16.msra.mxu0 %v4051_v15  ;;  %4073 = vmatpush3.bf16.msra.mxu1 %v4051_v15 }
 0x775   : > { %4056 = vmatprep.subr.bf16.mxu0 %v4055_v13  ;;  %4070 = vmatprep.subr.bf16.mxu1 %v4055_v13 }
 0x776   : > { %3841 = vmatmul.mubr.msk.f32.gmra.mrb[38].mxu0 %vm534_vm1, %v2213_v35 }
 0x778   : > { %4058 = vmatpush3.bf16.msra.mxu0 %v4055_v13  ;;  %4074 = vmatpush3.bf16.msra.mxu1 %v4055_v13 }
 0x79f   : > { %v5416_v31 = vpop.xlane.xlu1 %818 }
 0x7a0   : > { %6260 = vst [vmem:[#allocation38_spill] sm:$0xff] %v5416_v31  ;;  %v5446_v31 = vld [vmem:[#allocation3 + $0x8] sm:$0xff] }
 0x811   : > { %v5351_v25 = vpop.f32.mrb[24].mxu0 }
 0x812   : > { %v5353_v22 = vpop.f32.mrb[25].mxu0 }
 0x825   : > { %v5355_v49 = vpop.f32.mrb[26].mxu0 }
 0x826   : > { %v5357_v5 = vpop.f32.mrb[27].mxu0 }
 0x829   : > { %v5359_v58 = vpop.f32.mrb[28].mxu0 }
 0x82a   : > { %v5361_v51 = vpop.f32.mrb[29].mxu0 }
 0x82d   : > { %v5363_v30 = vpop.f32.mrb[30].mxu0 }
 0x82e   : > { %v5365_v43 = vpop.f32.mrb[31].mxu0 }
 0x83d   : > { %v5367_v61 = vpop.f32.mrb[32].mxu0 }
 0x83e   : > { %v5369_v35 = vpop.f32.mrb[33].mxu0  ;;  %v2370_v62 = vsel %vm688_vm4, %v5367_v61, -inf }
 0x83f   : > { %2371 = vmax.xlane.f32.xlu1 %v2370_v62  ;;  %v2367_v27 = vsel %vm688_vm4, %v5369_v35, -inf }
 0x840   : > { %2368 = vmax.xlane.f32.xlu0 %v2367_v27  ;;  %v743_v27 = vmul.f32 1.442695, %v728_v10 }
 0x841   : > { %v5375_v21 = vpop.f32.mrb[34].mxu0 }
 0x842   : > { %v5377_v28 = vpop.f32.mrb[35].mxu0  ;;  %v2376_v24 = vsel %vm688_vm4, %v5375_v21, -inf  ;;  %4367 = vpow2.f32 %v743_v27 }
 0x843   : > { %v2373_v17 = vsel %vm688_vm4, %v5377_v28, -inf }
 0x844   : > { %2377 = vmax.xlane.f32.xlu0 %v2376_v24  ;;  %v1358_v24 = vsel %vm688_vm4, %v4997_v48, 0.0  ;;  %v1355_v48 = vsel %vm688_vm4, %v4993_v9, 0.0 }
 0x845   : > { %v5381_v46 = vpop.f32.mrb[36].mxu0 }
 0x846   : > { %v5383_v63 = vpop.f32.mrb[37].mxu0  ;;  %v2382_v7 = vsel %vm688_vm4, %v5381_v46, -inf }
 0x847   : > { %2383 = vmax.xlane.f32.xlu1 %v2382_v7  ;;  %v2379_v62 = vsel %vm688_vm4, %v5383_v63, -inf  ;;  %v6212_v7 = vmov 3  }
 0x848   : > { %2374 = vmax.xlane.f32.xlu0 %v2373_v17  ;;  %v1364_v17 = vsel %vm688_vm4, %v5013_v33, 0.0 }
 0x849   : > { %v5393_v16 = vpop.f32.mrb[38].mxu0  ;;  %4264 = vset.pattern.permute.xlu0 %v6212_v7 }
 0x84a   : > { %v5395_v15 = vpop.f32.mrb[39].mxu0  ;;  %v2388_v13 = vsel %vm688_vm4, %v5393_v16, -inf }
 0x84b   : > { %2389 = vmax.xlane.f32.xlu1 %v2388_v13  ;;  %v2385_v10 = vsel %vm688_vm4, %v5395_v15, -inf }
 0x84c   : > { %2380 = vmax.xlane.f32.xlu0 %v2379_v62  ;;  %v5408_v13 = vpop.eup %4367  ;;  %v5418_v62 = vpop.xlane.xlu1 %827 }
 0x84d   : > { %6261 = vst [vmem:[#allocation39_spill] sm:$0xff] %v5418_v62 }
 0x850   : > { %1359 = vadd.xlane.f32.xlu0 %v1358_v24  ;;  %v5420_v33 = vpop.xlane.xlu1 %833 }
 0x854   : > { %1362 = vadd.xlane.f32.xlu0 %v1361_v38  ;;  %v5422_v27 = vpop.xlane.xlu1 %839 }
 0x858   : > { %1365 = vadd.xlane.f32.xlu0 %v1364_v17  ;;  %v5424_v24 = vpop.permute.xlu1 %856  ;;  %v5428_v17 = vpop.xlane.xlu0 %821 }
 0x859   : > { %6262 = vst [vmem:[#allocation40_spill] sm:$0xff] %v5424_v24  ;;  %6264 = vst [vmem:[#allocation42_spill] sm:$0xff] %v5428_v17  ;;  %v5451_v17 = vld [vmem:[#allocation3] sm:$0xff] }
 0x85c   : > { %886 = vperm.xlu1 %4262, %v5408_v13   ;;  %2386 = vmax.xlane.f32.xlu0 %v2385_v10  ;;  %v5426_v38 = vpop.permute.xlu1 %861 }
 0x85d   : > { %6263 = vst [vmem:[#allocation41_spill] sm:$0xff] %v5426_v38  ;;  %v5498_v38 = vld [vmem:[#allocation3 + $0x20] sm:$0xff] }
 0x860   : > { %4263 = vset.pattern.permute.xlu1 %v6212_v7  ;;  %v5430_v10 = vpop.permute.xlu1 %866  ;;  %v5432_v7 = vpop.xlane.xlu0 %824 }
 0x861   : > { %6265 = vst [vmem:[#allocation43_spill] sm:$0xff] %v5430_v10  ;;  %6266 = vst [vmem:[#allocation44_spill] sm:$0xff] %v5432_v7 }
 0x864   : > { %v5434_v9 = vpop.permute.xlu1 %871 }
 0x865   : > { %6267 = vst [vmem:[#allocation45_spill] sm:$0xff] %v5434_v9  ;;  %v5481_v9 = vld [vmem:[#allocation3 + $0x10] sm:$0xff] }
 0x868   : > { %v5438_v54 = vpop.permute.xlu1 %876 }
 0x869   : > { %6269 = vst [vmem:[#allocation47_spill] sm:$0xff] %v5438_v54  ;;  %v5466_v54 = vld [vmem:[#allocation3 + $0x18] sm:$0xff] }
 0x86c   : > { %v5442_v34 = vpop.permute.xlu1 %881 }
 0x86d   : > { %6271 = vst [vmem:[#allocation49_spill] sm:$0xff] %v5442_v34 }
 0x880   : > { %1356 = vadd.xlane.f32.xlu1 %v1355_v48  ;;  %v5436_v48 = vpop.xlane.xlu0 %830 }
 0x881   : > { %6268 = vst [vmem:[#allocation46_spill] sm:$0xff] %v5436_v48 }
 0x884   : > { %v5440_v19 = vpop.xlane.xlu0 %836 }
 0x885   : > { %6270 = vst [vmem:[#allocation48_spill] sm:$0xff] %v5440_v19 }
 0x888   : > { %v5444_v62 = vpop.permute.xlu0 %851 }
 0x8cc   : > { %v2372_v20 = vpop.xlane.xlu1 %2371 }
 0x8cd   : > { %v5449_v41 = vmax.f32 %v5446_v31, %v2372_v20  ;;  %v2369_v7 = vpop.xlane.xlu0 %2368 }
 0x8ce   : > { %v5454_v48 = vmax.f32 %v5451_v17, %v2369_v7 }
 0x8cf   : > { %v2788_v19 = vsel %vm2786_vm7, %v5125_v57, %v5449_v41  ;;  %2430 = vperm.xlu1 %4263, %v5449_v41  }
 0x8d0   : > { %2797 = vst.msk [vmem:[#allocation3 + $0x8] sm:$0xff] %vm469_vm3, %v2788_v19  ;;  %v2787_v59 = vsel %vm2786_vm7, %v5134_v50, %v5454_v48  ;;  %2425 = vperm.xlu0 %4264, %v5454_v48   ;;  %v5476_v50 = vld [vmem:[#allocation3 + $0x28] sm:$0xff] }
 0x8d1   : > { %2796 = vst.msk [vmem:[#allocation3] sm:$0xff] %vm469_vm3, %v2787_v59  ;;  %v2378_v20 = vpop.xlane.xlu0 %2377 }
 0x8d2   : > { %v5469_v7 = vmax.f32 %v5466_v54, %v2378_v20 }
 0x8d4   : > { %v2790_v57 = vsel %vm2786_vm7, %v5171_v2, %v5469_v7  ;;  %v2384_v34 = vpop.xlane.xlu1 %2383  ;;  %2440 = vperm.xlu1 %4263, %v5469_v7  }
 0x8d5   : > { %2799 = vst.msk [vmem:[#allocation3 + $0x18] sm:$0xff] %vm469_vm3, %v2790_v57  ;;  %v5479_v19 = vmax.f32 %v5476_v50, %v2384_v34  ;;  %v2375_v59 = vpop.xlane.xlu0 %2374 }
 0x8d6   : > { %v5484_v20 = vmax.f32 %v5481_v9, %v2375_v59 }
 0x8d7   : > { %v2792_v2 = vsel %vm2786_vm7, %v5192_v60, %v5479_v19 }
 0x8d8   : > { %2801 = vst.msk [vmem:[#allocation3 + $0x28] sm:$0xff] %vm469_vm3, %v2792_v2  ;;  %v2789_v57 = vsel %vm2786_vm7, %v5151_v44, %v5484_v20  ;;  %2435 = vperm.xlu1 %4263, %v5484_v20   ;;  %v2390_v34 = vpop.xlane.xlu1 %2389 }
 0x8d9   : > { %2798 = vst.msk [vmem:[#allocation3 + $0x10] sm:$0xff] %vm469_vm3, %v2789_v57  ;;  %v5496_v10 = vmax.f32 %v5389_v3, %v2390_v34  ;;  %v2381_v59 = vpop.xlane.xlu0 %2380  ;;  %v6272_v57 = vmov 1  }
 0x8da   : > { %v5501_v24 = vmax.f32 %v5498_v38, %v2381_v59 }
 0x8db   : > { %v2794_v60 = vsel %vm2786_vm7, %v5209_v53, %v5496_v10  ;;  %2460 = vperm.xlu0 %4264, %v5496_v10  }
 0x8dc   : > { %2803 = vst.msk [vmem:[#allocation3 + $0x38] sm:$0xff] %vm469_vm3, %v2794_v60  ;;  %v2791_v44 = vsel %vm2786_vm7, %v5175_v8, %v5501_v24  ;;  %2450 = vperm.xlu1 %4263, %v5479_v19  }
 0x8dd   : > { %2800 = vst.msk [vmem:[#allocation3 + $0x20] sm:$0xff] %vm469_vm3, %v2791_v44  ;;  %v5513_v2 = vpop.xlane.xlu0 %1359  ;;  %v1370_v44 = vsel %vm688_vm4, %v5027_v45, 0.0  ;;  %v1937_v45 = vsel %vm688_vm4, %v5319_v1, 0.0  ;;  %v1931_v1 = vsel %vm688_vm4, %v5307_v39, 0.0 }
 0x8df   : > { %4266 = vset.pattern.permute.xlu0 %v6272_v57 }
 0x8e0   : > { %2445 = vperm.xlu1 %4263, %v5501_v24  }
 0x8e1   : > { %v5517_v34 = vpop.xlane.xlu0 %1362 }
 0x8e2   : > { %6273 = vst [vmem:[#allocation50_spill] sm:$0xff] %v5517_v34  ;;  %v1376_v34 = vsel %vm688_vm4, %v5035_v42, 0.0  ;;  %v1367_v42 = vsel %vm688_vm4, %v5023_v29, 0.0  ;;  %v1946_v29 = vsel %vm688_vm4, %v5331_v12, 0.0 }
 0x8e5   : > { %v5519_v53 = vpop.xlane.xlu0 %1365 }
 0x8e9   : > { %v2387_v59 = vpop.xlane.xlu0 %2386 }
 0x8ea   : > { %v5522_v60 = vmax.f32 %v5270_v18, %v2387_v59  ;;  %v1925_v59 = vsel %vm688_vm4, %v5280_v52, 0.0  ;;  %v1940_v52 = vsel %vm688_vm4, %v5323_v11, 0.0  ;;  %v6276_v11 = vld [vmem:[#allocation14_spill] sm:$0xff] }
 0x8ec   : > { %v2793_v8 = vsel %vm2786_vm7, %v5197_v23, %v5522_v60  ;;  %2455 = vperm.xlu1 %4263, %v5522_v60   ;;  %v1928_v23 = vsel %vm688_vm4, %v5287_v14, 0.0 }
 0x8ed   : > { %2802 = vst.msk [vmem:[#allocation3 + $0x30] sm:$0xff] %vm469_vm3, %v2793_v8  ;;  %v1934_v8 = vsel %vm688_vm4, %v5309_v55, 0.0  ;;  %v1943_v55 = vsel %vm688_vm4, %v5329_v37, 0.0 }
 0x8f0   : > { %4265 = vset.pattern.permute.xlu1 %v6272_v57 }
 0x8fa   : > { %1371 = vadd.xlane.f32.xlu0 %v1370_v44  ;;  %v6275_v44 = vld [vmem:[#allocation15_spill] sm:$0xff] }
 0x8fe   : > { %1377 = vadd.xlane.f32.xlu0 %v1376_v34  ;;  %v6274_v34 = vld [vmem:[#allocation20_spill] sm:$0xff] }
 0x8ff   : > { %v1373_v14 = vsel %vm688_vm4, %v6274_v34, 0.0 }
 0x902   : > { %1926 = vadd.xlane.f32.xlu0 %v1925_v59  ;;  %v1259_v59 = vsub.f32 %v5451_v17, %v6275_v44  ;;  %v6279_v44 = vld [vmem:[#allocation30_spill] sm:$0xff] }
 0x906   : > { %1929 = vadd.xlane.f32.xlu0 %v1928_v23  ;;  %v1260_v23 = vsub.f32 %v5446_v31, %v6276_v11 }
 0x908   : > { %v1269_v37 = vmul.f32 1.442695, %v1260_v23 }
 0x90a   : > { %1935 = vadd.xlane.f32.xlu0 %v1934_v8  ;;  %v1267_v8 = vmul.f32 1.442695, %v1259_v59  ;;  %v1829_v59 = vsub.f32 %v5451_v17, %v6279_v44 }
 0x90c   : > { %4369 = vpow2.f32 %v1267_v8  ;;  %v1837_v23 = vmul.f32 1.442695, %v1829_v59  ;;  %v6284_v59 = vld [vmem:[#allocation21_spill] sm:$0xff] }
 0x90d   : > { %4371 = vpow2.f32 %v1269_v37 }
 0x90e   : > { %1938 = vadd.xlane.f32.xlu0 %v1937_v45  ;;  %v6277_v45 = vld [vmem:[#allocation18_spill] sm:$0xff] }
 0x910   : > { %1368 = vadd.xlane.f32.xlu1 %v1367_v42  ;;  %v1261_v42 = vsub.f32 %v5481_v9, %v6277_v45 }
 0x912   : > { %1941 = vadd.xlane.f32.xlu0 %v1940_v52  ;;  %v6278_v52 = vld [vmem:[#allocation17_spill] sm:$0xff] }
 0x913   : > { %v1262_v34 = vsub.f32 %v5466_v54, %v6278_v52 }
 0x914   : > { %1374 = vadd.xlane.f32.xlu1 %v1373_v14  ;;  %v1271_v14 = vmul.f32 1.442695, %v1261_v42  ;;  %v1831_v42 = vsub.f32 %v5481_v9, %v5138_v26  ;;  %v6282_v26 = vmov 3  }
 0x915   : > { %v1273_v39 = vmul.f32 1.442695, %v1262_v34  ;;  %v1832_v34 = vsub.f32 %v5466_v54, %v5154_v40  ;;  %v6285_v40 = vmov 2  }
 0x916   : > { %1944 = vadd.xlane.f32.xlu0 %v1943_v55  ;;  %v1263_v55 = vsub.f32 %v5498_v38, %v4975_v6  ;;  %4373 = vpow2.f32 %v1271_v14  ;;  %v1841_v52 = vmul.f32 1.442695, %v1831_v42 }
 0x917   : > { %4375 = vpow2.f32 %v1273_v39  ;;  %v6281_v39 = vld [vmem:[#allocation22_spill] sm:$0xff] }
 0x918   : > { %1932 = vadd.xlane.f32.xlu1 %v1931_v1  ;;  %v1275_v12 = vmul.f32 1.442695, %v1263_v55  ;;  %v5566_v1 = vpop.eup %4369  ;;  %v1843_v55 = vmul.f32 1.442695, %v1832_v34  ;;  %v6286_v34 = vld [vmem:[#allocation31_spill] sm:$0xff] }
 0x919   : > { %v5571_v8 = vpop.eup %4371 }
 0x91a   : > { %1947 = vadd.xlane.f32.xlu0 %v1946_v29  ;;  %4377 = vpow2.f32 %v1275_v12  ;;  %v6280_v29 = vld [vmem:[#allocation29_spill] sm:$0xff]  ;;  %v6283_v12 = vld [vmem:[#allocation16_spill] sm:$0xff] }
 0x91b   : > { %v1830_v11 = vsub.f32 %v5446_v31, %v6280_v29  ;;  %4379 = vpow2.f32 %v1837_v23  ;;  %v1264_v44 = vsub.f32 %v5476_v50, %v6283_v12  ;;  %v6288_v12 = vld [vmem:[#allocation19_spill] sm:$0xff] }
 0x91d   : > { %v1839_v45 = vmul.f32 1.442695, %v1830_v11  ;;  %v1277_v11 = vmul.f32 1.442695, %v1264_v44  ;;  %v1265_v44 = vsub.f32 %v5270_v18, %v6288_v12 }
 0x91f   : > { %4381 = vpow2.f32 %v1839_v45  ;;  %v1833_v45 = vsub.f32 %v5498_v38, %v5157_v56 }
 0x920   : > { %v5574_v6 = vpop.eup %4373  ;;  %4383 = vpow2.f32 %v1841_v52 }
 0x921   : > { %v5578_v37 = vpop.eup %4375  ;;  %4385 = vpow2.f32 %v1843_v55  ;;  %v1845_v52 = vmul.f32 1.442695, %v1833_v45 }
 0x922   : > { %4387 = vpow2.f32 %v1277_v11  ;;  %v2401_v11 = vsub.f32 %v5481_v9, %v5484_v20  ;;  %v1835_v20 = vsub.f32 %v5270_v18, %v5181_v47  ;;  %v1836_v47 = vsub.f32 %v5389_v3, %v5200_v0 }
 0x923   : > { %4389 = vpow2.f32 %v1845_v52  ;;  %v1266_v52 = vsub.f32 %v5389_v3, %v4960_v4 }
 0x924   : > { %v5584_v14 = vpop.eup %4377 }
 0x925   : > { %v5594_v29 = vpop.eup %4379 }
 0x929   : > { %1389 = vperm.xlu1 %4265, %v5566_v1   ;;  %v5600_v23 = vpop.eup %4381 }
 0x92a   : > { %v5607_v42 = vpop.eup %4383 }
 0x92b   : > { %v5614_v55 = vpop.eup %4385 }
 0x92c   : > { %v5625_v45 = vpop.eup %4387 }
 0x92d   : > { %1394 = vperm.xlu1 %4265, %v5571_v8   ;;  %v5635_v9 = vpop.eup %4389 }
 0x930   : > { %1399 = vperm.xlu0 %4266, %v5574_v6  }
 0x931   : > { %1404 = vperm.xlu1 %4265, %v5578_v37  }
 0x934   : > { %1596 = vrot.lane.b32.xlu0 %v6281_v39, %s4510_s22  ;;  %v1834_v39 = vsub.f32 %v5476_v50, %v6286_v34  ;;  %v1279_v34 = vmul.f32 1.442695, %v1265_v44 }
 0x935   : > { %1409 = vperm.xlu1 %4265, %v5584_v14   ;;  %4273 = vset.pattern.permute.xlu0 %v6282_v26 }
 0x936   : > { %v1847_v56 = vmul.f32 1.442695, %v1834_v39 }
 0x938   : > { %1598 = vrot.lane.b32.xlu0 %v6284_v59, %s4510_s22  ;;  %v5618_v59 = vpop.permute.xlu1 %886  ;;  %4391 = vpow2.f32 %v1847_v56  ;;  %v1281_v56 = vmul.f32 1.442695, %v1266_v52  ;;  %v1849_v52 = vmul.f32 1.442695, %v1835_v20 }
 0x939   : > { %4267 = vset.pattern.permute.xlu1 %v6285_v40  ;;  %4393 = vpow2.f32 %v1279_v34 }
 0x93a   : > { %1959 = vperm.xlu1 %4267, %v5594_v29  }
 0x93c   : > { %2166 = vrot.lane.b32.xlu0 %v5353_v22, %s4511_s23  ;;  %v6287_v22 = vld [vmem:[#allocation24_spill] sm:$0xff]  ;;  %v5629_v39 = vpop.xlane.xlu1 %1356 }
 0x93e   : > { %1964 = vperm.xlu1 %4267, %v5600_v23  }
 0x940   : > { %2168 = vrot.lane.b32.xlu0 %v5351_v25, %s4511_s23  ;;  %v6289_v25 = vld [vmem:[#allocation23_spill] sm:$0xff] }
 0x942   : > { %1969 = vperm.xlu1 %4267, %v5607_v42   ;;  %v5645_v34 = vpop.eup %4391 }
 0x944   : > { %1600 = vrot.lane.b32.xlu0 %v6287_v22, %s4510_s22  ;;  %v2411_v22 = vmul.f32 1.442695, %v2401_v11 }
 0x946   : > { %1974 = vperm.xlu1 %4267, %v5614_v55   ;;  %4395 = vpow2.f32 %v2411_v22 }
 0x947   : > { %4397 = vpow2.f32 %v1281_v56  ;;  %v5653_v56 = vpop.eup %4393 }
 0x948   : > { %1602 = vrot.lane.b32.xlu0 %v6289_v25, %s4510_s22 }
 0x94a   : > { %4268 = vset.pattern.permute.xlu1 %v6272_v57 }
 0x94b   : > { %1414 = vperm.xlu1 %4268, %v5625_v45  }
 0x94c   : > { %2170 = vrot.lane.b32.xlu0 %v5357_v5, %s4511_s23 }
 0x94e   : > { %v2431_v12 = vpop.permute.xlu1 %2430 }
 0x94f   : > { %v2464_v4 = vsub.f32 %v5367_v61, %v2431_v12  ;;  %4269 = vset.pattern.permute.xlu1 %v6285_v40  ;;  %v2426_v44 = vpop.permute.xlu0 %2425  ;;  %v6290_v12 = vld [vmem:[#allocation26_spill] sm:$0xff] }
 0x950   : > { %v2463_v25 = vsub.f32 %v5369_v35, %v2426_v44  ;;  %2172 = vrot.lane.b32.xlu0 %v5355_v49, %s4511_s23  ;;  %1979 = vperm.xlu1 %4269, %v5635_v9   ;;  %v1851_v35 = vmul.f32 1.442695, %v1836_v47 }
 0x951   : > { %v2473_v5 = vmul.f32 1.442695, %v2464_v4  ;;  %v6291_v4 = vld [vmem:[#allocation28_spill] sm:$0xff] }
 0x952   : > { %v2471_v11 = vmul.f32 1.442695, %v2463_v25  ;;  %v5660_v25 = vpop.eup %4395 }
 0x953   : > { %v2441_v61 = vpop.permute.xlu1 %2440 }
 0x954   : > { %4399 = vpow2.f32 %v2471_v11  ;;  %1604 = vrot.lane.b32.xlu0 %v6290_v12, %s4510_s22  ;;  %1984 = vperm.xlu1 %4269, %v5645_v34   ;;  %v2466_v49 = vsub.f32 %v5375_v21, %v2441_v61 }
 0x955   : > { %4401 = vpow2.f32 %v2473_v5  ;;  %v5662_v5 = vpop.eup %4397 }
 0x956   : > { %4403 = vpow2.f32 %v1849_v52  ;;  %v2477_v0 = vmul.f32 1.442695, %v2466_v49 }
 0x957   : > { %v2436_v22 = vpop.permute.xlu1 %2435  ;;  %4405 = vpow2.f32 %v1851_v35 }
 0x958   : > { %v2465_v20 = vsub.f32 %v5377_v28, %v2436_v22  ;;  %1608 = vrot.lane.b32.xlu0 %v6291_v4, %s4510_s22  ;;  %4270 = vset.pattern.permute.xlu1 %v6272_v57 }
 0x959   : > { %1419 = vperm.xlu1 %4270, %v5653_v56  }
 0x95a   : > { %v2475_v44 = vmul.f32 1.442695, %v2465_v20  ;;  %v2461_v20 = vpop.permute.xlu0 %2460 }
 0x95b   : > { %v2451_v21 = vpop.permute.xlu1 %2450  ;;  %v2470_v4 = vsub.f32 %v5393_v16, %v2461_v20  ;;  %v6293_v20 = vld [vmem:[#allocation27_spill] sm:$0xff] }
 0x95c   : > { %4407 = vpow2.f32 %v2475_v44  ;;  %2539 = vperm.xlu0 %4273, %v5660_v25   ;;  %v2468_v28 = vsub.f32 %v5381_v46, %v2451_v21 }
 0x95d   : > { %4409 = vpow2.f32 %v2477_v0  ;;  %1424 = vperm.xlu1 %4270, %v5662_v5   ;;  %v6292_v0 = vld [vmem:[#allocation25_spill] sm:$0xff] }
 0x95e   : > { %v4400_v11 = vpop.eup %4399  ;;  %v2481_v49 = vmul.f32 1.442695, %v2468_v28  ;;  %v2485_v28 = vmul.f32 1.442695, %v2470_v4 }
 0x95f   : > { %v4402_v52 = vpop.eup %4401  ;;  %v2446_v47 = vpop.permute.xlu1 %2445  ;;  %3859 = vmatprep.mubr.msk.f32.mxu0 %vm688_vm4, %v4400_v11 }
 0x960   : > { %v2467_v61 = vsub.f32 %v5383_v63, %v2446_v47  ;;  %3860 = vmatmul.mubr.msk.f32.vlgmr.msra.gmra.mrb[40].mxu0 %vm688_vm4, %v4402_v52  ;;  %4275 = vset.pattern.permute.xlu0 %v6272_v57  ;;  %v5671_v12 = vpop.eup %4403  ;;  %v2498_v4 = vsel %vm688_vm4, %v4402_v52, 0.0 }
 0x961   : > { %4271 = vset.pattern.permute.xlu1 %v6285_v40  ;;  %v5675_v46 = vpop.eup %4405 }
 0x962   : > { %v2479_v35 = vmul.f32 1.442695, %v2467_v61  ;;  %1989 = vperm.xlu1 %4271, %v5671_v12  }
 0x964   : > { %4411 = vpow2.f32 %v2479_v35  ;;  %v2400_v35 = vsub.f32 %v5446_v31, %v5449_v41  ;;  %v2402_v41 = vsub.f32 %v5466_v54, %v5469_v7  ;;  %v2495_v54 = vsel %vm688_vm4, %v4400_v11, 0.0 }
 0x965   : > { %4413 = vpow2.f32 %v2481_v49 }
 0x966   : > { %v4408_v22 = vpop.eup %4407  ;;  %1994 = vperm.xlu1 %4271, %v5675_v46   ;;  %v2409_v16 = vmul.f32 1.442695, %v2400_v35 }
 0x967   : > { %v4410_v63 = vpop.eup %4409  ;;  %3862 = vmatprep.mubr.msk.f32.mxu1 %vm688_vm4, %v4408_v22  ;;  %v2501_v11 = vsel %vm688_vm4, %v4408_v22, 0.0 }
 0x968   : > { %3863 = vmatmul.mubr.msk.f32.vlgmr.msra.gmra.mrb[24].mxu1 %vm688_vm4, %v4410_v63 }
 0x96a   : > { %1606 = vrot.lane.b32.xlu1 %v6292_v0, %s4510_s22  ;;  %v2413_v0 = vmul.f32 1.442695, %v2402_v41 }
 0x96b   : > { %v2456_v44 = vpop.permute.xlu1 %2455  ;;  %4272 = vset.pattern.permute.xlu1 %v6282_v26 }
 0x96c   : > { %v2469_v21 = vsub.f32 %v5395_v15, %v2456_v44  ;;  %v2399_v15 = vsub.f32 %v5451_v17, %v5454_v48  ;;  %v2404_v17 = vsub.f32 %v5476_v50, %v5479_v19  ;;  %v2403_v48 = vsub.f32 %v5498_v38, %v5501_v24 }
 0x96d   : > { %v2504_v50 = vsel %vm688_vm4, %v4410_v63, 0.0  ;;  %v2406_v19 = vsub.f32 %v5389_v3, %v5496_v10  ;;  %v2405_v38 = vsub.f32 %v5270_v18, %v5522_v60 }
 0x96e   : > { %v4412_v47 = vpop.eup %4411  ;;  %v2483_v61 = vmul.f32 1.442695, %v2469_v21  ;;  %2174 = vrot.lane.b32.xlu1 %v5361_v51, %s4511_s23  ;;  %v2407_v51 = vmul.f32 1.442695, %v2399_v15  ;;  %v2415_v52 = vmul.f32 1.442695, %v2403_v48 }
 0x96f   : > { %v4414_v49 = vpop.eup %4413  ;;  %3865 = vmatprep.mubr.msk.f32.mxu1 %vm688_vm4, %v4412_v47  ;;  %v2421_v24 = vmul.f32 1.442695, %v2406_v19  ;;  %v2419_v10 = vmul.f32 1.442695, %v2405_v38  ;;  %v2507_v22 = vsel %vm688_vm4, %v4412_v47, 0.0  ;;  %v5749_v15 = vld [vmem:[#allocation4 + $0x28] sm:$0xff] }
 0x970   : > { %4415 = vpow2.f32 %v2483_v61  ;;  %3866 = vmatmul.mubr.msk.f32.gmra.mrb[26].mxu1 %vm688_vm4, %v4414_v49  ;;  %v2510_v3 = vsel %vm688_vm4, %v4414_v49, 0.0  ;;  %v814_v41 = vmul.f32 %v5289_v32, %v5749_v15 }
 0x971   : > { %4417 = vpow2.f32 %v2485_v28 }
 0x972   : > { %2176 = vrot.lane.b32.xlu1 %v5359_v58, %s4511_s23  ;;  %4419 = vpow2.f32 %v2409_v16 }
 0x973   : > { %4421 = vpow2.f32 %v2407_v51 }
 0x974   : > { %4423 = vpow2.f32 %v2413_v0  ;;  %v1922_v0 = vmul.f32 %v5645_v34, %v5749_v15 }
 0x976   : > { %1610 = vrot.lane.b32.xlu1 %v6293_v20, %s4510_s22  ;;  %v1352_v20 = vmul.f32 %v5625_v45, %v5749_v15 }
 0x97a   : > { %v5699_v31 = vpop.eup %4415  ;;  %2178 = vrot.lane.b32.xlu1 %v5365_v43, %s4511_s23  ;;  %v2417_v43 = vmul.f32 1.442695, %v2404_v17  ;;  %v846_v17 = vadd.f32 %v5420_v33, %v814_v41  ;;  %v5791_v41 = vld [vmem:[#allocation5 + $0x8] sm:$0xff] }
 0x97b   : > { %v4418_v58 = vpop.eup %4417  ;;  %2499 = vadd.xlane.f32.xlu0 %v2498_v4  ;;  %3868 = vmatprep.mubr.msk.f32.mxu1 %vm688_vm4, %v5699_v31  ;;  %6297 = vst [vmem:[#allocation18_spill] sm:$0xff] %v5791_v41 }
 0x97c   : > { %3869 = vmatmul.mubr.msk.f32.gmra.mrb[28].mxu1 %vm688_vm4, %v4418_v58  ;;  %v5714_v7 = vpop.eup %4419  ;;  %4425 = vpow2.f32 %v2417_v43  ;;  %v2516_v61 = vsel %vm688_vm4, %v4418_v58, 0.0 }
 0x97d   : > { %4427 = vpow2.f32 %v2415_v52 }
 0x97e   : > { %2180 = vrot.lane.b32.xlu1 %v5363_v30, %s4511_s23  ;;  %v5720_v30 = vpop.eup %4421  ;;  %4429 = vpow2.f32 %v2421_v24 }
 0x97f   : > { %2496 = vadd.xlane.f32.xlu0 %v2495_v54  ;;  %v5726_v63 = vpop.eup %4423  ;;  %4431 = vpow2.f32 %v2419_v10 }
 0x982   : > { %2534 = vperm.xlu1 %4272, %v5714_v7  }
 0x983   : > { %2505 = vadd.xlane.f32.xlu0 %v2504_v50  ;;  %v5767_v50 = vld [vmem:[#allocation4 + $0x38] sm:$0xff] }
 0x984   : > { %v1354_v19 = vmul.f32 %v5662_v5, %v5767_v50  ;;  %v816_v34 = vmul.f32 %v5408_v13, %v5767_v50  ;;  %v1924_v24 = vmul.f32 %v5675_v46, %v5767_v50 }
 0x986   : > { %2529 = vperm.xlu1 %4272, %v5720_v30   ;;  %v5730_v28 = vpop.eup %4425  ;;  %v848_v38 = vadd.f32 %v5422_v27, %v816_v34 }
 0x987   : > { %2502 = vadd.xlane.f32.xlu0 %v2501_v11  ;;  %v1372_v44 = vpop.xlane.xlu0 %1371  ;;  %v5736_v60 = vpop.eup %4427 }
 0x988   : > { %v5742_v35 = vpop.eup %4429  ;;  %v1384_v4 = vadd.f32 %v1372_v44, %v1352_v20 }
 0x989   : > { %v5747_v47 = vpop.eup %4431 }
 0x98a   : > { %2544 = vperm.xlu1 %4272, %v5726_v63   ;;  %6294 = vst [vmem:[#allocation20_spill] sm:$0xff] %v5747_v47  ;;  %v2809_v48 = vsel %vm2768_vm5, %v846_v17, %v1384_v4 }
 0x98b   : > { %2511 = vadd.xlane.f32.xlu0 %v2510_v3  ;;  %v1378_v21 = vpop.xlane.xlu0 %1377 }
 0x98c   : > { %v1386_v33 = vadd.f32 %v1378_v21, %v1354_v19 }
 0x98e   : > { %2554 = vperm.xlu1 %4272, %v5730_v28   ;;  %v2811_v10 = vsel %vm2768_vm5, %v848_v38, %v1386_v33  ;;  %v6300_v38 = vld [vmem:[#allocation6_spill] sm:$0xff] }
 0x98f   : > { %2508 = vadd.xlane.f32.xlu0 %v2507_v22  ;;  %v5734_v18 = vpop.xlane.xlu0 %1926 }
 0x992   : > { %2549 = vperm.xlu1 %4272, %v5736_v60  }
 0x993   : > { %2517 = vadd.xlane.f32.xlu0 %v2516_v61  ;;  %v5740_v49 = vpop.xlane.xlu0 %1929  ;;  %v5787_v61 = vld [vmem:[#allocation5] sm:$0xff] }
 0x994   : > { %6296 = vst [vmem:[#allocation14_spill] sm:$0xff] %v5787_v61  ;;  %v889_v21 = vmul.f32 %v5444_v62, %v5787_v61 }
 0x996   : > { %2564 = vperm.xlu1 %4272, %v5742_v35  }
 0x997   : > { %v5745_v16 = vpop.xlane.xlu0 %1935 }
 0x99a   : > { %2559 = vperm.xlu1 %4272, %v5747_v47   ;;  %v5802_v47 = vld [vmem:[#allocation5 + $0x10] sm:$0xff] }
 0x99b   : > { %v5754_v51 = vpop.xlane.xlu0 %1938  ;;  %6301 = vst [vmem:[#allocation17_spill] sm:$0xff] %v5802_v47 }
 0x99d   : > { %v5758_v58 = vpop.xlane.xlu1 %1368 }
 0x99e   : > { %4274 = vset.pattern.permute.xlu1 %v6253_v36 }
 0x99f   : > { %v1942_v54 = vpop.xlane.xlu0 %1941 }
 0x9a0   : > { %v1954_v43 = vadd.f32 %v1942_v54, %v1922_v0  ;;  %v6298_v0 = vld [vmem:[#allocation7_spill] sm:$0xff]  ;;  %v6299_v54 = vld [vmem:[#allocation40_spill] sm:$0xff] }
 0x9a1   : > { %v5765_v45 = vpop.xlane.xlu1 %1374  ;;  %v1050_v17 = vadd.f32 %v6298_v0, %v889_v21 }
 0x9a2   : > { %v5770_v32 = vsel %vm2777_vm6, %v2809_v48, %v1954_v43  ;;  %v890_v43 = vmul.f32 %v6299_v54, %v5791_v41 }
 0x9a3   : > { %v5774_v52 = vpop.xlane.xlu0 %1944 }
 0x9a4   : > { %6295 = vst [vmem:[#allocation15_spill] sm:$0xff] %v5774_v52  ;;  %v1051_v62 = vadd.f32 %v6300_v38, %v890_v43  ;;  %v6303_v43 = vld [vmem:[#allocation41_spill] sm:$0xff] }
 0x9a5   : > { %v5778_v11 = vpop.xlane.xlu1 %1932 }
 0x9a7   : > { %v1948_v44 = vpop.xlane.xlu0 %1947 }
 0x9a8   : > { %v1956_v3 = vadd.f32 %v1948_v44, %v1924_v24 }
 0x9a9   : > { %v1390_v22 = vpop.permute.xlu1 %1389 }
 0x9aa   : > { %v5785_v5 = vsel %vm2777_vm6, %v2811_v10, %v1956_v3  ;;  %v1427_v27 = vmul.f32 %v1390_v22, %v5787_v61 }
 0x9ad   : > { %v1395_v20 = vpop.permute.xlu1 %1394 }
 0x9ae   : > { %v1428_v34 = vmul.f32 %v1395_v20, %v5791_v41  ;;  %v2513_v20 = vsel %vm688_vm4, %v5699_v31, 0.0 }
 0x9af   : > { %v1400_v13 = vpop.permute.xlu0 %1399 }
 0x9b1   : > { %v1405_v46 = vpop.permute.xlu1 %1404 }
 0x9b3   : > { %v1597_v4 = vpop.permute.xlu0 %1596 }
 0x9b4   : > { %v1620_v48 = vadd.f32 %v1597_v4, %v1427_v27 }
 0x9b5   : > { %v1410_v19 = vpop.permute.xlu1 %1409 }
 0x9b6   : > { %v2836_v33 = vsel %vm534_vm1, %v1050_v17, %v1620_v48  ;;  %v891_v48 = vmul.f32 %v6303_v43, %v5802_v47  ;;  %v6308_v43 = vld [vmem:[#allocation8_spill] sm:$0xff] }
 0x9b7   : > { %v1599_v24 = vpop.permute.xlu0 %1598 }
 0x9b8   : > { %v1621_v44 = vadd.f32 %v1599_v24, %v1428_v34  ;;  %v5812_v24 = vld [vmem:[#allocation5 + $0x18] sm:$0xff] }
 0x9b9   : > { %v1960_v3 = vpop.permute.xlu1 %1959  ;;  %6304 = vst [vmem:[#allocation29_spill] sm:$0xff] %v5812_v24 }
 0x9ba   : > { %v2837_v10 = vsel %vm534_vm1, %v1051_v62, %v1621_v44  ;;  %v1997_v22 = vmul.f32 %v1960_v3, %v5787_v61  ;;  %v1429_v62 = vmul.f32 %v1400_v13, %v5802_v47  ;;  %v6306_v3 = vld [vmem:[#allocation9_spill] sm:$0xff] }
 0x9bb   : > { %v2167_v21 = vpop.permute.xlu0 %2166 }
 0x9bc   : > { %v2190_v0 = vadd.f32 %v2167_v21, %v1997_v22  ;;  %v6307_v22 = vld [vmem:[#allocation43_spill] sm:$0xff] }
 0x9bd   : > { %v1965_v27 = vpop.permute.xlu1 %1964  ;;  %v892_v21 = vmul.f32 %v6307_v22, %v5812_v24  ;;  %v6310_v22 = vld [vmem:[#allocation45_spill] sm:$0xff] }
 0x9be   : > { %v5807_v4 = vsel %vm2844_vm8, %v2836_v33, %v2190_v0  ;;  %v1998_v17 = vmul.f32 %v1965_v27, %v5791_v41  ;;  %2514 = vadd.xlane.f32.xlu1 %v2513_v20  ;;  %v1052_v33 = vadd.f32 %v6306_v3, %v891_v48  ;;  %v1430_v20 = vmul.f32 %v1405_v46, %v5812_v24  ;;  %v5826_v3 = vld [vmem:[#allocation5 + $0x20] sm:$0xff] }
 0x9bf   : > { %6302 = vst [vmem:[#allocation30_spill] sm:$0xff] %v5807_v4  ;;  %v2169_v54 = vpop.permute.xlu0 %2168  ;;  %v1053_v4 = vadd.f32 %v6308_v43, %v892_v21  ;;  %v893_v21 = vmul.f32 %v6310_v22, %v5826_v3  ;;  %v5839_v43 = vld [vmem:[#allocation5 + $0x30] sm:$0xff] }
 0x9c0   : > { %v2191_v34 = vadd.f32 %v2169_v54, %v1998_v17 }
 0x9c1   : > { %v1970_v38 = vpop.permute.xlu1 %1969 }
 0x9c2   : > { %v5816_v44 = vsel %vm2844_vm8, %v2837_v10, %v2191_v34  ;;  %v1999_v13 = vmul.f32 %v1970_v38, %v5802_v47  ;;  %v1431_v38 = vmul.f32 %v1410_v19, %v5826_v3  ;;  %v6314_v19 = vld [vmem:[#allocation13_spill] sm:$0xff] }
 0x9c3   : > { %6305 = vst [vmem:[#allocation22_spill] sm:$0xff] %v5816_v44  ;;  %v1601_v31 = vpop.permute.xlu0 %1600 }
 0x9c4   : > { %v1622_v0 = vadd.f32 %v1601_v31, %v1429_v62 }
 0x9c5   : > { %v1975_v27 = vpop.permute.xlu1 %1974 }
 0x9c6   : > { %v2838_v17 = vsel %vm534_vm1, %v1052_v33, %v1622_v0  ;;  %v2000_v62 = vmul.f32 %v1975_v27, %v5812_v24 }
 0x9c7   : > { %v1603_v54 = vpop.permute.xlu0 %1602 }
 0x9c8   : > { %v1623_v61 = vadd.f32 %v1603_v54, %v1430_v20  ;;  %v6312_v20 = vld [vmem:[#allocation11_spill] sm:$0xff] }
 0x9c9   : > { %v1054_v54 = vadd.f32 %v6312_v20, %v893_v21  ;;  %v5847_v21 = vld [vmem:[#allocation5 + $0x28] sm:$0xff] }
 0x9ca   : > { %v2839_v10 = vsel %vm534_vm1, %v1053_v4, %v1623_v61  ;;  %v1415_v34 = vpop.permute.xlu1 %1414 }
 0x9cb   : > { %v2171_v44 = vpop.permute.xlu0 %2170 }
 0x9cc   : > { %v2192_v48 = vadd.f32 %v2171_v44, %v1999_v13  ;;  %v6313_v13 = vld [vmem:[#allocation49_spill] sm:$0xff] }
 0x9ce   : > { %v5830_v31 = vsel %vm2844_vm8, %v2838_v17, %v2192_v48  ;;  %v895_v48 = vmul.f32 %v6313_v13, %v5839_v43  ;;  %v6316_v13 = vld [vmem:[#allocation10_spill] sm:$0xff] }
 0x9cf   : > { %6309 = vst [vmem:[#allocation16_spill] sm:$0xff] %v5830_v31  ;;  %v1980_v46 = vpop.permute.xlu1 %1979  ;;  %v2173_v33 = vpop.permute.xlu0 %2172 }
 0x9d0   : > { %v2193_v0 = vadd.f32 %v2173_v33, %v2000_v62  ;;  %v1056_v22 = vadd.f32 %v6314_v19, %v895_v48  ;;  %v2001_v41 = vmul.f32 %v1980_v46, %v5826_v3  ;;  %v5855_v19 = vld [vmem:[#allocation5 + $0x38] sm:$0xff] }
 0x9d2   : > { %v5836_v61 = vsel %vm2844_vm8, %v2839_v10, %v2193_v0 }
 0x9d3   : > { %6311 = vst [vmem:[#allocation21_spill] sm:$0xff] %v5836_v61  ;;  %v1985_v4 = vpop.permute.xlu1 %1984  ;;  %v1605_v44 = vpop.permute.xlu0 %1604 }
 0x9d4   : > { %v1624_v27 = vadd.f32 %v1605_v44, %v1431_v38  ;;  %v6315_v38 = vld [vmem:[#allocation47_spill] sm:$0xff] }
 0x9d5   : > { %v894_v44 = vmul.f32 %v6315_v38, %v5847_v21 }
 0x9d6   : > { %v2840_v17 = vsel %vm534_vm1, %v1054_v54, %v1624_v27  ;;  %v1432_v54 = vmul.f32 %v1415_v34, %v5847_v21  ;;  %v896_v34 = vmul.f32 %v5618_v59, %v5855_v19 }
 0x9d7   : > { %v1609_v33 = vpop.permute.xlu0 %1608  ;;  %v1055_v24 = vadd.f32 %v6316_v13, %v894_v44 }
 0x9d8   : > { %v1420_v31 = vpop.permute.xlu1 %1419 }
 0x9d9   : > { %v1433_v62 = vmul.f32 %v1420_v31, %v5839_v43 }
 0x9db   : > { %v1626_v10 = vadd.f32 %v1609_v33, %v1433_v62 }
 0x9dc   : > { %v1425_v0 = vpop.permute.xlu1 %1424 }
 0x9dd   : > { %v2842_v47 = vsel %vm534_vm1, %v1056_v22, %v1626_v10  ;;  %v2002_v22 = vmul.f32 %v1985_v4, %v5847_v21  ;;  %v1434_v44 = vmul.f32 %v1425_v0, %v5855_v19 }
 0x9e1   : > { %v1990_v61 = vpop.permute.xlu1 %1989 }
 0x9e2   : > { %v2003_v13 = vmul.f32 %v1990_v61, %v5839_v43  ;;  %v5879_v61 = vpop.permute.xlu0 %2539 }
 0x9e5   : > { %v1995_v20 = vpop.permute.xlu1 %1994 }
 0x9e9   : > { %v1607_v27 = vpop.permute.xlu1 %1606 }
 0x9ea   : > { %v1625_v31 = vadd.f32 %v1607_v27, %v1432_v54  ;;  %v6317_v54 = vld [vmem:[#allocation12_spill] sm:$0xff] }
 0x9ec   : > { %v2841_v48 = vsel %vm534_vm1, %v1055_v24, %v1625_v31 }
 0x9ed   : > { %v2175_v62 = vpop.permute.xlu1 %2174 }
 0x9ee   : > { %v2194_v33 = vadd.f32 %v2175_v62, %v2001_v41  ;;  %v1057_v41 = vadd.f32 %v6317_v54, %v896_v34  ;;  %v2004_v62 = vmul.f32 %v1995_v20, %v5855_v19  ;;  %v6318_v34 = vld [vmem:[#allocation33_spill] sm:$0xff]  ;;  %v518_v20 = vld [vmem:[#allocation4] sm:$0xff] }
 0x9ef   : > { %v6319_v54 = vld [vmem:[#allocation42_spill] sm:$0xff] }
 0x9f0   : > { %v5859_v10 = vsel %vm2844_vm8, %v2840_v17, %v2194_v33 }
 0x9f1   : > { %v2177_v38 = vpop.permute.xlu1 %2176 }
 0x9f2   : > { %v2195_v52 = vadd.f32 %v2177_v38, %v2002_v22 }
 0x9f4   : > { %v5865_v46 = vsel %vm2844_vm8, %v2841_v48, %v2195_v52  ;;  %v519_v48 = vld [vmem:[#allocation4 + $0x8] sm:$0xff] }
 0x9f5   : > { %v1611_v24 = vpop.permute.xlu1 %1610  ;;  %v1348_v22 = vmul.f32 %v5571_v8, %v519_v48  ;;  %v1918_v38 = vmul.f32 %v5600_v23, %v519_v48 }
 0x9f6   : > { %v1627_v27 = vadd.f32 %v1611_v24, %v1434_v44  ;;  %v810_v44 = vmul.f32 %v6318_v34, %v519_v48 }
 0x9f7   : > { %v1380_v24 = vadd.f32 %v5513_v2, %v1348_v22  ;;  %v521_v2 = vld [vmem:[#allocation4 + $0x18] sm:$0xff]  ;;  %v6321_v22 = vld [vmem:[#allocation38_spill] sm:$0xff] }
 0x9f8   : > { %v2843_v4 = vsel %vm534_vm1, %v1057_v41, %v1627_v27  ;;  %v842_v41 = vadd.f32 %v6319_v54, %v810_v44  ;;  %v1347_v27 = vmul.f32 %v5566_v1, %v518_v20  ;;  %v1350_v1 = vmul.f32 %v5578_v37, %v521_v2  ;;  %v520_v54 = vld [vmem:[#allocation4 + $0x10] sm:$0xff] }
 0x9f9   : > { %v2179_v17 = vpop.permute.xlu1 %2178 }
 0x9fa   : > { %v2196_v31 = vadd.f32 %v2179_v17, %v2003_v13  ;;  %v2488_v13 = vmul.f32 %v5714_v7, %v519_v48  ;;  %v6320_v17 = vld [vmem:[#allocation32_spill] sm:$0xff]  ;;  %v1920_v48 = vmul.f32 %v5614_v55, %v521_v2 }
 0x9fb   : > { %v809_v23 = vmul.f32 %v6320_v17, %v518_v20 }
 0x9fc   : > { %v5872_v59 = vsel %vm2844_vm8, %v2842_v47, %v2196_v31  ;;  %v1950_v47 = vadd.f32 %v5740_v49, %v1918_v38  ;;  %v2805_v31 = vsel %vm2768_vm5, %v842_v41, %v1380_v24  ;;  %v1382_v24 = vadd.f32 %v5519_v53, %v1350_v1 }
 0x9fd   : > { %v2181_v33 = vpop.permute.xlu1 %2180  ;;  %v841_v38 = vadd.f32 %v6321_v22, %v809_v23  ;;  %v1952_v37 = vadd.f32 %v5745_v16, %v1920_v48  ;;  %v6325_v23 = vld [vmem:[#allocation50_spill] sm:$0xff] }
 0x9fe   : > { %v2197_v0 = vadd.f32 %v2181_v33, %v2004_v62  ;;  %v1379_v62 = vadd.f32 %v5629_v39, %v1347_v27  ;;  %v2813_v49 = vsel %vm2777_vm6, %v2805_v31, %v1950_v47  ;;  %v6322_v39 = vld [vmem:[#allocation35_spill] sm:$0xff] }
 0x9ff   : > { %v812_v44 = vmul.f32 %v6322_v39, %v521_v2  ;;  %v6323_v27 = vld [vmem:[#allocation39_spill] sm:$0xff] }
 0xa00   : > { %v5875_v52 = vsel %vm2844_vm8, %v2843_v4, %v2197_v0  ;;  %v1917_v4 = vmul.f32 %v5594_v29, %v518_v20  ;;  %v2487_v29 = vmul.f32 %v5720_v30, %v518_v20  ;;  %v1349_v30 = vmul.f32 %v5574_v6, %v520_v54 }
 0xa01   : > { %v2490_v20 = vmul.f32 %v5726_v63, %v521_v2  ;;  %v522_v2 = vld [vmem:[#allocation4 + $0x20] sm:$0xff] }
 0xa02   : > { %v1949_v0 = vadd.f32 %v5734_v18, %v1917_v4  ;;  %v2804_v18 = vsel %vm2768_vm5, %v841_v38, %v1379_v62  ;;  %v1919_v4 = vmul.f32 %v5607_v42, %v520_v54  ;;  %v1381_v31 = vadd.f32 %v6325_v23, %v1349_v30 }
 0xa03   : > { %v2489_v42 = vmul.f32 %v5660_v25, %v520_v54  ;;  %v2492_v25 = vmul.f32 %v5730_v28, %v5749_v15 }
 0xa04   : > { %v2812_v41 = vsel %vm2777_vm6, %v2804_v18, %v1949_v0  ;;  %v1951_v6 = vadd.f32 %v5778_v11, %v1919_v4  ;;  %v6326_v0 = vld [vmem:[#allocation44_spill] sm:$0xff]  ;;  %v6328_v18 = vld [vmem:[#allocation46_spill] sm:$0xff] }
 0xa05   : > { %v6327_v11 = vld [vmem:[#allocation36_spill] sm:$0xff] }
 0xa08   : > { %v2500_v8 = vpop.xlane.xlu0 %2499 }
 0xa09   : > { %v2520_v33 = vadd.f32 %v2500_v8, %v2488_v13  ;;  %v844_v13 = vadd.f32 %v6323_v27, %v812_v44  ;;  %v6324_v8 = vld [vmem:[#allocation34_spill] sm:$0xff] }
 0xa0a   : > { %v811_v17 = vmul.f32 %v6324_v8, %v520_v54 }
 0xa0b   : > { %v2821_v7 = vsel %vm2786_vm7, %v2813_v49, %v2520_v33  ;;  %v2807_v62 = vsel %vm2768_vm5, %v844_v13, %v1382_v24 }
 0xa0c   : > { %2829 = vst.msk [vmem:[#allocation4 + $0x8] sm:$0xff] %vm469_vm3, %v2821_v7  ;;  %v2497_v34 = vpop.xlane.xlu0 %2496  ;;  %v2815_v33 = vsel %vm2777_vm6, %v2807_v62, %v1952_v37  ;;  %v843_v49 = vadd.f32 %v6326_v0, %v811_v17  ;;  %v1351_v7 = vmul.f32 %v5584_v14, %v522_v2  ;;  %v1921_v14 = vmul.f32 %v5635_v9, %v522_v2 }
 0xa0d   : > { %v2519_v47 = vadd.f32 %v2497_v34, %v2487_v29  ;;  %v813_v34 = vmul.f32 %v6327_v11, %v522_v2 }
 0xa0e   : > { %v2806_v1 = vsel %vm2768_vm5, %v843_v49, %v1381_v31  ;;  %v1383_v39 = vadd.f32 %v5758_v58, %v1351_v7  ;;  %v2491_v58 = vmul.f32 %v5736_v60, %v522_v2  ;;  %v1953_v13 = vadd.f32 %v5754_v51, %v1921_v14  ;;  %v5941_v51 = vpop.permute.xlu1 %2534 }
 0xa0f   : > { %v2820_v55 = vsel %vm2786_vm7, %v2812_v41, %v2519_v47  ;;  %v2814_v48 = vsel %vm2777_vm6, %v2806_v1, %v1951_v6  ;;  %v845_v47 = vadd.f32 %v6328_v18, %v813_v34 }
 0xa10   : > { %2828 = vst.msk [vmem:[#allocation4] sm:$0xff] %vm469_vm3, %v2820_v55  ;;  %v2506_v53 = vpop.xlane.xlu0 %2505 }
 0xa11   : > { %v2522_v16 = vadd.f32 %v2506_v53, %v2490_v20  ;;  %v2808_v41 = vsel %vm2768_vm5, %v845_v47, %v1383_v39  ;;  %v2494_v20 = vmul.f32 %v5742_v35, %v5767_v50  ;;  %v6332_v47 = vld [vmem:[#allocation20_spill] sm:$0xff] }
 0xa12   : > { %v2816_v55 = vsel %vm2777_vm6, %v2808_v41, %v1953_v13  ;;  %v5950_v35 = vpop.permute.xlu1 %2529 }
 0xa13   : > { %v2875_v22 = vld [vmem:[#allocation4 + $0x8] sm:$0xff]  ;;  %v2823_v63 = vsel %vm2786_vm7, %v2815_v33, %v2522_v16 }
 0xa14   : > { %4433 = vrcp.f32 %v2875_v22  ;;  %2831 = vst.msk [vmem:[#allocation4 + $0x18] sm:$0xff] %vm469_vm3, %v2823_v63  ;;  %v2503_v38 = vpop.xlane.xlu0 %2502  ;;  %v524_v63 = vld [vmem:[#allocation4 + $0x30] sm:$0xff] }
 0xa15   : > { %v2521_v29 = vadd.f32 %v2503_v38, %v2489_v42  ;;  %v1353_v38 = vmul.f32 %v5653_v56, %v524_v63  ;;  %v1923_v34 = vmul.f32 %v5671_v12, %v524_v63  ;;  %v6331_v56 = vld [vmem:[#allocation15_spill] sm:$0xff] }
 0xa16   : > { %v5954_v50 = vpop.permute.xlu1 %2544 }
 0xa17   : > { %v2822_v44 = vsel %vm2786_vm7, %v2814_v48, %v2521_v29  ;;  %v2874_v37 = vld [vmem:[#allocation4] sm:$0xff]  ;;  %v6329_v29 = vld [vmem:[#allocation37_spill] sm:$0xff]  ;;  %v1385_v11 = vadd.f32 %v5765_v45, %v1353_v38 }
 0xa18   : > { %2830 = vst.msk [vmem:[#allocation4 + $0x10] sm:$0xff] %vm469_vm3, %v2822_v44  ;;  %v2512_v24 = vpop.xlane.xlu0 %2511  ;;  %4435 = vrcp.f32 %v2874_v37  ;;  %v815_v48 = vmul.f32 %v6329_v29, %v524_v63  ;;  %v6330_v44 = vld [vmem:[#allocation48_spill] sm:$0xff] }
 0xa19   : > { %v2524_v54 = vadd.f32 %v2512_v24, %v2492_v25  ;;  %v1955_v24 = vadd.f32 %v6331_v56, %v1923_v34  ;;  %v6333_v56 = vld [vmem:[#allocation18_spill] sm:$0xff] }
 0xa1a   : > { %v5962_v62 = vpop.permute.xlu1 %2554  ;;  %v847_v25 = vadd.f32 %v6330_v44, %v815_v48 }
 0xa1b   : > { %v2825_v27 = vsel %vm2786_vm7, %v5770_v32, %v2524_v54  ;;  %v2877_v53 = vld [vmem:[#allocation4 + $0x18] sm:$0xff]  ;;  %v2493_v54 = vmul.f32 %v6332_v47, %v524_v63 }
 0xa1c   : > { %2833 = vst.msk [vmem:[#allocation4 + $0x28] sm:$0xff] %vm469_vm3, %v2825_v27  ;;  %v2509_v28 = vpop.xlane.xlu0 %2508  ;;  %4437 = vrcp.f32 %v2877_v53  ;;  %v2810_v18 = vsel %vm2768_vm5, %v847_v25, %v1385_v11 }
 0xa1d   : > { %v2523_v15 = vadd.f32 %v2509_v28, %v2491_v58  ;;  %v2818_v12 = vsel %vm2777_vm6, %v2810_v18, %v1955_v24  ;;  %v2568_v24 = vmul.f32 %v5941_v51, %v6333_v56 }
 0xa1e   : > { %v4434_v30 = vpop.eup %4433  ;;  %v5966_v33 = vpop.permute.xlu1 %2549 }
 0xa1f   : > { %v2824_v9 = vsel %vm2786_vm7, %v2816_v55, %v2523_v15  ;;  %2951 = vperm.xlu0 %4275, %v4434_v30   ;;  %2905 = vperm.xlu1 %4274, %v4434_v30   ;;  %v3091_v55 = vld [vmem:[%s6193_s3 + $0x8] sm:$0xff] }
 0xa20   : > { %2832 = vst.msk [vmem:[#allocation4 + $0x20] sm:$0xff] %vm469_vm3, %v2824_v9  ;;  %v2518_v60 = vpop.xlane.xlu0 %2517  ;;  %v3093_v9 = vld [vmem:[%s6193_s3 + $0x18] sm:$0xff] }
 0xa21   : > { %v2526_v32 = vadd.f32 %v2518_v60, %v2494_v20 }
 0xa22   : > { %v4436_v8 = vpop.eup %4435  ;;  %v5974_v22 = vpop.permute.xlu1 %2564 }
 0xa23   : > { %v2827_v4 = vsel %vm2786_vm7, %v5785_v5, %v2526_v32  ;;  %4277 = vset.pattern.permute.xlu0 %v6282_v26  ;;  %4276 = vset.pattern.permute.xlu1 %v6285_v40  ;;  %v2876_v5 = vld [vmem:[#allocation4 + $0x10] sm:$0xff]  ;;  %v2879_v16 = vld [vmem:[#allocation4 + $0x28] sm:$0xff] }
 0xa24   : > { %2835 = vst.msk [vmem:[#allocation4 + $0x38] sm:$0xff] %vm469_vm3, %v2827_v4  ;;  %3031 = vperm.xlu0 %4277, %v4434_v30   ;;  %2991 = vperm.xlu1 %4276, %v4434_v30   ;;  %4439 = vrcp.f32 %v2876_v5 }
 0xa25   : > { %4441 = vrcp.f32 %v2879_v16 }
 0xa26   : > { %v4438_v17 = vpop.eup %4437  ;;  %v5984_v39 = vpop.permute.xlu1 %2559 }
 0xa27   : > { %v2878_v42 = vld [vmem:[#allocation4 + $0x20] sm:$0xff] }
 0xa28   : > { %4279 = vset.pattern.permute.xlu0 %v6272_v57  ;;  %4278 = vset.pattern.permute.xlu1 %v6253_v36  ;;  %4443 = vrcp.f32 %v2878_v42 }
 0xa29   : > { %2947 = vperm.xlu0 %4279, %v4436_v8   ;;  %2900 = vperm.xlu1 %4278, %v4436_v8  }
 0xa2b   : > { %v2881_v13 = vld [vmem:[#allocation4 + $0x38] sm:$0xff] }
 0xa2c   : > { %4445 = vrcp.f32 %v2881_v13 }
 0xa2d   : > { %4281 = vset.pattern.permute.xlu0 %v6282_v26  ;;  %4280 = vset.pattern.permute.xlu1 %v6285_v40 }
 0xa2e   : > { %3027 = vperm.xlu0 %4281, %v4436_v8   ;;  %2987 = vperm.xlu1 %4280, %v4436_v8   ;;  %v4440_v0 = vpop.eup %4439 }
 0xa2f   : > { %v4442_v7 = vpop.eup %4441 }
 0xa32   : > { %4283 = vset.pattern.permute.xlu0 %v6272_v57  ;;  %4282 = vset.pattern.permute.xlu1 %v6253_v36  ;;  %v4444_v27 = vpop.eup %4443 }
 0xa33   : > { %v5958_v23 = vpop.f32.mrb[40].mxu0  ;;  %2959 = vperm.xlu0 %4283, %v4438_v17   ;;  %2915 = vperm.xlu1 %4282, %v4438_v17  }
 0xa34   : > { %v5960_v31 = vpop.f32.mrb[41].mxu0 }
 0xa36   : > { %v4446_v15 = vpop.eup %4445 }
 0xa37   : > { %4285 = vset.pattern.permute.xlu0 %v6282_v26  ;;  %4284 = vset.pattern.permute.xlu1 %v6285_v40 }
 0xa38   : > { %3039 = vperm.xlu0 %4285, %v4438_v17   ;;  %2999 = vperm.xlu1 %4284, %v4438_v17  }
 0xa3b   : > { %v5968_v6 = vpop.f32.mrb[24].mxu1 }
 0xa3c   : > { %v5970_v49 = vpop.f32.mrb[25].mxu1  ;;  %4287 = vset.pattern.permute.xlu0 %v6272_v57  ;;  %4286 = vset.pattern.permute.xlu1 %v6253_v36 }
 0xa3d   : > { %2955 = vperm.xlu0 %4287, %v4440_v0   ;;  %2910 = vperm.xlu1 %4286, %v4440_v0  }
 0xa41   : > { %4289 = vset.pattern.permute.xlu0 %v6282_v26  ;;  %4288 = vset.pattern.permute.xlu1 %v6285_v40 }
 0xa42   : > { %3035 = vperm.xlu0 %4289, %v4440_v0   ;;  %2995 = vperm.xlu1 %4288, %v4440_v0  }
 0xa43   : > { %v3867_v2 = vpop.f32.mrb[26].mxu1 }
 0xa44   : > { %v2709_v1 = vpop.f32.mrb[27].mxu1 }
 0xa46   : > { %4291 = vset.pattern.permute.xlu0 %v6272_v57  ;;  %4290 = vset.pattern.permute.xlu1 %v6253_v36 }
 0xa47   : > { %2967 = vperm.xlu0 %4291, %v4442_v7   ;;  %2925 = vperm.xlu1 %4290, %v4442_v7  }
 0xa4b   : > { %v2515_v45 = vpop.xlane.xlu1 %2514  ;;  %4292 = vset.pattern.permute.xlu0 %v6285_v40  ;;  %4293 = vset.pattern.permute.xlu1 %v6282_v26 }
 0xa4c   : > { %v2525_v14 = vadd.f32 %v2515_v45, %v2493_v54  ;;  %3007 = vperm.xlu0 %4292, %v4442_v7   ;;  %3047 = vperm.xlu1 %4293, %v4442_v7   ;;  %v6334_v45 = vld [vmem:[#allocation29_spill] sm:$0xff] }
 0xa4e   : > { %v2826_v41 = vsel %vm2786_vm7, %v2818_v12, %v2525_v14  ;;  %v2570_v14 = vmul.f32 %v5954_v50, %v6334_v45  ;;  %v6335_v12 = vld [vmem:[#allocation14_spill] sm:$0xff] }
 0xa4f   : > { %2834 = vst.msk [vmem:[#allocation4 + $0x30] sm:$0xff] %vm469_vm3, %v2826_v41  ;;  %v3870_v37 = vpop.f32.mrb[28].mxu1  ;;  %v2567_v41 = vmul.f32 %v5950_v35, %v6335_v12  ;;  %v6339_v35 = vld [vmem:[#allocation30_spill] sm:$0xff] }
 0xa50   : > { %v2719_v58 = vpop.f32.mrb[29].mxu1  ;;  %4295 = vset.pattern.permute.xlu0 %v6272_v57  ;;  %4294 = vset.pattern.permute.xlu1 %v6253_v36 }
 0xa51   : > { %2963 = vperm.xlu0 %4295, %v4444_v27   ;;  %2920 = vperm.xlu1 %4294, %v4444_v27  }
 0xa55   : > { %4296 = vset.pattern.permute.xlu1 %v6285_v40  ;;  %4299 = vset.pattern.permute.xlu0 %v6253_v36 }
 0xa56   : > { %v2880_v28 = vld [vmem:[#allocation4 + $0x30] sm:$0xff]  ;;  %3003 = vperm.xlu1 %4296, %v4444_v27  }
 0xa57   : > { %4447 = vrcp.f32 %v2880_v28 }
 0xa5a   : > { %4297 = vset.pattern.permute.xlu1 %v6282_v26 }
 0xa5b   : > { %3043 = vperm.xlu1 %4297, %v4444_v27  }
 0xa5f   : > { %4298 = vset.pattern.permute.xlu1 %v6253_v36  ;;  %v3090_v36 = vld [vmem:[%s6193_s3] sm:$0xff] }
 0xa60   : > { %2935 = vperm.xlu1 %4298, %v4446_v15  }
 0xa61   : > { %v4448_v30 = vpop.eup %4447 }
 0xa62   : > { %2930 = vperm.xlu0 %4299, %v4448_v30  }
 0xa64   : > { %4300 = vset.pattern.permute.xlu1 %v6272_v57 }
 0xa65   : > { %2971 = vperm.xlu1 %4300, %v4448_v30  }
 0xa66   : > { %2738 = vrot.lane.b32.xlu0 %v5958_v23, %s4512_s24 }
 0xa67   : > { %4301 = vset.pattern.permute.xlu0 %v6272_v57  ;;  %v4059_v57 = vpack.c.bf16 %v3091_v55, %v3090_v36  ;;  %v6338_v55 = vld [vmem:[#allocation17_spill] sm:$0xff] }
 0xa68   : > { %v2569_v50 = vmul.f32 %v5879_v61, %v6338_v55  ;;  %v2571_v61 = vmul.f32 %v5966_v33, %v5826_v3 }
 0xa69   : > { %2742 = vrot.lane.b32.xlu1 %v5968_v6, %s4512_s24  ;;  %4060 = vmatprep.subr.bf16.mxu1 %v4059_v57 }
 0xa6a   : > { %2736 = vrot.lane.b32.xlu0 %v5960_v31, %s4512_s24  ;;  %4302 = vset.pattern.permute.xlu1 %v6285_v40  ;;  %v3092_v40 = vld [vmem:[%s6193_s3 + $0x10] sm:$0xff] }
 0xa6b   : > { %4062 = vmatpush3.bf16.msra.mxu1 %v4059_v57  ;;  %v4063_v20 = vpack.c.bf16 %v3093_v9, %v3092_v40 }
 0xa6d   : > { %2746 = vrot.lane.b32.xlu1 %v3867_v2, %s4512_s24  ;;  %4064 = vmatprep.subr.bf16.mxu1 %v4063_v20 }
 0xa6e   : > { %2740 = vrot.lane.b32.xlu0 %v5970_v49, %s4512_s24 }
 0xa6f   : > { %4066 = vmatpush3.bf16.msra.mxu1 %v4063_v20 }
 0xa71   : > { %2750 = vrot.lane.b32.xlu1 %v3870_v37, %s4512_s24  ;;  %v6336_v37 = vld [vmem:[#allocation22_spill] sm:$0xff] }
 0xa72   : > { %2744 = vrot.lane.b32.xlu0 %v2709_v1, %s4512_s24 }
 0xa75   : > { %3011 = vperm.xlu1 %4302, %v4448_v30  }
 0xa76   : > { %2748 = vrot.lane.b32.xlu0 %v2719_v58, %s4512_s24 }
 0xa79   : > { %3015 = vperm.xlu1 %4302, %v4446_v15  }
 0xa7a   : > { %2975 = vperm.xlu0 %4301, %v4446_v15  }
 0xa7d   : > { %4304 = vset.pattern.permute.xlu1 %v6282_v26 }
 0xa7e   : > { %4303 = vset.pattern.permute.xlu0 %v6282_v26  ;;  %3055 = vperm.xlu1 %4304, %v4446_v15   ;;  %v2572_v15 = vmul.f32 %v5962_v62, %v5847_v21  ;;  %v2574_v21 = vmul.f32 %v5974_v22, %v5855_v19 }
 0xa7f   : > { %3051 = vperm.xlu0 %4303, %v4448_v30   ;;  %v6337_v30 = vld [vmem:[#allocation21_spill] sm:$0xff] }
 0xa9e   : > { %v2906_v60 = vpop.permute.xlu1 %2905  ;;  %v2952_v32 = vpop.permute.xlu0 %2951 }
 0xaa3   : > { %v6022_v4 = vpop.permute.xlu1 %2991  ;;  %v6024_v53 = vpop.permute.xlu0 %3031 }
 0xaa8   : > { %v6026_v8 = vpop.permute.xlu1 %2900  ;;  %v6028_v5 = vpop.permute.xlu0 %2947 }
 0xaad   : > { %v6030_v17 = vpop.permute.xlu1 %2987  ;;  %v6034_v31 = vpop.permute.xlu0 %3027 }
 0xab2   : > { %v6032_v23 = vpop.permute.xlu1 %2915  ;;  %v2960_v26 = vpop.permute.xlu0 %2959 }
 0xab7   : > { %v6036_v16 = vpop.permute.xlu1 %2999  ;;  %v6040_v0 = vpop.permute.xlu0 %3039 }
 0xabc   : > { %v6038_v6 = vpop.permute.xlu1 %2910  ;;  %v6044_v63 = vpop.permute.xlu0 %2955 }
 0xac1   : > { %v6042_v49 = vpop.permute.xlu1 %2995  ;;  %v6048_v2 = vpop.permute.xlu0 %3035 }
 0xac6   : > { %v6046_v42 = vpop.permute.xlu1 %2925  ;;  %v6054_v7 = vpop.permute.xlu0 %2967 }
 0xacb   : > { %v6050_v38 = vpop.permute.xlu1 %3047  ;;  %v6058_v48 = vpop.permute.xlu0 %3007 }
 0xad0   : > { %v6052_v1 = vpop.permute.xlu1 %2920  ;;  %v6062_v34 = vpop.permute.xlu0 %2963 }
 0xad5   : > { %v6056_v29 = vpop.permute.xlu1 %3003 }
 0xada   : > { %v6060_v11 = vpop.permute.xlu1 %3043 }
 0xadf   : > { %v6064_v44 = vpop.permute.xlu1 %2935 }
 0xae1   : > { %v6066_v25 = vpop.permute.xlu0 %2930 }
 0xae4   : > { %v6070_v18 = vpop.permute.xlu1 %2971 }
 0xae5   : > { %v2739_v47 = vpop.permute.xlu0 %2738 }
 0xae6   : > { %v2761_v54 = vadd.f32 %v2739_v47, %v2568_v24  ;;  %v6340_v24 = vld [vmem:[#allocation16_spill] sm:$0xff] }
 0xae8   : > { %v2855_v27 = vsel %vm2853_vm9, %v6336_v37, %v2761_v54  ;;  %v2743_v58 = vpop.permute.xlu1 %2742 }
 0xae9   : > { %2864 = vst.msk [vmem:[#allocation5 + $0x8] sm:$0xff] %vm323_vm0, %v2855_v27  ;;  %v2763_v13 = vadd.f32 %v2743_v58, %v2570_v14  ;;  %v2737_v28 = vpop.permute.xlu0 %2736 }
 0xaea   : > { %v2760_v51 = vadd.f32 %v2737_v28, %v2567_v41 }
 0xaeb   : > { %v2857_v36 = vsel %vm2853_vm9, %v6337_v30, %v2763_v13 }
 0xaec   : > { %2866 = vst.msk [vmem:[#allocation5 + $0x18] sm:$0xff] %vm323_vm0, %v2857_v36  ;;  %v2854_v57 = vsel %vm2853_vm9, %v6339_v35, %v2760_v51  ;;  %v2747_v40 = vpop.permute.xlu1 %2746 }
 0xaed   : > { %2863 = vst.msk [vmem:[#allocation5] sm:$0xff] %vm323_vm0, %v2854_v57  ;;  %v2765_v9 = vadd.f32 %v2747_v40, %v2572_v15  ;;  %v2741_v20 = vpop.permute.xlu0 %2740 }
 0xaee   : > { %v2762_v56 = vadd.f32 %v2741_v20, %v2569_v50 }
 0xaef   : > { %v2859_v62 = vsel %vm2853_vm9, %v5865_v46, %v2765_v9  ;;  %v2573_v46 = vmul.f32 %v5984_v39, %v5839_v43 }
 0xaf0   : > { %2868 = vst.msk [vmem:[#allocation5 + $0x28] sm:$0xff] %vm323_vm0, %v2859_v62  ;;  %v2856_v47 = vsel %vm2853_vm9, %v6340_v24, %v2762_v56  ;;  %v2751_v54 = vpop.permute.xlu1 %2750  ;;  %v2891_v45 = vld [vmem:[#allocation5 + $0x8] sm:$0xff] }
 0xaf1   : > { %2865 = vst.msk [vmem:[#allocation5 + $0x10] sm:$0xff] %vm323_vm0, %v2856_v47  ;;  %v2767_v14 = vadd.f32 %v2751_v54, %v2574_v21  ;;  %v2745_v12 = vpop.permute.xlu0 %2744  ;;  %v2939_v41 = vmul.f32 %v2906_v60, %v2891_v45  ;;  %v2979_v37 = vmul.f32 %v2952_v32, %v2891_v45  ;;  %v3019_v33 = vmul.f32 %v6022_v4, %v2891_v45 }
 0xaf2   : > { %v2764_v19 = vadd.f32 %v2745_v12, %v2571_v61 }
 0xaf3   : > { %v2861_v3 = vsel %vm2853_vm9, %v5875_v52, %v2767_v14  ;;  %v2893_v22 = vld [vmem:[#allocation5 + $0x18] sm:$0xff]  ;;  %v3067_v60 = vsel %vm534_vm1, %v2939_v41, %v2979_v37 }
 0xaf4   : > { %2870 = vst.msk [vmem:[#allocation5 + $0x38] sm:$0xff] %vm323_vm0, %v2861_v3  ;;  %v2858_v27 = vsel %vm2853_vm9, %v5859_v10, %v2764_v19  ;;  %v3012_v58 = vpop.permute.xlu1 %3011  ;;  %v2890_v13 = vld [vmem:[#allocation5] sm:$0xff]  ;;  %v2941_v32 = vmul.f32 %v6032_v23, %v2893_v22  ;;  %v2981_v28 = vmul.f32 %v2960_v26, %v2893_v22  ;;  %v3075_v30 = vsel %vm2844_vm8, %v3067_v60, %v3019_v33 }
 0xaf5   : > { %2867 = vst.msk [vmem:[#allocation5 + $0x20] sm:$0xff] %vm323_vm0, %v2858_v27  ;;  %v2749_v43 = vpop.permute.xlu0 %2748  ;;  %v2938_v52 = vmul.f32 %v6026_v8, %v2890_v13  ;;  %v2978_v39 = vmul.f32 %v6028_v5, %v2890_v13  ;;  %v3018_v4 = vmul.f32 %v6030_v17, %v2890_v13  ;;  %v3058_v15 = vmul.f32 %v6034_v31, %v2890_v13 }
 0xaf6   : > { %v2766_v51 = vadd.f32 %v2749_v43, %v2573_v46  ;;  %v3021_v36 = vmul.f32 %v6036_v16, %v2893_v22  ;;  %v3059_v8 = vmul.f32 %v6024_v53, %v2891_v45  ;;  %v3069_v17 = vsel %vm534_vm1, %v2941_v32, %v2981_v28  ;;  %v3461_v32 = vld [vmem:[%s6194_s4] ss:$0 sm:$0xff] }
 0xaf7   : > { %v3066_v10 = vsel %vm534_vm1, %v2938_v52, %v2978_v39  ;;  %v2895_v23 = vld [vmem:[#allocation5 + $0x28] sm:$0xff] }
 0xaf8   : > { %v2860_v26 = vsel %vm2853_vm9, %v5872_v59, %v2766_v51  ;;  %v3074_v55 = vsel %vm2844_vm8, %v3066_v10, %v3018_v4  ;;  %v2892_v5 = vld [vmem:[#allocation5 + $0x10] sm:$0xff]  ;;  %v3016_v57 = vpop.permute.xlu1 %3015  ;;  %v3083_v59 = vsel %vm2853_vm9, %v3075_v30, %v3059_v8  ;;  %v2943_v53 = vmul.f32 %v6046_v42, %v2895_v23 }
 0xaf9   : > { %2869 = vst.msk [vmem:[#allocation5 + $0x30] sm:$0xff] %vm323_vm0, %v2860_v26  ;;  %v3082_v31 = vsel %vm2853_vm9, %v3074_v55, %v3058_v15  ;;  %v2940_v50 = vmul.f32 %v6038_v6, %v2892_v5  ;;  %v2980_v35 = vmul.f32 %v6044_v63, %v2892_v5  ;;  %v3020_v16 = vmul.f32 %v6042_v49, %v2892_v5  ;;  %v2976_v20 = vpop.permute.xlu0 %2975 }
 0xafa   : > { %3879 = vmatprep.mubr.msk.f32.mxu1 %vm323_vm0, %v3082_v31  ;;  %v2983_v40 = vmul.f32 %v6054_v7, %v2895_v23  ;;  %v3060_v56 = vmul.f32 %v6048_v2, %v2892_v5  ;;  %v3061_v63 = vmul.f32 %v6040_v0, %v2893_v22  ;;  %v3077_v49 = vsel %vm2844_vm8, %v3069_v17, %v3021_v36 }
 0xafb   : > { %v2897_v9 = vld [vmem:[#allocation5 + $0x38] sm:$0xff]  ;;  %3880 = vmatmul.mubr.msk.f32.vlgmr.msra.gmra.mrb[30].mxu1 %vm323_vm0, %v3083_v59  ;;  %v3068_v6 = vsel %vm534_vm1, %v2940_v50, %v2980_v35  ;;  %v3023_v7 = vmul.f32 %v6058_v48, %v2895_v23  ;;  %v3063_v48 = vmul.f32 %v6050_v38, %v2895_v23 }
 0xafc   : > { %v2945_v21 = vmul.f32 %v6064_v44, %v2897_v9  ;;  %v2985_v62 = vmul.f32 %v2976_v20, %v2897_v9  ;;  %v3076_v61 = vsel %vm2844_vm8, %v3068_v6, %v3020_v16  ;;  %v2894_v42 = vld [vmem:[#allocation5 + $0x20] sm:$0xff]  ;;  %v3085_v0 = vsel %vm2853_vm9, %v3077_v49, %v3061_v63 }
 0xafd   : > { %v3084_v24 = vsel %vm2853_vm9, %v3076_v61, %v3060_v56  ;;  %v2942_v47 = vmul.f32 %v6052_v1, %v2894_v42  ;;  %v2982_v2 = vmul.f32 %v6062_v34, %v2894_v42  ;;  %v3022_v54 = vmul.f32 %v6056_v29, %v2894_v42  ;;  %v3056_v12 = vpop.permute.xlu1 %3055 }
 0xafe   : > { %3882 = vmatprep.mubr.msk.f32.mxu1 %vm323_vm0, %v3084_v24  ;;  %v3071_v44 = vsel %vm534_vm1, %v2943_v53, %v2983_v40  ;;  %v3025_v14 = vmul.f32 %v3016_v57, %v2897_v9  ;;  %v3062_v1 = vmul.f32 %v6060_v11, %v2894_v42  ;;  %v3073_v37 = vsel %vm534_vm1, %v2945_v21, %v2985_v62  ;;  %v3052_v33 = vpop.permute.xlu0 %3051 }
 0xaff   : > { %3883 = vmatmul.mubr.msk.f32.gmra.mrb[32].mxu1 %vm323_vm0, %v3085_v0  ;;  %v3070_v45 = vsel %vm534_vm1, %v2942_v47, %v2982_v2  ;;  %v3079_v29 = vsel %vm2844_vm8, %v3071_v44, %v3023_v7  ;;  %v3065_v22 = vmul.f32 %v3056_v12, %v2897_v9 }
 0xb00   : > { %v2896_v41 = vld [vmem:[#allocation5 + $0x30] sm:$0xff]  ;;  %v3078_v34 = vsel %vm2844_vm8, %v3070_v45, %v3022_v54  ;;  %v3087_v11 = vsel %vm2853_vm9, %v3079_v29, %v3063_v48 }
 0xb01   : > { %v2944_v19 = vmul.f32 %v6066_v25, %v2896_v41  ;;  %v2984_v46 = vmul.f32 %v6070_v18, %v2896_v41  ;;  %v3024_v3 = vmul.f32 %v3012_v58, %v2896_v41  ;;  %v3086_v38 = vsel %vm2853_vm9, %v3078_v34, %v3062_v1 }
 0xb02   : > { %v3064_v27 = vmul.f32 %v3052_v33, %v2896_v41  ;;  %3885 = vmatprep.mubr.msk.f32.mxu1 %vm323_vm0, %v3086_v38  ;;  %v3081_v25 = vsel %vm2844_vm8, %v3073_v37, %v3025_v14 }
 0xb03   : > { %v3072_v13 = vsel %vm534_vm1, %v2944_v19, %v2984_v46  ;;  %3886 = vmatmul.mubr.msk.f32.gmra.mrb[34].mxu1 %vm323_vm0, %v3087_v11  ;;  %v3089_v58 = vsel %vm2853_vm9, %v3081_v25, %v3065_v22 }
 0xb04   : > { %v3080_v60 = vsel %vm2844_vm8, %v3072_v13, %v3024_v3 }
 0xb05   : > { %v3088_v18 = vsel %vm2853_vm9, %v3080_v60, %v3064_v27 }
 0xb06   : > { %3888 = vmatprep.mubr.msk.f32.mxu1 %vm323_vm0, %v3088_v18 }
 0xb07   : > { %3889 = vmatmul.mubr.msk.f32.gmra.mrb[36].mxu1 %vm323_vm0, %v3089_v58 }
 0xbce   : > { %v3881_v28 = vpop.f32.mrb[30].mxu1 }
 0xbcf   : > { %v3197_v43 = vadd.f32 %v3881_v28, %v3461_v32  ;;  %v3191_v52 = vpop.f32.mrb[31].mxu1 }
 0xbd0   : > { %v3192_v39 = vadd.f32 %v3461_v32, %v3191_v52 }
 0xbd1   : > { %3231 = vst.msk [vmem:[%s305_s13 + $0x8] sm:$0xff] %vm323_vm0, %v3197_v43 }
 0xbd2   : > { %3230 = vst.msk [vmem:[%s305_s13] sm:$0xff] %vm323_vm0, %v3192_v39  ;;  %v3884_v4 = vpop.f32.mrb[32].mxu1 }
 0xbd3   : > { %v3207_v51 = vadd.f32 %v3884_v4, %v3461_v32  ;;  %v3201_v15 = vpop.f32.mrb[33].mxu1 }
 0xbd4   : > { %v3202_v10 = vadd.f32 %v3461_v32, %v3201_v15 }
 0xbd5   : > { %3233 = vst.msk [vmem:[%s305_s13 + $0x18] sm:$0xff] %vm323_vm0, %v3207_v51 }
 0xbd6   : > { %3232 = vst.msk [vmem:[%s305_s13 + $0x10] sm:$0xff] %vm323_vm0, %v3202_v10  ;;  %v3887_v30 = vpop.f32.mrb[34].mxu1 }
 0xbd7   : > { %v3217_v36 = vadd.f32 %v3887_v30, %v3461_v32  ;;  %v3211_v23 = vpop.f32.mrb[35].mxu1 }
 0xbd8   : > { %v3212_v26 = vadd.f32 %v3461_v32, %v3211_v23 }
 0xbd9   : > { %3235 = vst.msk [vmem:[%s305_s13 + $0x28] sm:$0xff] %vm323_vm0, %v3217_v36 }
 0xbda   : > { %3234 = vst.msk [vmem:[%s305_s13 + $0x20] sm:$0xff] %vm323_vm0, %v3212_v26  ;;  %v3890_v55 = vpop.f32.mrb[36].mxu1 }
 0xbdb   : > { %v3227_v8 = vadd.f32 %v3890_v55, %v3461_v32  ;;  %v3221_v5 = vpop.f32.mrb[37].mxu1 }
 0xbdc   : > { %v3222_v17 = vadd.f32 %v3461_v32, %v3221_v5 }
 0xbdd   : > { %3237 = vst.msk [vmem:[%s305_s13 + $0x38] sm:$0xff] %vm323_vm0, %v3227_v8 }
 0xbde   : > { %3236 = vst.msk [vmem:[%s305_s13 + $0x30] sm:$0xff] %vm323_vm0, %v3222_v17 }
 0xbdf PF: > { %s15_s20 = sadd.s32 1, %s4495_s20   ;;  %s6341_s18 = smov %s4491_s19 }
 0xbe0   : > { %p12_p5 = scmp.ge.s32.totalorder %s15_s20, 4   ;;  %s6342_s19 = smov %s6344_s21 }
 0xbe2   :  { %14 = sbr.rel (!%p12_p5) target bundleno = 2 (0x2), region = 81 }

</bundles_post_ra>
